<compile_context>
chip_gen: v7x
topology: tpu7x:2x2x1
jax: 0.10.0
libtpu: 0.0.40
codegen_flags: <defaults>
</compile_context>

<pallas_src>
import jax
import jax.numpy as jnp
from jax.experimental import pallas as pl
from jax.experimental.pallas import tpu as pltpu

EPS = 1e-5


def _round_up(x, m):
    return ((x + m - 1) // m) * m


def _make_kernel(H, W, Cin_p, Cout_p, stride, Ho, Wo, use_sc):
    """Fused residual-block kernel for one batch element (batch dim squeezed)."""
    rows = Ho * Wo

    def conv3x3(load_tap, w_ref, cin):
        # 9-tap shift-and-matmul; each tap is a (rows, cin) x (cin, Cout_p)
        # MXU matmul with f32 accumulation.  Taps are read straight from the
        # source ref so only one patch + the accumulator are live at a time.
        acc = None
        for k in range(9):
            kh, kw = divmod(k, 3)
            patch = load_tap(kh, kw)
            t = jnp.dot(patch.reshape(rows, cin), w_ref[k],
                        preferred_element_type=jnp.float32)
            acc = t if acc is None else acc + t
        return acc  # (rows, Cout_p)

    def kernel(*refs):
        if use_sc:
            (x_ref, w1_ref, b1_ref, w2_ref, b2_ref,
             wsc_ref, bsc_ref, out_ref, pad_scr) = refs
        else:
            (x_ref, w1_ref, b1_ref, w2_ref, b2_ref,
             out_ref, pad_scr) = refs

        def load_x_tap(kh, kw):
            # Tap patch of the (spatially pre-padded) input, honoring stride.
            if stride == 1:
                return x_ref[kh:kh + Ho, kw:kw + Wo, :]
            p = x_ref[kh:kh + stride * (Ho - 1) + 1,
                      kw:kw + stride * (Wo - 1) + 1, :]
            return p[::stride, ::stride, :]

        def load_h_tap(kh, kw):
            return pad_scr[kh:kh + Ho, kw:kw + Wo, :]

        # ---- conv1 (3x3, stride) with folded BN1 -> ReLU -------------------
        acc1 = conv3x3(load_x_tap, w1_ref, Cin_p)
        out1 = jnp.maximum(acc1 + b1_ref[...], 0.0)

        # ---- stage conv2 input: zero only the 1-pixel halo strips ----------
        pad_scr[0:1, :, :] = jnp.zeros((1, Wo + 2, Cout_p), jnp.float32)
        pad_scr[Ho + 1:Ho + 2, :, :] = jnp.zeros((1, Wo + 2, Cout_p), jnp.float32)
        pad_scr[:, 0:1, :] = jnp.zeros((Ho + 2, 1, Cout_p), jnp.float32)
        pad_scr[:, Wo + 1:Wo + 2, :] = jnp.zeros((Ho + 2, 1, Cout_p), jnp.float32)
        pad_scr[1:Ho + 1, 1:Wo + 1, :] = out1.reshape(Ho, Wo, Cout_p)

        # ---- conv2 (3x3, stride 1) with folded BN2 -------------------------
        acc2 = conv3x3(load_h_tap, w2_ref, Cout_p) + b2_ref[...]

        # ---- shortcut -------------------------------------------------------
        if use_sc:
            # 1x1 conv with stride (+ folded BN); center tap of the padded
            # input is exactly the stride-subsampled unpadded input.
            x_in = load_x_tap(1, 1)
            sc = jnp.dot(x_in.reshape(rows, Cin_p), wsc_ref[...],
                         preferred_element_type=jnp.float32) + bsc_ref[...]
        else:
            # identity (stride == 1, Cin == Cout => Cin_p == Cout_p)
            sc = x_ref[1:H + 1, 1:W + 1, :].reshape(rows, Cout_p)

        # ---- epilogue: residual add + ReLU, one lane-dense store -----------
        out_ref[...] = jnp.maximum(acc2 + sc, 0.0).reshape(
            Ho, Wo, Cout_p).astype(out_ref.dtype)

    return kernel


def residual_block_forward(x_nchw, params, stride=1):
    """Pallas forward. x_nchw: (N, Cin, H, W). Returns (N, Cout, Ho, Wo)."""
    x = jnp.transpose(x_nchw, (0, 2, 3, 1)).astype(jnp.float32)   # NCHW -> NHWC
    N, H, W, Cin = x.shape
    Cout = params["w1"].shape[-1]
    Ho = (H + 2 - 3) // stride + 1
    Wo = (W + 2 - 3) // stride + 1
    use_sc = (stride != 1) or (Cin != Cout)

    # Lane-dense channel padding (multiples of 128).
    Cin_p = _round_up(Cin, 128)
    Cout_p = _round_up(Cout, 128)

    # One combined spatial-halo + channel zero-pad (single HBM materialization;
    # the same buffer feeds conv1, the 1x1 shortcut and the identity shortcut).
    xpad = jnp.pad(x, ((0, 0), (1, 1), (1, 1), (0, Cin_p - Cin)))

    def fold_bn(w, g, b, m, v):
        # y = (w*x - mean) * gamma*rsqrt(var+eps) + beta  ==  (w*scale)*x + bias
        g = g.reshape(-1).astype(jnp.float32)
        b = b.reshape(-1).astype(jnp.float32)
        m = m.reshape(-1).astype(jnp.float32)
        v = v.reshape(-1).astype(jnp.float32)
        scale = g * jax.lax.rsqrt(v + EPS)
        return w.astype(jnp.float32) * scale, b - m * scale

    w1f, b1f = fold_bn(params["w1"], params["bn1_gamma"], params["bn1_beta"],
                       params["bn1_mean"], params["bn1_var"])
    w2f, b2f = fold_bn(params["w2"], params["bn2_gamma"], params["bn2_beta"],
                       params["bn2_mean"], params["bn2_var"])

    w1f = jnp.pad(w1f, ((0, 0), (0, 0), (0, Cin_p - Cin), (0, Cout_p - Cout)))
    w1f = w1f.reshape(9, Cin_p, Cout_p)
    b1f = jnp.pad(b1f, (0, Cout_p - Cout)).reshape(1, Cout_p)
    w2f = jnp.pad(w2f, ((0, 0), (0, 0), (0, Cout_p - Cout), (0, Cout_p - Cout)))
    w2f = w2f.reshape(9, Cout_p, Cout_p)
    b2f = jnp.pad(b2f, (0, Cout_p - Cout)).reshape(1, Cout_p)

    inputs = [xpad, w1f, b1f, w2f, b2f]
    in_specs = [
        pl.BlockSpec((None, H + 2, W + 2, Cin_p), lambda b: (b, 0, 0, 0)),
        pl.BlockSpec((9, Cin_p, Cout_p), lambda b: (0, 0, 0)),
        pl.BlockSpec((1, Cout_p), lambda b: (0, 0)),
        pl.BlockSpec((9, Cout_p, Cout_p), lambda b: (0, 0, 0)),
        pl.BlockSpec((1, Cout_p), lambda b: (0, 0)),
    ]
    if use_sc:
        wscf, bscf = fold_bn(params["wsc"], params["bnsc_gamma"],
                             params["bnsc_beta"], params["bnsc_mean"],
                             params["bnsc_var"])
        wscf = jnp.pad(wscf, ((0, Cin_p - Cin), (0, Cout_p - Cout)))
        bscf = jnp.pad(bscf, (0, Cout_p - Cout)).reshape(1, Cout_p)
        inputs += [wscf, bscf]
        in_specs += [pl.BlockSpec((Cin_p, Cout_p), lambda b: (0, 0)),
                     pl.BlockSpec((1, Cout_p), lambda b: (0, 0))]

    kernel = _make_kernel(H, W, Cin_p, Cout_p, stride, Ho, Wo, use_sc)

    out_nhwc = pl.pallas_call(
        kernel,
        out_shape=jax.ShapeDtypeStruct((N, Ho, Wo, Cout_p), jnp.float32),
        grid=(N,),
        in_specs=in_specs,
        out_specs=pl.BlockSpec((None, Ho, Wo, Cout_p), lambda b: (b, 0, 0, 0)),
        scratch_shapes=[pltpu.VMEM((Ho + 2, Wo + 2, Cout_p), jnp.float32)],
        compiler_params=pltpu.CompilerParams(
            dimension_semantics=("parallel",),
            vmem_limit_bytes=32 * 1024 * 1024),
    )(*inputs)

    out_nhwc = out_nhwc[..., :Cout]                 # drop lane padding
    return jnp.transpose(out_nhwc, (0, 3, 1, 2))    # back to NCHW


def residual_block_reference(x_nchw, params, stride=1):
    """Pure-JAX reference (mirrors the PyTorch forward, inference-mode BN)."""
    def conv(x, w_hwio, s, pad):
        return jax.lax.conv_general_dilated(
            x, w_hwio, window_strides=(s, s), padding=pad,
            dimension_numbers=("NCHW", "HWIO", "NCHW"))

    def bn(x, g, b, m, v):
        g = g.reshape(1, -1, 1, 1); b = b.reshape(1, -1, 1, 1)
        m = m.reshape(1, -1, 1, 1); v = v.reshape(1, -1, 1, 1)
        return (x - m) * (g / jnp.sqrt(v + EPS)) + b

    Cin = x_nchw.shape[1]
    Cout = params["w1"].shape[-1]

    out = conv(x_nchw, params["w1"], stride, [(1, 1), (1, 1)])
    out = jax.nn.relu(bn(out, params["bn1_gamma"], params["bn1_beta"],
                         params["bn1_mean"], params["bn1_var"]))
    out = conv(out, params["w2"], 1, [(1, 1), (1, 1)])
    out = bn(out, params["bn2_gamma"], params["bn2_beta"],
             params["bn2_mean"], params["bn2_var"])
    if stride != 1 or Cin != Cout:
        sc = conv(x_nchw, params["wsc"].reshape(1, 1, Cin, Cout), stride,
                  [(0, 0), (0, 0)])
        sc = bn(sc, params["bnsc_gamma"], params["bnsc_beta"],
                params["bnsc_mean"], params["bnsc_var"])
    else:
        sc = x_nchw
    return jax.nn.relu(out + sc)


if __name__ == "__main__":
    N, Cin, H, W = 2, 4, 16, 16
    Cout, stride = 8, 1   # Cin != Cout -> conv shortcut path is exercised

    key = jax.random.PRNGKey(0)
    ks = jax.random.split(key, 16)
    x = jax.random.normal(ks[0], (N, Cin, H, W), jnp.float32)

    def bn_params(k0, k1, k2, k3, c):
        return (jax.random.uniform(k0, (1, c), jnp.float32, 0.8, 1.2),   # gamma
                0.1 * jax.random.normal(k1, (1, c), jnp.float32),        # beta
                0.1 * jax.random.normal(k2, (1, c), jnp.float32),        # running_mean
                jax.random.uniform(k3, (1, c), jnp.float32, 0.5, 1.5))   # running_var

    g1, b1, m1, v1 = bn_params(ks[4], ks[5], ks[6], ks[7], Cout)
    g2, b2, m2, v2 = bn_params(ks[8], ks[9], ks[10], ks[11], Cout)
    gs, bs, ms, vs = bn_params(ks[12], ks[13], ks[14], ks[15], Cout)

    params = {
        "w1": 0.2 * jax.random.normal(ks[1], (3, 3, Cin, Cout), jnp.float32),
        "w2": 0.2 * jax.random.normal(ks[2], (3, 3, Cout, Cout), jnp.float32),
        "wsc": 0.2 * jax.random.normal(ks[3], (Cin, Cout), jnp.float32),
        "bn1_gamma": g1, "bn1_beta": b1, "bn1_mean": m1, "bn1_var": v1,
        "bn2_gamma": g2, "bn2_beta": b2, "bn2_mean": m2, "bn2_var": v2,
        "bnsc_gamma": gs, "bnsc_beta": bs, "bnsc_mean": ms, "bnsc_var": vs,
    }

    out = residual_block_forward(x, params, stride=stride)
    out = jax.block_until_ready(out)

    ref = residual_block_reference(x, params, stride=stride)
    assert out.shape == ref.shape, (out.shape, ref.shape)
    max_err = float(jnp.max(jnp.abs(out - ref)))
    if max_err > 2e-3:
        raise AssertionError(f"mismatch vs reference, max_err={max_err}")
    print("KERNEL_OK")
</pallas_src>

<mosaic_0001>
module attributes {stable_mosaic.version = 11 : i64} {
  func.func @kernel(%arg0: i32, %arg1: memref<1x18x18x128xf32, #tpu.memory_space<vmem>>, %arg2: memref<9x128x128xf32, #tpu.memory_space<vmem>>, %arg3: memref<1x128xf32, #tpu.memory_space<vmem>>, %arg4: memref<9x128x128xf32, #tpu.memory_space<vmem>>, %arg5: memref<1x128xf32, #tpu.memory_space<vmem>>, %arg6: memref<128x128xf32, #tpu.memory_space<vmem>>, %arg7: memref<1x128xf32, #tpu.memory_space<vmem>>, %arg8: memref<1x16x16x128xf32, #tpu.memory_space<vmem>>, %arg9: memref<18x18x128xf32, #tpu.memory_space<vmem>>) attributes {dimension_semantics = [#tpu.dimension_semantics<parallel>], iteration_bounds = array<i64: 2>, scalar_prefetch = 0 : i64, scratch_operands = 1 : i64, tpu.core_type = #tpu.core_type<tc>, window_params = [{transform_indices = @transform_0, window_bounds = array<i64: 1, 18, 18, 128>}, {pipeline_mode = #tpu.pipeline_mode<synchronous>, transform_indices = @transform_1, window_bounds = array<i64: 9, 128, 128>}, {pipeline_mode = #tpu.pipeline_mode<synchronous>, transform_indices = @transform_2, window_bounds = array<i64: 1, 128>}, {pipeline_mode = #tpu.pipeline_mode<synchronous>, transform_indices = @transform_3, window_bounds = array<i64: 9, 128, 128>}, {pipeline_mode = #tpu.pipeline_mode<synchronous>, transform_indices = @transform_4, window_bounds = array<i64: 1, 128>}, {pipeline_mode = #tpu.pipeline_mode<synchronous>, transform_indices = @transform_5, window_bounds = array<i64: 128, 128>}, {pipeline_mode = #tpu.pipeline_mode<synchronous>, transform_indices = @transform_6, window_bounds = array<i64: 1, 128>}, {transform_indices = @transform_7, window_bounds = array<i64: 1, 16, 16, 128>}]} {
    %c0 = arith.constant 0 : index
    %c0_0 = arith.constant 0 : index
    %c0_1 = arith.constant 0 : index
    %c0_2 = arith.constant 0 : index
    %0 = vector.load %arg1[%c0, %c0_0, %c0_1, %c0_2] : memref<1x18x18x128xf32, #tpu.memory_space<vmem>>, vector<1x16x16x128xf32>
    %1 = vector.shape_cast %0 : vector<1x16x16x128xf32> to vector<16x16x128xf32>
    %2 = vector.shape_cast %1 : vector<16x16x128xf32> to vector<256x128xf32>
    %c0_3 = arith.constant 0 : index
    %c0_4 = arith.constant 0 : index
    %c0_5 = arith.constant 0 : index
    %3 = vector.load %arg2[%c0_3, %c0_4, %c0_5] : memref<9x128x128xf32, #tpu.memory_space<vmem>>, vector<1x128x128xf32>
    %4 = vector.shape_cast %3 : vector<1x128x128xf32> to vector<128x128xf32>
    %cst = arith.constant dense<0.000000e+00> : vector<256x128xf32>
    %5 = tpu.matmul %2, %4, %cst {dimension_numbers = #tpu.dot_dimension_numbers<[1], [0], [0], [1], [0, 0, 1, 1], [], []>} : vector<256x128xf32>, vector<128x128xf32>, vector<256x128xf32> -> vector<256x128xf32>
    %c0_6 = arith.constant 0 : index
    %c0_7 = arith.constant 0 : index
    %c1 = arith.constant 1 : index
    %c0_8 = arith.constant 0 : index
    %6 = vector.load %arg1[%c0_6, %c0_7, %c1, %c0_8] : memref<1x18x18x128xf32, #tpu.memory_space<vmem>>, vector<1x16x16x128xf32>
    %7 = vector.shape_cast %6 : vector<1x16x16x128xf32> to vector<16x16x128xf32>
    %8 = vector.shape_cast %7 : vector<16x16x128xf32> to vector<256x128xf32>
    %c1_9 = arith.constant 1 : index
    %c0_10 = arith.constant 0 : index
    %c0_11 = arith.constant 0 : index
    %9 = vector.load %arg2[%c1_9, %c0_10, %c0_11] : memref<9x128x128xf32, #tpu.memory_space<vmem>>, vector<1x128x128xf32>
    %10 = vector.shape_cast %9 : vector<1x128x128xf32> to vector<128x128xf32>
    %cst_12 = arith.constant dense<0.000000e+00> : vector<256x128xf32>
    %11 = tpu.matmul %8, %10, %cst_12 {dimension_numbers = #tpu.dot_dimension_numbers<[1], [0], [0], [1], [0, 0, 1, 1], [], []>} : vector<256x128xf32>, vector<128x128xf32>, vector<256x128xf32> -> vector<256x128xf32>
    %12 = arith.addf %5, %11 : vector<256x128xf32>
    %c0_13 = arith.constant 0 : index
    %c0_14 = arith.constant 0 : index
    %c2 = arith.constant 2 : index
    %c0_15 = arith.constant 0 : index
    %13 = vector.load %arg1[%c0_13, %c0_14, %c2, %c0_15] : memref<1x18x18x128xf32, #tpu.memory_space<vmem>>, vector<1x16x16x128xf32>
    %14 = vector.shape_cast %13 : vector<1x16x16x128xf32> to vector<16x16x128xf32>
    %15 = vector.shape_cast %14 : vector<16x16x128xf32> to vector<256x128xf32>
    %c2_16 = arith.constant 2 : index
    %c0_17 = arith.constant 0 : index
    %c0_18 = arith.constant 0 : index
    %16 = vector.load %arg2[%c2_16, %c0_17, %c0_18] : memref<9x128x128xf32, #tpu.memory_space<vmem>>, vector<1x128x128xf32>
    %17 = vector.shape_cast %16 : vector<1x128x128xf32> to vector<128x128xf32>
    %cst_19 = arith.constant dense<0.000000e+00> : vector<256x128xf32>
    %18 = tpu.matmul %15, %17, %cst_19 {dimension_numbers = #tpu.dot_dimension_numbers<[1], [0], [0], [1], [0, 0, 1, 1], [], []>} : vector<256x128xf32>, vector<128x128xf32>, vector<256x128xf32> -> vector<256x128xf32>
    %19 = arith.addf %12, %18 : vector<256x128xf32>
    %c0_20 = arith.constant 0 : index
    %c1_21 = arith.constant 1 : index
    %c0_22 = arith.constant 0 : index
    %c0_23 = arith.constant 0 : index
    %20 = vector.load %arg1[%c0_20, %c1_21, %c0_22, %c0_23] : memref<1x18x18x128xf32, #tpu.memory_space<vmem>>, vector<1x16x16x128xf32>
    %21 = vector.shape_cast %20 : vector<1x16x16x128xf32> to vector<16x16x128xf32>
    %22 = vector.shape_cast %21 : vector<16x16x128xf32> to vector<256x128xf32>
    %c3 = arith.constant 3 : index
    %c0_24 = arith.constant 0 : index
    %c0_25 = arith.constant 0 : index
    %23 = vector.load %arg2[%c3, %c0_24, %c0_25] : memref<9x128x128xf32, #tpu.memory_space<vmem>>, vector<1x128x128xf32>
    %24 = vector.shape_cast %23 : vector<1x128x128xf32> to vector<128x128xf32>
    %cst_26 = arith.constant dense<0.000000e+00> : vector<256x128xf32>
    %25 = tpu.matmul %22, %24, %cst_26 {dimension_numbers = #tpu.dot_dimension_numbers<[1], [0], [0], [1], [0, 0, 1, 1], [], []>} : vector<256x128xf32>, vector<128x128xf32>, vector<256x128xf32> -> vector<256x128xf32>
    %26 = arith.addf %19, %25 : vector<256x128xf32>
    %c0_27 = arith.constant 0 : index
    %c1_28 = arith.constant 1 : index
    %c1_29 = arith.constant 1 : index
    %c0_30 = arith.constant 0 : index
    %27 = vector.load %arg1[%c0_27, %c1_28, %c1_29, %c0_30] : memref<1x18x18x128xf32, #tpu.memory_space<vmem>>, vector<1x16x16x128xf32>
    %28 = vector.shape_cast %27 : vector<1x16x16x128xf32> to vector<16x16x128xf32>
    %29 = vector.shape_cast %28 : vector<16x16x128xf32> to vector<256x128xf32>
    %c4 = arith.constant 4 : index
    %c0_31 = arith.constant 0 : index
    %c0_32 = arith.constant 0 : index
    %30 = vector.load %arg2[%c4, %c0_31, %c0_32] : memref<9x128x128xf32, #tpu.memory_space<vmem>>, vector<1x128x128xf32>
    %31 = vector.shape_cast %30 : vector<1x128x128xf32> to vector<128x128xf32>
    %cst_33 = arith.constant dense<0.000000e+00> : vector<256x128xf32>
    %32 = tpu.matmul %29, %31, %cst_33 {dimension_numbers = #tpu.dot_dimension_numbers<[1], [0], [0], [1], [0, 0, 1, 1], [], []>} : vector<256x128xf32>, vector<128x128xf32>, vector<256x128xf32> -> vector<256x128xf32>
    %33 = arith.addf %26, %32 : vector<256x128xf32>
    %c0_34 = arith.constant 0 : index
    %c1_35 = arith.constant 1 : index
    %c2_36 = arith.constant 2 : index
    %c0_37 = arith.constant 0 : index
    %34 = vector.load %arg1[%c0_34, %c1_35, %c2_36, %c0_37] : memref<1x18x18x128xf32, #tpu.memory_space<vmem>>, vector<1x16x16x128xf32>
    %35 = vector.shape_cast %34 : vector<1x16x16x128xf32> to vector<16x16x128xf32>
    %36 = vector.shape_cast %35 : vector<16x16x128xf32> to vector<256x128xf32>
    %c5 = arith.constant 5 : index
    %c0_38 = arith.constant 0 : index
    %c0_39 = arith.constant 0 : index
    %37 = vector.load %arg2[%c5, %c0_38, %c0_39] : memref<9x128x128xf32, #tpu.memory_space<vmem>>, vector<1x128x128xf32>
    %38 = vector.shape_cast %37 : vector<1x128x128xf32> to vector<128x128xf32>
    %cst_40 = arith.constant dense<0.000000e+00> : vector<256x128xf32>
    %39 = tpu.matmul %36, %38, %cst_40 {dimension_numbers = #tpu.dot_dimension_numbers<[1], [0], [0], [1], [0, 0, 1, 1], [], []>} : vector<256x128xf32>, vector<128x128xf32>, vector<256x128xf32> -> vector<256x128xf32>
    %40 = arith.addf %33, %39 : vector<256x128xf32>
    %c0_41 = arith.constant 0 : index
    %c2_42 = arith.constant 2 : index
    %c0_43 = arith.constant 0 : index
    %c0_44 = arith.constant 0 : index
    %41 = vector.load %arg1[%c0_41, %c2_42, %c0_43, %c0_44] : memref<1x18x18x128xf32, #tpu.memory_space<vmem>>, vector<1x16x16x128xf32>
    %42 = vector.shape_cast %41 : vector<1x16x16x128xf32> to vector<16x16x128xf32>
    %43 = vector.shape_cast %42 : vector<16x16x128xf32> to vector<256x128xf32>
    %c6 = arith.constant 6 : index
    %c0_45 = arith.constant 0 : index
    %c0_46 = arith.constant 0 : index
    %44 = vector.load %arg2[%c6, %c0_45, %c0_46] : memref<9x128x128xf32, #tpu.memory_space<vmem>>, vector<1x128x128xf32>
    %45 = vector.shape_cast %44 : vector<1x128x128xf32> to vector<128x128xf32>
    %cst_47 = arith.constant dense<0.000000e+00> : vector<256x128xf32>
    %46 = tpu.matmul %43, %45, %cst_47 {dimension_numbers = #tpu.dot_dimension_numbers<[1], [0], [0], [1], [0, 0, 1, 1], [], []>} : vector<256x128xf32>, vector<128x128xf32>, vector<256x128xf32> -> vector<256x128xf32>
    %47 = arith.addf %40, %46 : vector<256x128xf32>
    %c0_48 = arith.constant 0 : index
    %c2_49 = arith.constant 2 : index
    %c1_50 = arith.constant 1 : index
    %c0_51 = arith.constant 0 : index
    %48 = vector.load %arg1[%c0_48, %c2_49, %c1_50, %c0_51] : memref<1x18x18x128xf32, #tpu.memory_space<vmem>>, vector<1x16x16x128xf32>
    %49 = vector.shape_cast %48 : vector<1x16x16x128xf32> to vector<16x16x128xf32>
    %50 = vector.shape_cast %49 : vector<16x16x128xf32> to vector<256x128xf32>
    %c7 = arith.constant 7 : index
    %c0_52 = arith.constant 0 : index
    %c0_53 = arith.constant 0 : index
    %51 = vector.load %arg2[%c7, %c0_52, %c0_53] : memref<9x128x128xf32, #tpu.memory_space<vmem>>, vector<1x128x128xf32>
    %52 = vector.shape_cast %51 : vector<1x128x128xf32> to vector<128x128xf32>
    %cst_54 = arith.constant dense<0.000000e+00> : vector<256x128xf32>
    %53 = tpu.matmul %50, %52, %cst_54 {dimension_numbers = #tpu.dot_dimension_numbers<[1], [0], [0], [1], [0, 0, 1, 1], [], []>} : vector<256x128xf32>, vector<128x128xf32>, vector<256x128xf32> -> vector<256x128xf32>
    %54 = arith.addf %47, %53 : vector<256x128xf32>
    %c0_55 = arith.constant 0 : index
    %c2_56 = arith.constant 2 : index
    %c2_57 = arith.constant 2 : index
    %c0_58 = arith.constant 0 : index
    %55 = vector.load %arg1[%c0_55, %c2_56, %c2_57, %c0_58] : memref<1x18x18x128xf32, #tpu.memory_space<vmem>>, vector<1x16x16x128xf32>
    %56 = vector.shape_cast %55 : vector<1x16x16x128xf32> to vector<16x16x128xf32>
    %57 = vector.shape_cast %56 : vector<16x16x128xf32> to vector<256x128xf32>
    %c8 = arith.constant 8 : index
    %c0_59 = arith.constant 0 : index
    %c0_60 = arith.constant 0 : index
    %58 = vector.load %arg2[%c8, %c0_59, %c0_60] : memref<9x128x128xf32, #tpu.memory_space<vmem>>, vector<1x128x128xf32>
    %59 = vector.shape_cast %58 : vector<1x128x128xf32> to vector<128x128xf32>
    %cst_61 = arith.constant dense<0.000000e+00> : vector<256x128xf32>
    %60 = tpu.matmul %57, %59, %cst_61 {dimension_numbers = #tpu.dot_dimension_numbers<[1], [0], [0], [1], [0, 0, 1, 1], [], []>} : vector<256x128xf32>, vector<128x128xf32>, vector<256x128xf32> -> vector<256x128xf32>
    %61 = arith.addf %54, %60 : vector<256x128xf32>
    %c0_62 = arith.constant 0 : index
    %c0_63 = arith.constant 0 : index
    %62 = vector.load %arg3[%c0_62, %c0_63] : memref<1x128xf32, #tpu.memory_space<vmem>>, vector<1x128xf32>
    %63 = vector.broadcast %62 : vector<1x128xf32> to vector<256x128xf32>
    %64 = arith.addf %61, %63 : vector<256x128xf32>
    %cst_64 = arith.constant 0.000000e+00 : f32
    %65 = vector.broadcast %cst_64 : f32 to vector<256x128xf32>
    %66 = arith.maximumf %64, %65 : vector<256x128xf32>
    %cst_65 = arith.constant 0.000000e+00 : f32
    %67 = vector.broadcast %cst_65 : f32 to vector<1x18x128xf32>
    %c0_66 = arith.constant 0 : index
    %c0_67 = arith.constant 0 : index
    %c0_68 = arith.constant 0 : index
    %68 = vector.load %arg9[%c0_66, %c0_67, %c0_68] : memref<18x18x128xf32, #tpu.memory_space<vmem>>, vector<1x18x128xf32>
    tpu.vector_store %arg9[%c0_66, %c0_67, %c0_68], %67 {strides = array<i32>} : memref<18x18x128xf32, #tpu.memory_space<vmem>>, vector<1x18x128xf32>,
    %cst_69 = arith.constant 0.000000e+00 : f32
    %69 = vector.broadcast %cst_69 : f32 to vector<1x18x128xf32>
    %c17 = arith.constant 17 : index
    %c0_70 = arith.constant 0 : index
    %c0_71 = arith.constant 0 : index
    %70 = vector.load %arg9[%c17, %c0_70, %c0_71] : memref<18x18x128xf32, #tpu.memory_space<vmem>>, vector<1x18x128xf32>
    tpu.vector_store %arg9[%c17, %c0_70, %c0_71], %69 {strides = array<i32>} : memref<18x18x128xf32, #tpu.memory_space<vmem>>, vector<1x18x128xf32>,
    %cst_72 = arith.constant 0.000000e+00 : f32
    %71 = vector.broadcast %cst_72 : f32 to vector<18x1x128xf32>
    %c0_73 = arith.constant 0 : index
    %c0_74 = arith.constant 0 : index
    %c0_75 = arith.constant 0 : index
    %72 = vector.load %arg9[%c0_73, %c0_74, %c0_75] : memref<18x18x128xf32, #tpu.memory_space<vmem>>, vector<18x1x128xf32>
    tpu.vector_store %arg9[%c0_73, %c0_74, %c0_75], %71 {strides = array<i32>} : memref<18x18x128xf32, #tpu.memory_space<vmem>>, vector<18x1x128xf32>,
    %cst_76 = arith.constant 0.000000e+00 : f32
    %73 = vector.broadcast %cst_76 : f32 to vector<18x1x128xf32>
    %c0_77 = arith.constant 0 : index
    %c17_78 = arith.constant 17 : index
    %c0_79 = arith.constant 0 : index
    %74 = vector.load %arg9[%c0_77, %c17_78, %c0_79] : memref<18x18x128xf32, #tpu.memory_space<vmem>>, vector<18x1x128xf32>
    tpu.vector_store %arg9[%c0_77, %c17_78, %c0_79], %73 {strides = array<i32>} : memref<18x18x128xf32, #tpu.memory_space<vmem>>, vector<18x1x128xf32>,
    %75 = vector.shape_cast %66 : vector<256x128xf32> to vector<16x16x128xf32>
    %c1_80 = arith.constant 1 : index
    %c1_81 = arith.constant 1 : index
    %c0_82 = arith.constant 0 : index
    %76 = vector.load %arg9[%c1_80, %c1_81, %c0_82] : memref<18x18x128xf32, #tpu.memory_space<vmem>>, vector<16x16x128xf32>
    tpu.vector_store %arg9[%c1_80, %c1_81, %c0_82], %75 {strides = array<i32>} : memref<18x18x128xf32, #tpu.memory_space<vmem>>, vector<16x16x128xf32>,
    %c0_83 = arith.constant 0 : index
    %c0_84 = arith.constant 0 : index
    %c0_85 = arith.constant 0 : index
    %77 = vector.load %arg9[%c0_83, %c0_84, %c0_85] : memref<18x18x128xf32, #tpu.memory_space<vmem>>, vector<16x16x128xf32>
    %78 = vector.shape_cast %77 : vector<16x16x128xf32> to vector<256x128xf32>
    %c0_86 = arith.constant 0 : index
    %c0_87 = arith.constant 0 : index
    %c0_88 = arith.constant 0 : index
    %79 = vector.load %arg4[%c0_86, %c0_87, %c0_88] : memref<9x128x128xf32, #tpu.memory_space<vmem>>, vector<1x128x128xf32>
    %80 = vector.shape_cast %79 : vector<1x128x128xf32> to vector<128x128xf32>
    %cst_89 = arith.constant dense<0.000000e+00> : vector<256x128xf32>
    %81 = tpu.matmul %78, %80, %cst_89 {dimension_numbers = #tpu.dot_dimension_numbers<[1], [0], [0], [1], [0, 0, 1, 1], [], []>} : vector<256x128xf32>, vector<128x128xf32>, vector<256x128xf32> -> vector<256x128xf32>
    %c0_90 = arith.constant 0 : index
    %c1_91 = arith.constant 1 : index
    %c0_92 = arith.constant 0 : index
    %82 = vector.load %arg9[%c0_90, %c1_91, %c0_92] : memref<18x18x128xf32, #tpu.memory_space<vmem>>, vector<16x16x128xf32>
    %83 = vector.shape_cast %82 : vector<16x16x128xf32> to vector<256x128xf32>
    %c1_93 = arith.constant 1 : index
    %c0_94 = arith.constant 0 : index
    %c0_95 = arith.constant 0 : index
    %84 = vector.load %arg4[%c1_93, %c0_94, %c0_95] : memref<9x128x128xf32, #tpu.memory_space<vmem>>, vector<1x128x128xf32>
    %85 = vector.shape_cast %84 : vector<1x128x128xf32> to vector<128x128xf32>
    %cst_96 = arith.constant dense<0.000000e+00> : vector<256x128xf32>
    %86 = tpu.matmul %83, %85, %cst_96 {dimension_numbers = #tpu.dot_dimension_numbers<[1], [0], [0], [1], [0, 0, 1, 1], [], []>} : vector<256x128xf32>, vector<128x128xf32>, vector<256x128xf32> -> vector<256x128xf32>
    %87 = arith.addf %81, %86 : vector<256x128xf32>
    %c0_97 = arith.constant 0 : index
    %c2_98 = arith.constant 2 : index
    %c0_99 = arith.constant 0 : index
    %88 = vector.load %arg9[%c0_97, %c2_98, %c0_99] : memref<18x18x128xf32, #tpu.memory_space<vmem>>, vector<16x16x128xf32>
    %89 = vector.shape_cast %88 : vector<16x16x128xf32> to vector<256x128xf32>
    %c2_100 = arith.constant 2 : index
    %c0_101 = arith.constant 0 : index
    %c0_102 = arith.constant 0 : index
    %90 = vector.load %arg4[%c2_100, %c0_101, %c0_102] : memref<9x128x128xf32, #tpu.memory_space<vmem>>, vector<1x128x128xf32>
    %91 = vector.shape_cast %90 : vector<1x128x128xf32> to vector<128x128xf32>
    %cst_103 = arith.constant dense<0.000000e+00> : vector<256x128xf32>
    %92 = tpu.matmul %89, %91, %cst_103 {dimension_numbers = #tpu.dot_dimension_numbers<[1], [0], [0], [1], [0, 0, 1, 1], [], []>} : vector<256x128xf32>, vector<128x128xf32>, vector<256x128xf32> -> vector<256x128xf32>
    %93 = arith.addf %87, %92 : vector<256x128xf32>
    %c1_104 = arith.constant 1 : index
    %c0_105 = arith.constant 0 : index
    %c0_106 = arith.constant 0 : index
    %94 = vector.load %arg9[%c1_104, %c0_105, %c0_106] : memref<18x18x128xf32, #tpu.memory_space<vmem>>, vector<16x16x128xf32>
    %95 = vector.shape_cast %94 : vector<16x16x128xf32> to vector<256x128xf32>
    %c3_107 = arith.constant 3 : index
    %c0_108 = arith.constant 0 : index
    %c0_109 = arith.constant 0 : index
    %96 = vector.load %arg4[%c3_107, %c0_108, %c0_109] : memref<9x128x128xf32, #tpu.memory_space<vmem>>, vector<1x128x128xf32>
    %97 = vector.shape_cast %96 : vector<1x128x128xf32> to vector<128x128xf32>
    %cst_110 = arith.constant dense<0.000000e+00> : vector<256x128xf32>
    %98 = tpu.matmul %95, %97, %cst_110 {dimension_numbers = #tpu.dot_dimension_numbers<[1], [0], [0], [1], [0, 0, 1, 1], [], []>} : vector<256x128xf32>, vector<128x128xf32>, vector<256x128xf32> -> vector<256x128xf32>
    %99 = arith.addf %93, %98 : vector<256x128xf32>
    %c1_111 = arith.constant 1 : index
    %c1_112 = arith.constant 1 : index
    %c0_113 = arith.constant 0 : index
    %100 = vector.load %arg9[%c1_111, %c1_112, %c0_113] : memref<18x18x128xf32, #tpu.memory_space<vmem>>, vector<16x16x128xf32>
    %101 = vector.shape_cast %100 : vector<16x16x128xf32> to vector<256x128xf32>
    %c4_114 = arith.constant 4 : index
    %c0_115 = arith.constant 0 : index
    %c0_116 = arith.constant 0 : index
    %102 = vector.load %arg4[%c4_114, %c0_115, %c0_116] : memref<9x128x128xf32, #tpu.memory_space<vmem>>, vector<1x128x128xf32>
    %103 = vector.shape_cast %102 : vector<1x128x128xf32> to vector<128x128xf32>
    %cst_117 = arith.constant dense<0.000000e+00> : vector<256x128xf32>
    %104 = tpu.matmul %101, %103, %cst_117 {dimension_numbers = #tpu.dot_dimension_numbers<[1], [0], [0], [1], [0, 0, 1, 1], [], []>} : vector<256x128xf32>, vector<128x128xf32>, vector<256x128xf32> -> vector<256x128xf32>
    %105 = arith.addf %99, %104 : vector<256x128xf32>
    %c1_118 = arith.constant 1 : index
    %c2_119 = arith.constant 2 : index
    %c0_120 = arith.constant 0 : index
    %106 = vector.load %arg9[%c1_118, %c2_119, %c0_120] : memref<18x18x128xf32, #tpu.memory_space<vmem>>, vector<16x16x128xf32>
    %107 = vector.shape_cast %106 : vector<16x16x128xf32> to vector<256x128xf32>
    %c5_121 = arith.constant 5 : index
    %c0_122 = arith.constant 0 : index
    %c0_123 = arith.constant 0 : index
    %108 = vector.load %arg4[%c5_121, %c0_122, %c0_123] : memref<9x128x128xf32, #tpu.memory_space<vmem>>, vector<1x128x128xf32>
    %109 = vector.shape_cast %108 : vector<1x128x128xf32> to vector<128x128xf32>
    %cst_124 = arith.constant dense<0.000000e+00> : vector<256x128xf32>
    %110 = tpu.matmul %107, %109, %cst_124 {dimension_numbers = #tpu.dot_dimension_numbers<[1], [0], [0], [1], [0, 0, 1, 1], [], []>} : vector<256x128xf32>, vector<128x128xf32>, vector<256x128xf32> -> vector<256x128xf32>
    %111 = arith.addf %105, %110 : vector<256x128xf32>
    %c2_125 = arith.constant 2 : index
    %c0_126 = arith.constant 0 : index
    %c0_127 = arith.constant 0 : index
    %112 = vector.load %arg9[%c2_125, %c0_126, %c0_127] : memref<18x18x128xf32, #tpu.memory_space<vmem>>, vector<16x16x128xf32>
    %113 = vector.shape_cast %112 : vector<16x16x128xf32> to vector<256x128xf32>
    %c6_128 = arith.constant 6 : index
    %c0_129 = arith.constant 0 : index
    %c0_130 = arith.constant 0 : index
    %114 = vector.load %arg4[%c6_128, %c0_129, %c0_130] : memref<9x128x128xf32, #tpu.memory_space<vmem>>, vector<1x128x128xf32>
    %115 = vector.shape_cast %114 : vector<1x128x128xf32> to vector<128x128xf32>
    %cst_131 = arith.constant dense<0.000000e+00> : vector<256x128xf32>
    %116 = tpu.matmul %113, %115, %cst_131 {dimension_numbers = #tpu.dot_dimension_numbers<[1], [0], [0], [1], [0, 0, 1, 1], [], []>} : vector<256x128xf32>, vector<128x128xf32>, vector<256x128xf32> -> vector<256x128xf32>
    %117 = arith.addf %111, %116 : vector<256x128xf32>
    %c2_132 = arith.constant 2 : index
    %c1_133 = arith.constant 1 : index
    %c0_134 = arith.constant 0 : index
    %118 = vector.load %arg9[%c2_132, %c1_133, %c0_134] : memref<18x18x128xf32, #tpu.memory_space<vmem>>, vector<16x16x128xf32>
    %119 = vector.shape_cast %118 : vector<16x16x128xf32> to vector<256x128xf32>
    %c7_135 = arith.constant 7 : index
    %c0_136 = arith.constant 0 : index
    %c0_137 = arith.constant 0 : index
    %120 = vector.load %arg4[%c7_135, %c0_136, %c0_137] : memref<9x128x128xf32, #tpu.memory_space<vmem>>, vector<1x128x128xf32>
    %121 = vector.shape_cast %120 : vector<1x128x128xf32> to vector<128x128xf32>
    %cst_138 = arith.constant dense<0.000000e+00> : vector<256x128xf32>
    %122 = tpu.matmul %119, %121, %cst_138 {dimension_numbers = #tpu.dot_dimension_numbers<[1], [0], [0], [1], [0, 0, 1, 1], [], []>} : vector<256x128xf32>, vector<128x128xf32>, vector<256x128xf32> -> vector<256x128xf32>
    %123 = arith.addf %117, %122 : vector<256x128xf32>
    %c2_139 = arith.constant 2 : index
    %c2_140 = arith.constant 2 : index
    %c0_141 = arith.constant 0 : index
    %124 = vector.load %arg9[%c2_139, %c2_140, %c0_141] : memref<18x18x128xf32, #tpu.memory_space<vmem>>, vector<16x16x128xf32>
    %125 = vector.shape_cast %124 : vector<16x16x128xf32> to vector<256x128xf32>
    %c8_142 = arith.constant 8 : index
    %c0_143 = arith.constant 0 : index
    %c0_144 = arith.constant 0 : index
    %126 = vector.load %arg4[%c8_142, %c0_143, %c0_144] : memref<9x128x128xf32, #tpu.memory_space<vmem>>, vector<1x128x128xf32>
    %127 = vector.shape_cast %126 : vector<1x128x128xf32> to vector<128x128xf32>
    %cst_145 = arith.constant dense<0.000000e+00> : vector<256x128xf32>
    %128 = tpu.matmul %125, %127, %cst_145 {dimension_numbers = #tpu.dot_dimension_numbers<[1], [0], [0], [1], [0, 0, 1, 1], [], []>} : vector<256x128xf32>, vector<128x128xf32>, vector<256x128xf32> -> vector<256x128xf32>
    %129 = arith.addf %123, %128 : vector<256x128xf32>
    %c0_146 = arith.constant 0 : index
    %c0_147 = arith.constant 0 : index
    %130 = vector.load %arg5[%c0_146, %c0_147] : memref<1x128xf32, #tpu.memory_space<vmem>>, vector<1x128xf32>
    %131 = vector.broadcast %130 : vector<1x128xf32> to vector<256x128xf32>
    %132 = arith.addf %129, %131 : vector<256x128xf32>
    %c0_148 = arith.constant 0 : index
    %c1_149 = arith.constant 1 : index
    %c1_150 = arith.constant 1 : index
    %c0_151 = arith.constant 0 : index
    %133 = vector.load %arg1[%c0_148, %c1_149, %c1_150, %c0_151] : memref<1x18x18x128xf32, #tpu.memory_space<vmem>>, vector<1x16x16x128xf32>
    %134 = vector.shape_cast %133 : vector<1x16x16x128xf32> to vector<16x16x128xf32>
    %135 = vector.shape_cast %134 : vector<16x16x128xf32> to vector<256x128xf32>
    %c0_152 = arith.constant 0 : index
    %c0_153 = arith.constant 0 : index
    %136 = vector.load %arg6[%c0_152, %c0_153] : memref<128x128xf32, #tpu.memory_space<vmem>>, vector<128x128xf32>
    %cst_154 = arith.constant dense<0.000000e+00> : vector<256x128xf32>
    %137 = tpu.matmul %135, %136, %cst_154 {dimension_numbers = #tpu.dot_dimension_numbers<[1], [0], [0], [1], [0, 0, 1, 1], [], []>} : vector<256x128xf32>, vector<128x128xf32>, vector<256x128xf32> -> vector<256x128xf32>
    %c0_155 = arith.constant 0 : index
    %c0_156 = arith.constant 0 : index
    %138 = vector.load %arg7[%c0_155, %c0_156] : memref<1x128xf32, #tpu.memory_space<vmem>>, vector<1x128xf32>
    %139 = vector.broadcast %138 : vector<1x128xf32> to vector<256x128xf32>
    %140 = arith.addf %137, %139 : vector<256x128xf32>
    %141 = arith.addf %132, %140 : vector<256x128xf32>
    %cst_157 = arith.constant 0.000000e+00 : f32
    %142 = vector.broadcast %cst_157 : f32 to vector<256x128xf32>
    %143 = arith.maximumf %141, %142 : vector<256x128xf32>
    %144 = vector.shape_cast %143 : vector<256x128xf32> to vector<16x16x128xf32>
    %c0_158 = arith.constant 0 : index
    %c0_159 = arith.constant 0 : index
    %c0_160 = arith.constant 0 : index
    %c0_161 = arith.constant 0 : index
    %145 = vector.load %arg8[%c0_158, %c0_159, %c0_160, %c0_161] : memref<1x16x16x128xf32, #tpu.memory_space<vmem>>, vector<1x16x16x128xf32>
    %146 = vector.shape_cast %145 : vector<1x16x16x128xf32> to vector<16x16x128xf32>
    %147 = vector.shape_cast %144 : vector<16x16x128xf32> to vector<1x16x16x128xf32>
    tpu.vector_store %arg8[%c0_158, %c0_159, %c0_160, %c0_161], %147 {strides = array<i32>} : memref<1x16x16x128xf32, #tpu.memory_space<vmem>>, vector<1x16x16x128xf32>,
    return
  }
  func.func @transform_0(%arg0: i32) -> (i32, i32, i32, i32) {
    %c0_i32 = arith.constant 0 : i32
    %c0_i32_0 = arith.constant 0 : i32
    %c0_i32_1 = arith.constant 0 : i32
    %c0_i32_2 = arith.constant 0 : i32
    return %arg0, %c0_i32, %c0_i32_0, %c0_i32_1 : i32, i32, i32, i32
  }
  func.func @transform_1(%arg0: i32) -> (i32, i32, i32) {
    %c0_i32 = arith.constant 0 : i32
    %c0_i32_0 = arith.constant 0 : i32
    %c0_i32_1 = arith.constant 0 : i32
    %c0_i32_2 = arith.constant 0 : i32
    return %c0_i32, %c0_i32_0, %c0_i32_1 : i32, i32, i32
  }
  func.func @transform_2(%arg0: i32) -> (i32, i32) {
    %c0_i32 = arith.constant 0 : i32
    %c0_i32_0 = arith.constant 0 : i32
    %c0_i32_1 = arith.constant 0 : i32
    return %c0_i32, %c0_i32_0 : i32, i32
  }
  func.func @transform_3(%arg0: i32) -> (i32, i32, i32) {
    %c0_i32 = arith.constant 0 : i32
    %c0_i32_0 = arith.constant 0 : i32
    %c0_i32_1 = arith.constant 0 : i32
    %c0_i32_2 = arith.constant 0 : i32
    return %c0_i32, %c0_i32_0, %c0_i32_1 : i32, i32, i32
  }
  func.func @transform_4(%arg0: i32) -> (i32, i32) {
    %c0_i32 = arith.constant 0 : i32
    %c0_i32_0 = arith.constant 0 : i32
    %c0_i32_1 = arith.constant 0 : i32
    return %c0_i32, %c0_i32_0 : i32, i32
  }
  func.func @transform_5(%arg0: i32) -> (i32, i32) {
    %c0_i32 = arith.constant 0 : i32
    %c0_i32_0 = arith.constant 0 : i32
    %c0_i32_1 = arith.constant 0 : i32
    return %c0_i32, %c0_i32_0 : i32, i32
  }
  func.func @transform_6(%arg0: i32) -> (i32, i32) {
    %c0_i32 = arith.constant 0 : i32
    %c0_i32_0 = arith.constant 0 : i32
    %c0_i32_1 = arith.constant 0 : i32
    return %c0_i32, %c0_i32_0 : i32, i32
  }
  func.func @transform_7(%arg0: i32) -> (i32, i32, i32, i32) {
    %c0_i32 = arith.constant 0 : i32
    %c0_i32_0 = arith.constant 0 : i32
    %c0_i32_1 = arith.constant 0 : i32
    %c0_i32_2 = arith.constant 0 : i32
    return %arg0, %c0_i32, %c0_i32_0, %c0_i32_1 : i32, i32, i32, i32
  }
}

</mosaic_0001>

<bundles_post_ra>
// kernel: tpu_custom_call.1
= control target key start
LH: loop header
LB: loop body
LE: loop exit
PB: predicated region body
PF: predicated region fallthrough
CT: control target
= control target key end

     0   :  { %12 = vsyncpa [#allocation4], 0  ;;  %s12441_s0 = inlined_call_operand.vmem [shape: f32[2,18,18,128], index: 0, kind: input, shape index: {}]   ;;  %s12442_s1 = inlined_call_operand.vmem [shape: f32[9,128,128], index: 1, kind: input, shape index: {}]   ;;  %s12443_s2 = inlined_call_operand.vmem [shape: f32[1,128], index: 2, kind: input, shape index: {}]   ;;  %s12444_s3 = inlined_call_operand.hbm [shape: f32[9,128,128], index: 3, kind: input, shape index: {}]   ;;  %s12445_s4 = inlined_call_operand.vmem [shape: f32[1,128], index: 4, kind: input, shape index: {}]   ;;  %s12446_s5 = inlined_call_operand.vmem [shape: f32[128,128], index: 5, kind: input, shape index: {}]   ;;  %s12447_s6 = inlined_call_operand.vmem [shape: f32[1,128], index: 6, kind: input, shape index: {}]   ;;  %s12448_s7 = inlined_call_operand.hbm [shape: f32[2,16,16,128], index: 7, kind: output, shape index: {}]  }
   0x1   :  { %13 = vsyncpa [#allocation5], 0 }
   0x2   :  { %15 = vsyncpa [#allocation5 + $0x1], 0  ;;  %s10556_s24 = smov 0   ;;  %s10558_s25 = smov 0  }
   0x3   :  { %s10560_s26 = smov 0   ;;  %s10562_s27 = smov 0  }
   0x4 LB: > { %s10577_s28 = sadd.s32 4294967295, %s10507_s27   ;;  %s6323_s29 = sadd.s32 4294967294, %s10507_s27   ;;  %s10507_s27 = sphi %s10562_s27, %s12621_s27   ;;  %s10503_s26 = sphi %s10560_s26, %s12620_s26   ;;  %s10499_s25 = sphi %s10558_s25, %s12619_s25   ;;  %s10495_s24 = sphi %s10556_s24, %s12618_s24  }
   0x5   : > { %s10581_s30 = sadd.s32 1, %s10507_s27   ;;  %s180_s8 = sadd.s32 1, %s10503_s26 }
   0x6   : > { %s177_s9 = ssub.s32 %s10507_s27, %s10581_s30  ;;  %p190_p0 = scmp.ne.s32.totalorder %s10503_s26, %s10499_s25 }
   0x7   : > { %p178_p1 = scmp.eq.s32.totalorder %s177_s9, 0  ;;  %p191_p2 = scmp.eq.s32.totalorder %s10577_s28, 1 }
   0x8   : > { %p196_p3 = scmp.ne.s32.totalorder %s10499_s25, %s10495_s24  ;;  %p197_p4 = scmp.eq.s32.totalorder %s6323_s29, 1 }
   0x9   : > { %s10592_s10 = scalar_select %p178_p1, %s10503_s26, %s180_s8  }
   0xa   : > { %p10594_p5 = por %p191_p2, %p190_p0  ;;  %p10598_p6 = por %p197_p4, %p196_p3 }
   0xb   : > { %p6324_p7 = scmp.ge.s32.totalorder %s10507_s27, 1  ;;  %p204_p8 = scmp.lt.s32.totalorder %s10507_s27, 3 }
   0xc   : > { %s12501_s11 = scalar_select %p10594_p5, 1, 0 }
   0xd   : > { %s12502_s12 = scalar_select %p10598_p6, 1, 0 }
   0xe   : > { %p12449_p9 = scmp.eq.s32.totalorder %s10577_s28, 0  ;;  %p10605_p10 = pnand %p6324_p7, %p204_p8 }
   0xf   : > { %s10509_s14 = smov [#allocation3]   ;;  %s10413_s19 = scalar_lea.hbm %s12444_s3, 18432 }
  0x10   : > { %s12503_s13 = scalar_select %p10605_p10, 1, 0 }
  0x11   : > { %s222_s15 = sshll.u32 %s10509_s14, 4  ;;  %p10363_p11 = pneg %p10605_p10  ;;  %s223_s15 = int_to_ptr.vmem [resolvable:$true] %s222_s15 }
  0x12   : > { %p10414_p13 = scmp.ne.s32.totalorder %s12444_s3, %s10413_s19  ;;  %p10420_p3 = scmp.lt.u32.totalorder %s10413_s19, %s12444_s3 }
  0x13   : > { %p10613_p12 = pnand %p12449_p9, %p10363_p11 }
  0x15   : > { %p10415_p0 = pneg %p10613_p12 }
  0x17   : > { %p10416_p1 = pnand %p10415_p0, %p10414_p13 }
  0x19   : > { %p10417_p2 = pneg %p10416_p1 }
  0x1b   : > { %p10422_p4 = pnand %p10420_p3, %p10417_p2 }
  0x1d   : > { %10425 = shalt.err (!%p10422_p4)
}
  0x1e   : > { %s10426_s29 = scalar_lea.vmem %s223_s15, 18432  ;;  %p10434_p9 = scmp.lt.s32.totalorder %s223_s15, %s223_s15 }
  0x1f   : > { %p10427_p7 = scmp.ne.s32.totalorder %s223_s15, %s10426_s29  ;;  %p10435_p6 = scmp.lt.s32.totalorder %s10426_s29, %s10426_s29 }
  0x21   : > { %p10429_p8 = pnand %p10427_p7, %p10415_p0  ;;  %p10436_p5 = por %p10435_p6, %p10434_p9 }
  0x23   : > { %p10430_p11 = pneg %p10429_p8 }
  0x25   : > { %p10437_p10 = pnand %p10436_p5, %p10430_p11 }
  0x27   : > { %10440 = shalt.err (!%p10437_p10)
}
  0x28   : > { %s10510_s8 = smov 128   ;;  %s10511_s9 = smov 8  }
  0x29   : > { %10366 = dma.hbm_to_vmem [thread:$0]  (!%p10613_p12), %s12444_s3, 18432, %s223_s15, [#allocation4], %s10510_s8, %s10510_s8, %s10511_s9  }
  0x2a   : > { %p12505_p13 = scmp.ne.s32.totalorder %s12503_s13, 0 }
  0x2c   : > { %255 = sbr.rel (%p12505_p13) target bundleno = 1683 (0x693), region = 48 }
  0x33   : > { %p12506_p1 = scmp.eq.s32.totalorder %s10577_s28, 0 }
  0x35   : > { %10486 = dma.done.wait (%p12506_p1), [#allocation4], 18432   ;;  %p12507_p0 = pmov %p12506_p1 }
  0x36   : > { %p287_p5 = scmp.lt.s32.totalorder %s10577_s28, 1  ;;  %v6331_v0 = vld [vmem:[%s12442_s1 + $0x80] sm:$0xff]  ;;  %v6332_v1 = vld [vmem:[%s12442_s1 + $0x88] sm:$0xff]  ;;  %v6333_v2 = vld [vmem:[%s12442_s1 + $0x90] sm:$0xff]  ;;  %s284_s21 = sand.u32 1, %s10499_s25  }
  0x37   : > { %10488 = vsyncadd (%p12507_p0), [#allocation4], 4294948864  ;;  %v9124_v3 = vpack.c.bf16 %v6332_v1, %v6331_v0  ;;  %v6334_v4 = vld [vmem:[%s12442_s1 + $0x98] sm:$0xff]  ;;  %v6335_v6 = vld [vmem:[%s12442_s1 + $0xa0] sm:$0xff]  ;;  %s6329_s13 = sshll.u32 %s284_s21, 8  ;;  %p12616_p9 = scmp.ne.s32.totalorder %s12501_s11, 0 }
  0x38   : > { %s288_s18 = scalar_select %p287_p5, %s10577_s28, 1  ;;  %v9128_v5 = vpack.c.bf16 %v6334_v4, %v6333_v2  ;;  %v6336_v7 = vld [vmem:[%s12442_s1 + $0xa8] sm:$0xff]  ;;  %v6337_v10 = vld [vmem:[%s12442_s1 + $0xb0] sm:$0xff]  ;;  %v6338_v11 = vld [vmem:[%s12442_s1 + $0xb8] sm:$0xff] }
  0x39   : > { %9125 = vmatprep.subr.bf16.mxu0 %v9124_v3  ;;  %v9132_v8 = vpack.c.bf16 %v6336_v7, %v6335_v6  ;;  %v9136_v12 = vpack.c.bf16 %v6338_v11, %v6337_v10  ;;  %v6339_v13 = vld [vmem:[%s12442_s1 + $0xc0] sm:$0xff]  ;;  %v6340_v14 = vld [vmem:[%s12442_s1 + $0xc8] sm:$0xff]  ;;  %v6341_v16 = vld [vmem:[%s12442_s1 + $0xd0] sm:$0xff]  ;;  %s12305_s22 = scalar_lea.vmem [#allocation6], %s6329_s13  ;;  %s10513_s17 = smov [#allocation6]  }
  0x3a   : > { %s10356_s19 = smul.u32 432, %s288_s18  ;;  %9127 = vmatpush3.bf16.msra.mxu0 %v9124_v3  ;;  %v9140_v15 = vpack.c.bf16 %v6340_v14, %v6339_v13  ;;  %v6342_v17 = vld [vmem:[%s12442_s1 + $0xd8] sm:$0xff]  ;;  %v6343_v19 = vld [vmem:[%s12442_s1 + $0xe0] sm:$0xff]  ;;  %v6344_v20 = vld [vmem:[%s12442_s1 + $0xe8] sm:$0xff]  ;;  %s6249_s23 = sshll.u32 %s12305_s22, 4  ;;  %s12394_s23 = int_to_ptr.vmem [resolvable:$true] %s6249_s23 }
  0x3b   : > { %9129 = vmatprep.subr.bf16.mxu0 %v9128_v5  ;;  %v9144_v18 = vpack.c.bf16 %v6342_v17, %v6341_v16  ;;  %v9148_v21 = vpack.c.bf16 %v6344_v20, %v6343_v19  ;;  %v6345_v22 = vld [vmem:[%s12442_s1 + $0xf0] sm:$0xff]  ;;  %v6346_v23 = vld [vmem:[%s12442_s1 + $0xf8] sm:$0xff]  ;;  %v324_v25 = vld [vmem:[%s12442_s1] sm:$0xff]  ;;  %s10441_s14 = scalar_lea.vmem %s12394_s23, 4096  ;;  %s10445_s18 = sshll.u32 %s10513_s17, 4  ;;  %s10446_s18 = int_to_ptr.vmem [resolvable:$false] %s10445_s18 }
  0x3c   : > { %s10662_s16 = scalar_lea.vmem %s12441_s0, %s10356_s19  ;;  %v9152_v24 = vpack.c.bf16 %v6346_v23, %v6345_v22  ;;  %v325_v26 = vld [vmem:[%s12442_s1 + $0x8] sm:$0xff]  ;;  %v326_v28 = vld [vmem:[%s12442_s1 + $0x10] sm:$0xff]  ;;  %v327_v29 = vld [vmem:[%s12442_s1 + $0x18] sm:$0xff]  ;;  %s6691_s19 = sshll.u32 %s10577_s28, 12 }
  0x3d   : > { %v340_v9 = vld [vmem:[%s10662_s16 + $0x1] sm:$0xff]  ;;  %v9156_v27 = vpack.c.bf16 %v325_v26, %v324_v25  ;;  %v341_v30 = vld [vmem:[%s10662_s16 + $0x9] sm:$0xff]  ;;  %v10709_v31 = vld [vmem:[%s10662_s16 + $0x19] sm:$0xff]  ;;  %v9160_v32 = vpack.c.bf16 %v327_v29, %v326_v28  ;;  %s12392_s9 = scalar_lea.hbm %s12448_s7, %s6691_s19  ;;  %s12400_s28 = scalar_lea.sflag [#allocation5], %s284_s21 }
  0x3e   : > { %7636 = vmatprep.mubr.f32.mxu0 %v340_v9  ;;  %9131 = vmatpush3.bf16.msra.mxu0 %v9128_v5  ;;  %v328_v33 = vld [vmem:[%s12442_s1 + $0x20] sm:$0xff]  ;;  %v329_v34 = vld [vmem:[%s12442_s1 + $0x28] sm:$0xff]  ;;  %v10722_v36 = vld [vmem:[%s10662_s16 + $0x31] sm:$0xff]  ;;  %p10442_p6 = scmp.ne.s32.totalorder %s12394_s23, %s10441_s14  ;;  %s10447_s20 = scalar_lea.vmem %s10446_s18, 8192 }
  0x3f   : > { %9133 = vmatprep.subr.bf16.mxu0 %v9132_v8  ;;  %v10719_v35 = vld [vmem:[%s10662_s16 + $0x21] sm:$0xff]  ;;  %v9164_v37 = vpack.c.bf16 %v329_v34, %v328_v33  ;;  %v330_v38 = vld [vmem:[%s12442_s1 + $0x30] sm:$0xff]  ;;  %v331_v39 = vld [vmem:[%s12442_s1 + $0x38] sm:$0xff]  ;;  %p10448_p2 = scmp.lt.s32.totalorder %s12394_s23, %s10446_s18  ;;  %p10449_p3 = scmp.lt.s32.totalorder %s10447_s20, %s10441_s14 }
  0x40   : > { %v10733_v40 = vld [vmem:[%s10662_s16 + $0x39] sm:$0xff]  ;;  %v10736_v41 = vld [vmem:[%s10662_s16 + $0x49] sm:$0xff]  ;;  %v9168_v42 = vpack.c.bf16 %v331_v39, %v330_v38  ;;  %v10747_v45 = vld [vmem:[%s10662_s16 + $0x51] sm:$0xff]  ;;  %p10443_p10 = pnand %p10442_p6, %p12616_p9 }
  0x41   : > { %v332_v43 = vld [vmem:[%s12442_s1 + $0x40] sm:$0xff]  ;;  %v333_v44 = vld [vmem:[%s12442_s1 + $0x48] sm:$0xff]  ;;  %v334_v48 = vld [vmem:[%s12442_s1 + $0x50] sm:$0xff]  ;;  %p10450_p4 = por %p10449_p3, %p10448_p2 }
  0x42   : > { %9135 = vmatpush3.bf16.msra.mxu0 %v9132_v8  ;;  %v10750_v46 = vld [vmem:[%s10662_s16 + $0x61] sm:$0xff]  ;;  %v9172_v47 = vpack.c.bf16 %v333_v44, %v332_v43  ;;  %v335_v49 = vld [vmem:[%s12442_s1 + $0x58] sm:$0xff]  ;;  %v10761_v50 = vld [vmem:[%s10662_s16 + $0x69] sm:$0xff]  ;;  %p10444_p12 = pneg %p10443_p10 }
  0x43   : > { %9137 = vmatprep.subr.bf16.mxu0 %v9136_v12  ;;  %v10764_v51 = vld [vmem:[%s10662_s16 + $0x79] sm:$0xff]  ;;  %v9176_v52 = vpack.c.bf16 %v335_v49, %v334_v48  ;;  %v337_v54 = vld [vmem:[%s12442_s1 + $0x68] sm:$0xff]  ;;  %v10778_v56 = vld [vmem:[%s10662_s16 + $0x91] sm:$0xff] }
  0x44   : > { %v336_v53 = vld [vmem:[%s12442_s1 + $0x60] sm:$0xff]  ;;  %v338_v58 = vld [vmem:[%s12442_s1 + $0x70] sm:$0xff]  ;;  %v339_v59 = vld [vmem:[%s12442_s1 + $0x78] sm:$0xff]  ;;  %p10451_p7 = pnand %p10450_p4, %p10444_p12 }
  0x45   : > { %v10775_v55 = vld [vmem:[%s10662_s16 + $0x81] sm:$0xff]  ;;  %v9180_v57 = vpack.c.bf16 %v337_v54, %v336_v53  ;;  %v10789_v60 = vld [vmem:[%s10662_s16 + $0x99] sm:$0xff]  ;;  %v10792_v61 = vld [vmem:[%s10662_s16 + $0xa9] sm:$0xff]  ;;  %v9184_v62 = vpack.c.bf16 %v339_v59, %v338_v58 }
  0x46   : > { %9139 = vmatpush3.bf16.msra.mxu0 %v9136_v12  ;;  %v6347_v63 = vld [vmem:[%s12442_s1 + $0x100] sm:$0xff]  ;;  %v6348_v0 = vld [vmem:[%s12442_s1 + $0x108] sm:$0xff]  ;;  %v10803_v1 = vld [vmem:[%s10662_s16 + $0xb1] sm:$0xff] }
  0x47   : > { %9141 = vmatprep.subr.bf16.mxu0 %v9140_v15  ;;  %v10806_v2 = vld [vmem:[%s10662_s16 + $0xc1] sm:$0xff]  ;;  %v9188_v3 = vpack.c.bf16 %v6348_v0, %v6347_v63  ;;  %v10811_v4 = vld [vmem:[%s10662_s16 + $0xc9] sm:$0xff]  ;;  %v10814_v5 = vld [vmem:[%s10662_s16 + $0xd9] sm:$0xff] }
  0x48   : > { %v10819_v6 = vld [vmem:[%s10662_s16 + $0xe1] sm:$0xff]  ;;  %v10822_v7 = vld [vmem:[%s10662_s16 + $0xf1] sm:$0xff]  ;;  %v10827_v8 = vld [vmem:[%s10662_s16 + $0xf9] sm:$0xff] }
  0x49   : > { %v10830_v9 = vld [vmem:[%s10662_s16 + $0x109] sm:$0xff]  ;;  %v10835_v10 = vld [vmem:[%s10662_s16 + $0x111] sm:$0xff]  ;;  %v10838_v11 = vld [vmem:[%s10662_s16 + $0x121] sm:$0xff] }
  0x4a   : > { %9143 = vmatpush3.bf16.msra.mxu0 %v9140_v15  ;;  %v10843_v12 = vld [vmem:[%s10662_s16 + $0x129] sm:$0xff]  ;;  %v10846_v13 = vld [vmem:[%s10662_s16 + $0x139] sm:$0xff]  ;;  %v10851_v14 = vld [vmem:[%s10662_s16 + $0x141] sm:$0xff] }
  0x4b   : > { %9145 = vmatprep.subr.bf16.mxu0 %v9144_v18  ;;  %12508 = vst [vmem:[#allocation9_spill] sm:$0xff] %v10843_v12  ;;  %12509 = vst [vmem:[#allocation10_spill] sm:$0xff] %v10846_v13  ;;  %v10854_v15 = vld [vmem:[%s10662_s16 + $0x151] sm:$0xff]  ;;  %v10859_v16 = vld [vmem:[%s10662_s16 + $0x159] sm:$0xff] }
  0x4c   : > { %12510 = vst [vmem:[#allocation11_spill] sm:$0xff] %v10851_v14  ;;  %12511 = vst [vmem:[#allocation12_spill] sm:$0xff] %v10854_v15  ;;  %v10862_v17 = vld [vmem:[%s10662_s16 + $0x169] sm:$0xff]  ;;  %v292_v19 = vld [vmem:[%s10662_s16] sm:$0xff] }
  0x4d   : > { %12512 = vst [vmem:[#allocation13_spill] sm:$0xff] %v10859_v16  ;;  %12513 = vst [vmem:[#allocation14_spill] sm:$0xff] %v10862_v17  ;;  %v6349_v20 = vld [vmem:[%s12442_s1 + $0x110] sm:$0xff]  ;;  %v293_v22 = vld [vmem:[%s10662_s16 + $0x8] sm:$0xff] }
  0x4e   : > { %9147 = vmatpush3.bf16.msra.mxu0 %v9144_v18  ;;  %v10867_v18 = vld [vmem:[%s10662_s16 + $0x171] sm:$0xff]  ;;  %v6351_v25 = vld [vmem:[%s12442_s1 + $0x120] sm:$0xff]  ;;  %v6352_v26 = vld [vmem:[%s12442_s1 + $0x128] sm:$0xff] }
  0x4f   : > { %9149 = vmatprep.subr.bf16.mxu0 %v9148_v21  ;;  %12514 = vst [vmem:[#allocation15_spill] sm:$0xff] %v10867_v18  ;;  %v10879_v23 = vld [vmem:[%s10662_s16 + $0x18] sm:$0xff]  ;;  %v10892_v28 = vld [vmem:[%s10662_s16 + $0x30] sm:$0xff]  ;;  %v9196_v29 = vpack.c.bf16 %v6352_v26, %v6351_v25  ;;  %v10906_v34 = vld [vmem:[%s10662_s16 + $0x48] sm:$0xff] }
  0x50   : > { %v10903_v33 = vld [vmem:[%s10662_s16 + $0x38] sm:$0xff]  ;;  %v6355_v38 = vld [vmem:[%s12442_s1 + $0x140] sm:$0xff]  ;;  %v6356_v39 = vld [vmem:[%s12442_s1 + $0x148] sm:$0xff] }
  0x51   : > { %v10920_v43 = vld [vmem:[%s10662_s16 + $0x60] sm:$0xff]  ;;  %v9204_v44 = vpack.c.bf16 %v6356_v39, %v6355_v38  ;;  %v6358_v48 = vld [vmem:[%s12442_s1 + $0x158] sm:$0xff]  ;;  %v10931_v49 = vld [vmem:[%s10662_s16 + $0x68] sm:$0xff] }
  0x52   : > { %9151 = vmatpush3.bf16.msra.mxu0 %v9148_v21  ;;  %v6350_v21 = vld [vmem:[%s12442_s1 + $0x118] sm:$0xff]  ;;  %v6359_v54 = vld [vmem:[%s12442_s1 + $0x160] sm:$0xff]  ;;  %v10948_v59 = vld [vmem:[%s10662_s16 + $0x90] sm:$0xff] }
  0x53   : > { %9153 = vmatprep.subr.bf16.mxu0 %v9152_v24  ;;  %v10945_v58 = vld [vmem:[%s10662_s16 + $0x80] sm:$0xff]  ;;  %v6361_v63 = vld [vmem:[%s12442_s1 + $0x170] sm:$0xff]  ;;  %v6362_v0 = vld [vmem:[%s12442_s1 + $0x178] sm:$0xff] }
  0x54   : > { %v10976_v25 = vld [vmem:[%s10662_s16 + $0xc0] sm:$0xff]  ;;  %v10997_v38 = vld [vmem:[%s10662_s16 + $0xf8] sm:$0xff]  ;;  %v11000_v39 = vld [vmem:[%s10662_s16 + $0x108] sm:$0xff] }
  0x56   : > { %9155 = vmatpush3.bf16.msra.mxu0 %v9152_v24  ;;  %v9192_v24 = vpack.c.bf16 %v6350_v21, %v6349_v20  ;;  %v9216_v20 = vpack.c.bf16 %v6362_v0, %v6361_v63  ;;  %v6395_v21 = vld [vmem:[%s12442_s1 + $0x180] sm:$0xff]  ;;  %v11032_v63 = vld [vmem:[%s10662_s16 + $0x168] sm:$0xff]  ;;  %v11037_v0 = vld [vmem:[%s10662_s16 + $0x170] sm:$0xff] }
  0x57   : > { %9157 = vmatprep.subr.bf16.mxu0 %v9156_v27 }
  0x59   : > { %7637 = vmatmul.mubr.f32.vlgmr.msra.gmra.mrb[0].mxu0 %v341_v30  ;;  %v6353_v30 = vld [vmem:[%s12442_s1 + $0x130] sm:$0xff] }
  0x5a   : > { %9159 = vmatpush3.bf16.msra.mxu0 %v9156_v27  ;;  %7639 = vmatprep.mubr.f32.mxu0 %v10709_v31  ;;  %v10889_v27 = vld [vmem:[%s10662_s16 + $0x20] sm:$0xff] }
  0x5b   : > { %9161 = vmatprep.subr.bf16.mxu0 %v9160_v32 }
  0x5d   : > { %7640 = vmatmul.mubr.f32.gmra.mrb[2].mxu0 %v10719_v35 }
  0x5e   : > { %7642 = vmatprep.mubr.f32.mxu0 %v10722_v36  ;;  %9163 = vmatpush3.bf16.msra.mxu0 %v9160_v32  ;;  %v6354_v32 = vld [vmem:[%s12442_s1 + $0x138] sm:$0xff] }
  0x5f   : > { %9165 = vmatprep.subr.bf16.mxu0 %v9164_v37 }
  0x61   : > { %7643 = vmatmul.mubr.f32.gmra.mrb[4].mxu0 %v10733_v40 }
  0x62   : > { %7645 = vmatprep.mubr.f32.mxu0 %v10736_v41  ;;  %9167 = vmatpush3.bf16.msra.mxu0 %v9164_v37  ;;  %v9200_v37 = vpack.c.bf16 %v6354_v32, %v6353_v30  ;;  %v10984_v30 = vld [vmem:[%s10662_s16 + $0xd8] sm:$0xff]  ;;  %v10989_v32 = vld [vmem:[%s10662_s16 + $0xe0] sm:$0xff] }
  0x63   : > { %9169 = vmatprep.subr.bf16.mxu0 %v9168_v42 }
  0x65   : > { %7646 = vmatmul.mubr.f32.gmra.mrb[6].mxu0 %v10747_v45 }
  0x66   : > { %7648 = vmatprep.mubr.f32.mxu0 %v10750_v46  ;;  %9171 = vmatpush3.bf16.msra.mxu0 %v9168_v42  ;;  %v10917_v42 = vld [vmem:[%s10662_s16 + $0x50] sm:$0xff] }
  0x67   : > { %9173 = vmatprep.subr.bf16.mxu0 %v9172_v47 }
  0x69   : > { %7649 = vmatmul.mubr.f32.gmra.mrb[8].mxu0 %v10761_v50 }
  0x6a   : > { %7651 = vmatprep.mubr.f32.mxu0 %v10764_v51  ;;  %9175 = vmatpush3.bf16.msra.mxu0 %v9172_v47  ;;  %v6357_v47 = vld [vmem:[%s12442_s1 + $0x150] sm:$0xff] }
  0x6b   : > { %9177 = vmatprep.subr.bf16.mxu0 %v9176_v52  ;;  %v9208_v53 = vpack.c.bf16 %v6358_v48, %v6357_v47  ;;  %v11008_v47 = vld [vmem:[%s10662_s16 + $0x120] sm:$0xff]  ;;  %v11013_v48 = vld [vmem:[%s10662_s16 + $0x128] sm:$0xff] }
  0x6d   : > { %7652 = vmatmul.mubr.f32.gmra.mrb[10].mxu0 %v10775_v55 }
  0x6e   : > { %7654 = vmatprep.mubr.f32.mxu0 %v10778_v56  ;;  %9179 = vmatpush3.bf16.msra.mxu0 %v9176_v52  ;;  %v10934_v52 = vld [vmem:[%s10662_s16 + $0x78] sm:$0xff] }
  0x6f   : > { %9181 = vmatprep.subr.bf16.mxu0 %v9180_v57 }
  0x71   : > { %7655 = vmatmul.mubr.f32.gmra.mrb[12].mxu0 %v10789_v60 }
  0x72   : > { %7657 = vmatprep.mubr.f32.mxu0 %v10792_v61  ;;  %9183 = vmatpush3.bf16.msra.mxu0 %v9180_v57  ;;  %v6360_v57 = vld [vmem:[%s12442_s1 + $0x168] sm:$0xff] }
  0x73   : > { %9185 = vmatprep.subr.bf16.mxu0 %v9184_v62 }
  0x75   : > { %7658 = vmatmul.mubr.f32.gmra.mrb[14].mxu0 %v10803_v1 }
  0x76   : > { %7660 = vmatprep.mubr.f32.mxu0 %v10806_v2  ;;  %9187 = vmatpush3.bf16.msra.mxu0 %v9184_v62  ;;  %v9212_v62 = vpack.c.bf16 %v6360_v57, %v6359_v54  ;;  %v11021_v54 = vld [vmem:[%s10662_s16 + $0x140] sm:$0xff]  ;;  %v11024_v57 = vld [vmem:[%s10662_s16 + $0x150] sm:$0xff] }
  0x77   : > { %9189 = vmatprep.subr.bf16.mxu0 %v9188_v3 }
  0x79   : > { %7661 = vmatmul.mubr.f32.gmra.mrb[16].mxu0 %v10811_v4 }
  0x7a   : > { %7663 = vmatprep.mubr.f32.mxu0 %v10814_v5 }
  0x7d   : > { %7664 = vmatmul.mubr.f32.gmra.mrb[18].mxu0 %v10819_v6 }
  0x7e   : > { %7666 = vmatprep.mubr.f32.mxu0 %v10822_v7 }
  0x81   : > { %7667 = vmatmul.mubr.f32.gmra.mrb[20].mxu0 %v10827_v8 }
  0x82   : > { %7669 = vmatprep.mubr.f32.mxu0 %v10830_v9 }
  0x85   : > { %7670 = vmatmul.mubr.f32.gmra.mrb[22].mxu0 %v10835_v10 }
  0x86   : > { %7672 = vmatprep.mubr.f32.mxu0 %v10838_v11 }
  0x89   : > { %7673 = vmatmul.mubr.f32.gmra.mrb[24].mxu0 %v10843_v12  ;;  %v6402_v12 = vld [vmem:[%s12442_s1 + $0x1b8] sm:$0xff] }
  0x8a   : > { %7675 = vmatprep.mubr.f32.mxu0 %v10846_v13  ;;  %v11059_v13 = vld [vmem:[%s10662_s16 + $0x22] sm:$0xff] }
  0x8b   : > { %12516 = vst [vmem:[#allocation17_spill] sm:$0xff] %v11059_v13 }
  0x8d   : > { %7676 = vmatmul.mubr.f32.gmra.mrb[26].mxu0 %v10851_v14  ;;  %v6400_v14 = vld [vmem:[%s12442_s1 + $0x1a8] sm:$0xff] }
  0x8e   : > { %7678 = vmatprep.mubr.f32.mxu0 %v10854_v15  ;;  %v6399_v15 = vld [vmem:[%s12442_s1 + $0x1a0] sm:$0xff] }
  0x91   : > { %7679 = vmatmul.mubr.f32.gmra.mrb[28].mxu0 %v10859_v16 }
  0x92   : > { %7681 = vmatprep.mubr.f32.mxu0 %v10862_v17  ;;  %v11049_v17 = vld [vmem:[%s10662_s16 + $0x1a] sm:$0xff] }
  0x93   : > { %12515 = vst [vmem:[#allocation16_spill] sm:$0xff] %v11049_v17 }
  0x95   : > { %7682 = vmatmul.mubr.f32.gmra.mrb[30].mxu0 %v10867_v18  ;;  %v840_v18 = vld [vmem:[%s10662_s16 + $0xa] sm:$0xff] }
  0x96   : > { %7716 = vmatprep.mubr.f32.mxu0 %v292_v19  ;;  %v10962_v19 = vld [vmem:[%s10662_s16 + $0xa8] sm:$0xff] }
  0x99   : > { %7717 = vmatmul.mubr.f32.vlgmr.msra.gmra.mrb[0].mxu0 %v293_v22  ;;  %v6396_v22 = vld [vmem:[%s12442_s1 + $0x188] sm:$0xff] }
  0x9a   : > { %9191 = vmatpush3.bf16.msra.mxu0 %v9188_v3  ;;  %7719 = vmatprep.mubr.f32.mxu0 %v10879_v23  ;;  %v10959_v3 = vld [vmem:[%s10662_s16 + $0x98] sm:$0xff]  ;;  %v9220_v26 = vpack.c.bf16 %v6396_v22, %v6395_v21  ;;  %v6397_v21 = vld [vmem:[%s12442_s1 + $0x190] sm:$0xff] }
  0x9b   : > { %9193 = vmatprep.subr.bf16.mxu0 %v9192_v24  ;;  %v6398_v22 = vld [vmem:[%s12442_s1 + $0x198] sm:$0xff] }
  0x9c   : > { %v9224_v16 = vpack.c.bf16 %v6398_v22, %v6397_v21  ;;  %v9228_v21 = vpack.c.bf16 %v6400_v14, %v6399_v15  ;;  %v6401_v22 = vld [vmem:[%s12442_s1 + $0x1b0] sm:$0xff]  ;;  %v6403_v15 = vld [vmem:[%s12442_s1 + $0x1c0] sm:$0xff] }
  0x9d   : > { %7720 = vmatmul.mubr.f32.gmra.mrb[2].mxu0 %v10889_v27  ;;  %v9232_v14 = vpack.c.bf16 %v6402_v12, %v6401_v22  ;;  %v6405_v22 = vld [vmem:[%s12442_s1 + $0x1d0] sm:$0xff] }
  0x9e   : > { %7722 = vmatprep.mubr.f32.mxu0 %v10892_v28  ;;  %9195 = vmatpush3.bf16.msra.mxu0 %v9192_v24  ;;  %v10973_v24 = vld [vmem:[%s10662_s16 + $0xb0] sm:$0xff] }
  0x9f   : > { %9197 = vmatprep.subr.bf16.mxu0 %v9196_v29 }
  0xa1   : > { %7723 = vmatmul.mubr.f32.gmra.mrb[4].mxu0 %v10903_v33 }
  0xa2   : > { %7725 = vmatprep.mubr.f32.mxu0 %v10906_v34  ;;  %9199 = vmatpush3.bf16.msra.mxu0 %v9196_v29  ;;  %v10981_v29 = vld [vmem:[%s10662_s16 + $0xc8] sm:$0xff] }
  0xa3   : > { %9201 = vmatprep.subr.bf16.mxu0 %v9200_v37 }
  0xa5   : > { %7726 = vmatmul.mubr.f32.gmra.mrb[6].mxu0 %v10917_v42 }
  0xa6   : > { %7728 = vmatprep.mubr.f32.mxu0 %v10920_v43  ;;  %9203 = vmatpush3.bf16.msra.mxu0 %v9200_v37  ;;  %v10992_v37 = vld [vmem:[%s10662_s16 + $0xf0] sm:$0xff] }
  0xa7   : > { %9205 = vmatprep.subr.bf16.mxu0 %v9204_v44 }
  0xa9   : > { %7729 = vmatmul.mubr.f32.gmra.mrb[8].mxu0 %v10931_v49 }
  0xaa   : > { %7731 = vmatprep.mubr.f32.mxu0 %v10934_v52  ;;  %9207 = vmatpush3.bf16.msra.mxu0 %v9204_v44  ;;  %v11005_v44 = vld [vmem:[%s10662_s16 + $0x110] sm:$0xff] }
  0xab   : > { %9209 = vmatprep.subr.bf16.mxu0 %v9208_v53 }
  0xad   : > { %7732 = vmatmul.mubr.f32.gmra.mrb[10].mxu0 %v10945_v58 }
  0xae   : > { %7734 = vmatprep.mubr.f32.mxu0 %v10948_v59  ;;  %9211 = vmatpush3.bf16.msra.mxu0 %v9208_v53  ;;  %v11016_v53 = vld [vmem:[%s10662_s16 + $0x138] sm:$0xff] }
  0xaf   : > { %9213 = vmatprep.subr.bf16.mxu0 %v9212_v62 }
  0xb1   : > { %7735 = vmatmul.mubr.f32.gmra.mrb[12].mxu0 %v10959_v3 }
  0xb2   : > { %7737 = vmatprep.mubr.f32.mxu0 %v10962_v19  ;;  %9215 = vmatpush3.bf16.msra.mxu0 %v9212_v62  ;;  %v11029_v62 = vld [vmem:[%s10662_s16 + $0x158] sm:$0xff] }
  0xb3   : > { %9217 = vmatprep.subr.bf16.mxu0 %v9216_v20 }
  0xb5   : > { %7738 = vmatmul.mubr.f32.gmra.mrb[14].mxu0 %v10973_v24 }
  0xb6   : > { %7740 = vmatprep.mubr.f32.mxu0 %v10976_v25  ;;  %9219 = vmatpush3.bf16.msra.mxu0 %v9216_v20  ;;  %v839_v20 = vld [vmem:[%s10662_s16 + $0x2] sm:$0xff] }
  0xb7   : > { %9221 = vmatprep.subr.bf16.mxu0 %v9220_v26 }
  0xb9   : > { %7741 = vmatmul.mubr.f32.gmra.mrb[16].mxu0 %v10981_v29 }
  0xba   : > { %7743 = vmatprep.mubr.f32.mxu0 %v10984_v30 }
  0xbd   : > { %7744 = vmatmul.mubr.f32.gmra.mrb[18].mxu0 %v10989_v32 }
  0xbe   : > { %7746 = vmatprep.mubr.f32.mxu0 %v10992_v37 }
  0xc1   : > { %7747 = vmatmul.mubr.f32.gmra.mrb[20].mxu0 %v10997_v38 }
  0xc2   : > { %7749 = vmatprep.mubr.f32.mxu0 %v11000_v39 }
  0xc5   : > { %7750 = vmatmul.mubr.f32.gmra.mrb[22].mxu0 %v11005_v44 }
  0xc6   : > { %7752 = vmatprep.mubr.f32.mxu0 %v11008_v47 }
  0xc9   : > { %7753 = vmatmul.mubr.f32.gmra.mrb[24].mxu0 %v11013_v48 }
  0xca   : > { %7755 = vmatprep.mubr.f32.mxu0 %v11016_v53 }
  0xcd   : > { %7756 = vmatmul.mubr.f32.gmra.mrb[26].mxu0 %v11021_v54 }
  0xce   : > { %7758 = vmatprep.mubr.f32.mxu0 %v11024_v57 }
  0xd1   : > { %7759 = vmatmul.mubr.f32.gmra.mrb[28].mxu0 %v11029_v62 }
  0xd2   : > { %7761 = vmatprep.mubr.f32.mxu0 %v11032_v63 }
  0xd5   : > { %7762 = vmatmul.mubr.f32.gmra.mrb[30].mxu0 %v11037_v0 }
  0xd6   : > { %7796 = vmatprep.mubr.f32.mxu0 %v839_v20  ;;  %v11062_v20 = vld [vmem:[%s10662_s16 + $0x32] sm:$0xff] }
  0xd7   : > { %12517 = vst [vmem:[#allocation18_spill] sm:$0xff] %v11062_v20 }
  0xd9   : > { %7797 = vmatmul.mubr.f32.vlgmr.msra.gmra.mrb[0].mxu0 %v840_v18  ;;  %v11073_v18 = vld [vmem:[%s10662_s16 + $0x3a] sm:$0xff] }
  0xda   : > { %9223 = vmatpush3.bf16.msra.mxu0 %v9220_v26  ;;  %7799 = vmatprep.mubr.f32.mxu0 %v11049_v17  ;;  %12518 = vst [vmem:[#allocation19_spill] sm:$0xff] %v11073_v18  ;;  %v11076_v26 = vld [vmem:[%s10662_s16 + $0x4a] sm:$0xff] }
  0xdb   : > { %9225 = vmatprep.subr.bf16.mxu0 %v9224_v16  ;;  %12519 = vst [vmem:[#allocation20_spill] sm:$0xff] %v11076_v26  ;;  %v6404_v17 = vld [vmem:[%s12442_s1 + $0x1c8] sm:$0xff] }
  0xdc   : > { %v9236_v12 = vpack.c.bf16 %v6404_v17, %v6403_v15  ;;  %v6407_v15 = vld [vmem:[%s12442_s1 + $0x1e0] sm:$0xff] }
  0xdd   : > { %7800 = vmatmul.mubr.f32.gmra.mrb[2].mxu0 %v11059_v13  ;;  %v6406_v13 = vld [vmem:[%s12442_s1 + $0x1d8] sm:$0xff] }
  0xde   : > { %7802 = vmatprep.mubr.f32.mxu0 %v11062_v20  ;;  %9227 = vmatpush3.bf16.msra.mxu0 %v9224_v16  ;;  %v11087_v20 = vld [vmem:[%s10662_s16 + $0x52] sm:$0xff]  ;;  %v11090_v16 = vld [vmem:[%s10662_s16 + $0x62] sm:$0xff]  ;;  %v9240_v17 = vpack.c.bf16 %v6406_v13, %v6405_v22 }
  0xdf   : > { %9229 = vmatprep.subr.bf16.mxu0 %v9228_v21  ;;  %12520 = vst [vmem:[#allocation21_spill] sm:$0xff] %v11087_v20  ;;  %12521 = vst [vmem:[#allocation22_spill] sm:$0xff] %v11090_v16  ;;  %v6409_v22 = vld [vmem:[%s12442_s1 + $0x1f0] sm:$0xff] }
  0xe1   : > { %7803 = vmatmul.mubr.f32.gmra.mrb[4].mxu0 %v11073_v18  ;;  %v6408_v18 = vld [vmem:[%s12442_s1 + $0x1e8] sm:$0xff] }
  0xe2   : > { %7805 = vmatprep.mubr.f32.mxu0 %v11076_v26  ;;  %9231 = vmatpush3.bf16.msra.mxu0 %v9228_v21  ;;  %v11101_v26 = vld [vmem:[%s10662_s16 + $0x6a] sm:$0xff]  ;;  %v11104_v21 = vld [vmem:[%s10662_s16 + $0x7a] sm:$0xff]  ;;  %v9244_v13 = vpack.c.bf16 %v6408_v18, %v6407_v15 }
  0xe3   : > { %9233 = vmatprep.subr.bf16.mxu0 %v9232_v14  ;;  %12522 = vst [vmem:[#allocation23_spill] sm:$0xff] %v11101_v26  ;;  %12523 = vst [vmem:[#allocation24_spill] sm:$0xff] %v11104_v21  ;;  %v6443_v15 = vld [vmem:[%s12442_s1 + $0x200] sm:$0xff] }
  0xe5   : > { %7806 = vmatmul.mubr.f32.gmra.mrb[6].mxu0 %v11087_v20  ;;  %v6410_v20 = vld [vmem:[%s12442_s1 + $0x1f8] sm:$0xff] }
  0xe6   : > { %7808 = vmatprep.mubr.f32.mxu0 %v11090_v16  ;;  %9235 = vmatpush3.bf16.msra.mxu0 %v9232_v14  ;;  %v11115_v16 = vld [vmem:[%s10662_s16 + $0x82] sm:$0xff]  ;;  %v11118_v14 = vld [vmem:[%s10662_s16 + $0x92] sm:$0xff]  ;;  %v9248_v18 = vpack.c.bf16 %v6410_v20, %v6409_v22  ;;  %v11151_v22 = vld [vmem:[%s10662_s16 + $0xca] sm:$0xff] }
  0xe7   : > { %9237 = vmatprep.subr.bf16.mxu0 %v9236_v12  ;;  %12524 = vst [vmem:[#allocation25_spill] sm:$0xff] %v11118_v14  ;;  %12527 = vst [vmem:[#allocation28_spill] sm:$0xff] %v11151_v22 }
  0xe9   : > { %7809 = vmatmul.mubr.f32.gmra.mrb[8].mxu0 %v11101_v26  ;;  %v6444_v26 = vld [vmem:[%s12442_s1 + $0x208] sm:$0xff] }
  0xea   : > { %7811 = vmatprep.mubr.f32.mxu0 %v11104_v21  ;;  %9239 = vmatpush3.bf16.msra.mxu0 %v9236_v12  ;;  %v11129_v21 = vld [vmem:[%s10662_s16 + $0x9a] sm:$0xff]  ;;  %v11132_v12 = vld [vmem:[%s10662_s16 + $0xaa] sm:$0xff]  ;;  %v9252_v20 = vpack.c.bf16 %v6444_v26, %v6443_v15  ;;  %v11162_v26 = vld [vmem:[%s10662_s16 + $0xf2] sm:$0xff] }
  0xeb   : > { %9241 = vmatprep.subr.bf16.mxu0 %v9240_v17  ;;  %12525 = vst [vmem:[#allocation26_spill] sm:$0xff] %v11129_v21  ;;  %12530 = vst [vmem:[#allocation31_spill] sm:$0xff] %v11162_v26  ;;  %v11170_v15 = vld [vmem:[%s10662_s16 + $0x10a] sm:$0xff] }
  0xec   : > { %12532 = vst [vmem:[#allocation33_spill] sm:$0xff] %v11170_v15 }
  0xed   : > { %7812 = vmatmul.mubr.f32.gmra.mrb[10].mxu0 %v11115_v16 }
  0xee   : > { %7814 = vmatprep.mubr.f32.mxu0 %v11118_v14  ;;  %9243 = vmatpush3.bf16.msra.mxu0 %v9240_v17  ;;  %v11143_v17 = vld [vmem:[%s10662_s16 + $0xb2] sm:$0xff]  ;;  %v11146_v14 = vld [vmem:[%s10662_s16 + $0xc2] sm:$0xff] }
  0xef   : > { %9245 = vmatprep.subr.bf16.mxu0 %v9244_v13  ;;  %12526 = vst [vmem:[#allocation27_spill] sm:$0xff] %v11146_v14 }
  0xf1   : > { %7815 = vmatmul.mubr.f32.gmra.mrb[12].mxu0 %v11129_v21  ;;  %v11154_v21 = vld [vmem:[%s10662_s16 + $0xda] sm:$0xff] }
  0xf2   : > { %7817 = vmatprep.mubr.f32.mxu0 %v11132_v12  ;;  %9247 = vmatpush3.bf16.msra.mxu0 %v9244_v13  ;;  %12528 = vst [vmem:[#allocation29_spill] sm:$0xff] %v11154_v21  ;;  %v11159_v13 = vld [vmem:[%s10662_s16 + $0xe2] sm:$0xff] }
  0xf3   : > { %9249 = vmatprep.subr.bf16.mxu0 %v9248_v18  ;;  %12529 = vst [vmem:[#allocation30_spill] sm:$0xff] %v11159_v13 }
  0xf5   : > { %7818 = vmatmul.mubr.f32.gmra.mrb[14].mxu0 %v11143_v17 }
  0xf6   : > { %7820 = vmatprep.mubr.f32.mxu0 %v11146_v14  ;;  %9251 = vmatpush3.bf16.msra.mxu0 %v9248_v18  ;;  %v11167_v18 = vld [vmem:[%s10662_s16 + $0xfa] sm:$0xff] }
  0xf7   : > { %9253 = vmatprep.subr.bf16.mxu0 %v9252_v20  ;;  %12531 = vst [vmem:[#allocation32_spill] sm:$0xff] %v11167_v18  ;;  %v11199_v14 = vld [vmem:[%s10662_s16 + $0x15a] sm:$0xff] }
  0xf8   : > { %12539 = vst [vmem:[#allocation40_spill] sm:$0xff] %v11199_v14 }
  0xf9   : > { %7821 = vmatmul.mubr.f32.gmra.mrb[16].mxu0 %v11151_v22  ;;  %v11178_v22 = vld [vmem:[%s10662_s16 + $0x122] sm:$0xff] }
  0xfa   : > { %7823 = vmatprep.mubr.f32.mxu0 %v11154_v21  ;;  %v11175_v21 = vld [vmem:[%s10662_s16 + $0x112] sm:$0xff]  ;;  %12534 = vst [vmem:[#allocation35_spill] sm:$0xff] %v11178_v22 }
  0xfb   : > { %12533 = vst [vmem:[#allocation34_spill] sm:$0xff] %v11175_v21 }
  0xfd   : > { %7824 = vmatmul.mubr.f32.gmra.mrb[18].mxu0 %v11159_v13  ;;  %v11186_v13 = vld [vmem:[%s10662_s16 + $0x13a] sm:$0xff] }
  0xfe   : > { %7826 = vmatprep.mubr.f32.mxu0 %v11162_v26  ;;  %v11183_v26 = vld [vmem:[%s10662_s16 + $0x12a] sm:$0xff]  ;;  %12536 = vst [vmem:[#allocation37_spill] sm:$0xff] %v11186_v13 }
  0xff   : > { %12535 = vst [vmem:[#allocation36_spill] sm:$0xff] %v11183_v26 }
 0x101   : > { %7827 = vmatmul.mubr.f32.gmra.mrb[20].mxu0 %v11167_v18  ;;  %v11191_v18 = vld [vmem:[%s10662_s16 + $0x142] sm:$0xff] }
 0x102   : > { %7829 = vmatprep.mubr.f32.mxu0 %v11170_v15  ;;  %12537 = vst [vmem:[#allocation38_spill] sm:$0xff] %v11191_v18  ;;  %v11194_v15 = vld [vmem:[%s10662_s16 + $0x152] sm:$0xff] }
 0x103   : > { %12538 = vst [vmem:[#allocation39_spill] sm:$0xff] %v11194_v15 }
 0x105   : > { %7830 = vmatmul.mubr.f32.gmra.mrb[22].mxu0 %v11175_v21  ;;  %v11202_v21 = vld [vmem:[%s10662_s16 + $0x16a] sm:$0xff] }
 0x106   : > { %7832 = vmatprep.mubr.f32.mxu0 %v11178_v22  ;;  %12540 = vst [vmem:[#allocation41_spill] sm:$0xff] %v11202_v21  ;;  %v11207_v22 = vld [vmem:[%s10662_s16 + $0x172] sm:$0xff] }
 0x109   : > { %7833 = vmatmul.mubr.f32.gmra.mrb[24].mxu0 %v11183_v26 }
 0x10a   : > { %7835 = vmatprep.mubr.f32.mxu0 %v11186_v13  ;;  %v6445_v13 = vld [vmem:[%s12442_s1 + $0x210] sm:$0xff] }
 0x10d   : > { %7836 = vmatmul.mubr.f32.gmra.mrb[26].mxu0 %v11191_v18  ;;  %v6446_v18 = vld [vmem:[%s12442_s1 + $0x218] sm:$0xff] }
 0x10e   : > { %7838 = vmatprep.mubr.f32.mxu0 %v11194_v15  ;;  %v9256_v15 = vpack.c.bf16 %v6446_v18, %v6445_v13  ;;  %v6450_v13 = vld [vmem:[%s12442_s1 + $0x238] sm:$0xff]  ;;  %v6453_v18 = vld [vmem:[%s12442_s1 + $0x250] sm:$0xff] }
 0x111   : > { %7839 = vmatmul.mubr.f32.gmra.mrb[28].mxu0 %v11199_v14  ;;  %v6447_v14 = vld [vmem:[%s12442_s1 + $0x220] sm:$0xff] }
 0x112   : > { %7841 = vmatprep.mubr.f32.mxu0 %v11202_v21  ;;  %v6448_v21 = vld [vmem:[%s12442_s1 + $0x228] sm:$0xff] }
 0x113   : > { %v9260_v26 = vpack.c.bf16 %v6448_v21, %v6447_v14  ;;  %v6452_v21 = vld [vmem:[%s12442_s1 + $0x248] sm:$0xff] }
 0x115   : > { %7842 = vmatmul.mubr.f32.gmra.mrb[30].mxu0 %v11207_v22 }
 0x116   : > { %7876 = vmatprep.mubr.f32.mxu0 %v10879_v23  ;;  %v6449_v23 = vld [vmem:[%s12442_s1 + $0x230] sm:$0xff] }
 0x119   : > { %7877 = vmatmul.mubr.f32.vlgmr.msra.gmra.mrb[0].mxu0 %v10889_v27  ;;  %v9264_v27 = vpack.c.bf16 %v6450_v13, %v6449_v23  ;;  %v6456_v13 = vld [vmem:[%s12442_s1 + $0x268] sm:$0xff] }
 0x11a   : > { %9255 = vmatpush3.bf16.msra.mxu0 %v9252_v20  ;;  %7879 = vmatprep.mubr.f32.mxu0 %v10892_v28  ;;  %v6451_v20 = vld [vmem:[%s12442_s1 + $0x240] sm:$0xff] }
 0x11b   : > { %9257 = vmatprep.subr.bf16.mxu0 %v9256_v15  ;;  %v9268_v14 = vpack.c.bf16 %v6452_v21, %v6451_v20  ;;  %v6458_v21 = vld [vmem:[%s12442_s1 + $0x278] sm:$0xff] }
 0x11d   : > { %7880 = vmatmul.mubr.f32.gmra.mrb[2].mxu0 %v10903_v33 }
 0x11e   : > { %7882 = vmatprep.mubr.f32.mxu0 %v10906_v34  ;;  %9259 = vmatpush3.bf16.msra.mxu0 %v9256_v15  ;;  %v6454_v15 = vld [vmem:[%s12442_s1 + $0x258] sm:$0xff] }
 0x11f   : > { %9261 = vmatprep.subr.bf16.mxu0 %v9260_v26  ;;  %v9272_v23 = vpack.c.bf16 %v6454_v15, %v6453_v18  ;;  %v6492_v15 = vld [vmem:[%s12442_s1 + $0x288] sm:$0xff] }
 0x121   : > { %7883 = vmatmul.mubr.f32.gmra.mrb[4].mxu0 %v10917_v42 }
 0x122   : > { %7885 = vmatprep.mubr.f32.mxu0 %v10920_v43  ;;  %9263 = vmatpush3.bf16.msra.mxu0 %v9260_v26  ;;  %v6455_v26 = vld [vmem:[%s12442_s1 + $0x260] sm:$0xff] }
 0x123   : > { %9265 = vmatprep.subr.bf16.mxu0 %v9264_v27  ;;  %v9276_v20 = vpack.c.bf16 %v6456_v13, %v6455_v26  ;;  %v11293_v13 = vld [vmem:[%s10662_s16 + $0x188] sm:$0xff] }
 0x125   : > { %7886 = vmatmul.mubr.f32.gmra.mrb[6].mxu0 %v10931_v49 }
 0x126   : > { %7888 = vmatprep.mubr.f32.mxu0 %v10934_v52  ;;  %9267 = vmatpush3.bf16.msra.mxu0 %v9264_v27  ;;  %v6457_v27 = vld [vmem:[%s12442_s1 + $0x270] sm:$0xff] }
 0x127   : > { %9269 = vmatprep.subr.bf16.mxu0 %v9268_v14  ;;  %v9280_v18 = vpack.c.bf16 %v6458_v21, %v6457_v27  ;;  %v6494_v27 = vld [vmem:[%s12442_s1 + $0x298] sm:$0xff] }
 0x129   : > { %7889 = vmatmul.mubr.f32.gmra.mrb[8].mxu0 %v10945_v58 }
 0x12a   : > { %7891 = vmatprep.mubr.f32.mxu0 %v10948_v59  ;;  %9271 = vmatpush3.bf16.msra.mxu0 %v9268_v14  ;;  %v6491_v14 = vld [vmem:[%s12442_s1 + $0x280] sm:$0xff] }
 0x12b   : > { %9273 = vmatprep.subr.bf16.mxu0 %v9272_v23  ;;  %v9284_v26 = vpack.c.bf16 %v6492_v15, %v6491_v14  ;;  %v6496_v14 = vld [vmem:[%s12442_s1 + $0x2a8] sm:$0xff] }
 0x12d   : > { %7892 = vmatmul.mubr.f32.gmra.mrb[10].mxu0 %v10959_v3 }
 0x12e   : > { %7894 = vmatprep.mubr.f32.mxu0 %v10962_v19  ;;  %9275 = vmatpush3.bf16.msra.mxu0 %v9272_v23  ;;  %v11288_v23 = vld [vmem:[%s10662_s16 + $0x180] sm:$0xff] }
 0x12f   : > { %9277 = vmatprep.subr.bf16.mxu0 %v9276_v20 }
 0x131   : > { %7895 = vmatmul.mubr.f32.gmra.mrb[12].mxu0 %v10973_v24 }
 0x132   : > { %7897 = vmatprep.mubr.f32.mxu0 %v10976_v25  ;;  %9279 = vmatpush3.bf16.msra.mxu0 %v9276_v20  ;;  %v6493_v20 = vld [vmem:[%s12442_s1 + $0x290] sm:$0xff] }
 0x133   : > { %9281 = vmatprep.subr.bf16.mxu0 %v9280_v18  ;;  %v9288_v21 = vpack.c.bf16 %v6494_v27, %v6493_v20  ;;  %v6498_v20 = vld [vmem:[%s12442_s1 + $0x2b8] sm:$0xff] }
 0x134   : > { %v6502_v27 = vld [vmem:[%s12442_s1 + $0x2d8] sm:$0xff] }
 0x135   : > { %7898 = vmatmul.mubr.f32.gmra.mrb[14].mxu0 %v10981_v29 }
 0x136   : > { %7900 = vmatprep.mubr.f32.mxu0 %v10984_v30  ;;  %9283 = vmatpush3.bf16.msra.mxu0 %v9280_v18  ;;  %v6495_v18 = vld [vmem:[%s12442_s1 + $0x2a0] sm:$0xff] }
 0x137   : > { %9285 = vmatprep.subr.bf16.mxu0 %v9284_v26  ;;  %v9292_v15 = vpack.c.bf16 %v6496_v14, %v6495_v18  ;;  %v6506_v18 = vld [vmem:[%s12442_s1 + $0x2f8] sm:$0xff]  ;;  %v6540_v14 = vld [vmem:[%s12442_s1 + $0x308] sm:$0xff] }
 0x139   : > { %7901 = vmatmul.mubr.f32.gmra.mrb[16].mxu0 %v10989_v32 }
 0x13a   : > { %7903 = vmatprep.mubr.f32.mxu0 %v10992_v37 }
 0x13d   : > { %7904 = vmatmul.mubr.f32.gmra.mrb[18].mxu0 %v10997_v38 }
 0x13e   : > { %7906 = vmatprep.mubr.f32.mxu0 %v11000_v39 }
 0x141   : > { %7907 = vmatmul.mubr.f32.gmra.mrb[20].mxu0 %v11005_v44 }
 0x142   : > { %7909 = vmatprep.mubr.f32.mxu0 %v11008_v47 }
 0x145   : > { %7910 = vmatmul.mubr.f32.gmra.mrb[22].mxu0 %v11013_v48 }
 0x146   : > { %7912 = vmatprep.mubr.f32.mxu0 %v11016_v53 }
 0x149   : > { %7913 = vmatmul.mubr.f32.gmra.mrb[24].mxu0 %v11021_v54 }
 0x14a   : > { %7915 = vmatprep.mubr.f32.mxu0 %v11024_v57 }
 0x14d   : > { %7916 = vmatmul.mubr.f32.gmra.mrb[26].mxu0 %v11029_v62 }
 0x14e   : > { %7918 = vmatprep.mubr.f32.mxu0 %v11032_v63 }
 0x151   : > { %7919 = vmatmul.mubr.f32.gmra.mrb[28].mxu0 %v11037_v0 }
 0x152   : > { %7921 = vmatprep.mubr.f32.mxu0 %v11288_v23 }
 0x155   : > { %7922 = vmatmul.mubr.f32.gmra.mrb[30].mxu0 %v11293_v13 }
 0x156   : > { %7956 = vmatprep.mubr.f32.mxu0 %v10709_v31  ;;  %v6497_v31 = vld [vmem:[%s12442_s1 + $0x2b0] sm:$0xff] }
 0x159   : > { %7957 = vmatmul.mubr.f32.vlgmr.msra.gmra.mrb[0].mxu0 %v10719_v35  ;;  %v9296_v35 = vpack.c.bf16 %v6498_v20, %v6497_v31  ;;  %v6543_v20 = vld [vmem:[%s12442_s1 + $0x320] sm:$0xff] }
 0x15a   : > { %9287 = vmatpush3.bf16.msra.mxu0 %v9284_v26  ;;  %7959 = vmatprep.mubr.f32.mxu0 %v10722_v36  ;;  %v6499_v36 = vld [vmem:[%s12442_s1 + $0x2c0] sm:$0xff]  ;;  %v6500_v26 = vld [vmem:[%s12442_s1 + $0x2c8] sm:$0xff] }
 0x15b   : > { %9289 = vmatprep.subr.bf16.mxu0 %v9288_v21 }
 0x15d   : > { %7960 = vmatmul.mubr.f32.gmra.mrb[2].mxu0 %v10733_v40  ;;  %v9300_v40 = vpack.c.bf16 %v6500_v26, %v6499_v36  ;;  %v12549_v36 = vld [vmem:[#allocation17_spill] sm:$0xff]  ;;  %v12550_v26 = vld [vmem:[#allocation18_spill] sm:$0xff] }
 0x15e   : > { %7962 = vmatprep.mubr.f32.mxu0 %v10736_v41  ;;  %9291 = vmatpush3.bf16.msra.mxu0 %v9288_v21  ;;  %v6501_v41 = vld [vmem:[%s12442_s1 + $0x2d0] sm:$0xff]  ;;  %v6504_v21 = vld [vmem:[%s12442_s1 + $0x2e8] sm:$0xff] }
 0x15f   : > { %9293 = vmatprep.subr.bf16.mxu0 %v9292_v15 }
 0x161   : > { %7963 = vmatmul.mubr.f32.gmra.mrb[4].mxu0 %v10747_v45  ;;  %v9304_v45 = vpack.c.bf16 %v6502_v27, %v6501_v41  ;;  %v6545_v41 = vld [vmem:[%s12442_s1 + $0x330] sm:$0xff]  ;;  %v6546_v27 = vld [vmem:[%s12442_s1 + $0x338] sm:$0xff] }
 0x162   : > { %7965 = vmatprep.mubr.f32.mxu0 %v10750_v46  ;;  %9295 = vmatpush3.bf16.msra.mxu0 %v9292_v15  ;;  %v6503_v46 = vld [vmem:[%s12442_s1 + $0x2e0] sm:$0xff]  ;;  %v12548_v15 = vld [vmem:[#allocation16_spill] sm:$0xff] }
 0x163   : > { %9297 = vmatprep.subr.bf16.mxu0 %v9296_v35 }
 0x165   : > { %7966 = vmatmul.mubr.f32.gmra.mrb[6].mxu0 %v10761_v50  ;;  %v9308_v50 = vpack.c.bf16 %v6504_v21, %v6503_v46  ;;  %v12552_v46 = vld [vmem:[#allocation20_spill] sm:$0xff]  ;;  %v9328_v21 = vpack.c.bf16 %v6546_v27, %v6545_v41  ;;  %v12563_v41 = vld [vmem:[#allocation31_spill] sm:$0xff] }
 0x166   : > { %7968 = vmatprep.mubr.f32.mxu0 %v10764_v51  ;;  %9299 = vmatpush3.bf16.msra.mxu0 %v9296_v35  ;;  %v6505_v51 = vld [vmem:[%s12442_s1 + $0x2f0] sm:$0xff]  ;;  %v6544_v35 = vld [vmem:[%s12442_s1 + $0x328] sm:$0xff] }
 0x167   : > { %9301 = vmatprep.subr.bf16.mxu0 %v9300_v40  ;;  %v12564_v27 = vld [vmem:[#allocation32_spill] sm:$0xff] }
 0x169   : > { %7969 = vmatmul.mubr.f32.gmra.mrb[8].mxu0 %v10775_v55  ;;  %v9312_v55 = vpack.c.bf16 %v6506_v18, %v6505_v51  ;;  %v6548_v51 = vld [vmem:[%s12442_s1 + $0x348] sm:$0xff]  ;;  %v12553_v18 = vld [vmem:[#allocation21_spill] sm:$0xff] }
 0x16a   : > { %7971 = vmatprep.mubr.f32.mxu0 %v10778_v56  ;;  %9303 = vmatpush3.bf16.msra.mxu0 %v9300_v40  ;;  %v6539_v56 = vld [vmem:[%s12442_s1 + $0x300] sm:$0xff]  ;;  %v9324_v40 = vpack.c.bf16 %v6544_v35, %v6543_v20  ;;  %v6588_v20 = vld [vmem:[%s12442_s1 + $0x388] sm:$0xff] }
 0x16b   : > { %9305 = vmatprep.subr.bf16.mxu0 %v9304_v45  ;;  %v12559_v35 = vld [vmem:[#allocation27_spill] sm:$0xff] }
 0x16d   : > { %7972 = vmatmul.mubr.f32.gmra.mrb[10].mxu0 %v10789_v60  ;;  %v9316_v60 = vpack.c.bf16 %v6540_v14, %v6539_v56  ;;  %v6549_v14 = vld [vmem:[%s12442_s1 + $0x350] sm:$0xff] }
 0x16e   : > { %7974 = vmatprep.mubr.f32.mxu0 %v10792_v61  ;;  %9307 = vmatpush3.bf16.msra.mxu0 %v9304_v45  ;;  %v12541_v61 = vld [vmem:[#allocation9_spill] sm:$0xff]  ;;  %v12551_v45 = vld [vmem:[#allocation19_spill] sm:$0xff] }
 0x16f   : > { %9309 = vmatprep.subr.bf16.mxu0 %v9308_v50 }
 0x171   : > { %7975 = vmatmul.mubr.f32.gmra.mrb[12].mxu0 %v10803_v1  ;;  %v12542_v1 = vld [vmem:[#allocation10_spill] sm:$0xff] }
 0x172   : > { %7977 = vmatprep.mubr.f32.mxu0 %v10806_v2  ;;  %9311 = vmatpush3.bf16.msra.mxu0 %v9308_v50  ;;  %v12543_v2 = vld [vmem:[#allocation11_spill] sm:$0xff] }
 0x173   : > { %9313 = vmatprep.subr.bf16.mxu0 %v9312_v55  ;;  %v6547_v50 = vld [vmem:[%s12442_s1 + $0x340] sm:$0xff] }
 0x174   : > { %v9332_v56 = vpack.c.bf16 %v6548_v51, %v6547_v50  ;;  %v12569_v50 = vld [vmem:[#allocation37_spill] sm:$0xff]  ;;  %v12570_v51 = vld [vmem:[#allocation38_spill] sm:$0xff] }
 0x175   : > { %7978 = vmatmul.mubr.f32.gmra.mrb[14].mxu0 %v10811_v4  ;;  %v12544_v4 = vld [vmem:[#allocation12_spill] sm:$0xff] }
 0x176   : > { %7980 = vmatprep.mubr.f32.mxu0 %v10814_v5  ;;  %9315 = vmatpush3.bf16.msra.mxu0 %v9312_v55  ;;  %v12545_v5 = vld [vmem:[#allocation13_spill] sm:$0xff]  ;;  %v12554_v55 = vld [vmem:[#allocation22_spill] sm:$0xff] }
 0x177   : > { %9317 = vmatprep.subr.bf16.mxu0 %v9316_v60 }
 0x179   : > { %7981 = vmatmul.mubr.f32.gmra.mrb[16].mxu0 %v10819_v6  ;;  %v12546_v6 = vld [vmem:[#allocation14_spill] sm:$0xff] }
 0x17a   : > { %7983 = vmatprep.mubr.f32.mxu0 %v10822_v7  ;;  %v11374_v7 = vld [vmem:[%s10662_s16 + $0x181] sm:$0xff] }
 0x17d   : > { %7984 = vmatmul.mubr.f32.gmra.mrb[18].mxu0 %v10827_v8  ;;  %v12547_v8 = vld [vmem:[#allocation15_spill] sm:$0xff] }
 0x17e   : > { %7986 = vmatprep.mubr.f32.mxu0 %v10830_v9  ;;  %v11379_v9 = vld [vmem:[%s10662_s16 + $0x189] sm:$0xff] }
 0x181   : > { %7987 = vmatmul.mubr.f32.gmra.mrb[20].mxu0 %v10835_v10  ;;  %v6541_v10 = vld [vmem:[%s12442_s1 + $0x310] sm:$0xff] }
 0x182   : > { %7989 = vmatprep.mubr.f32.mxu0 %v10838_v11  ;;  %v6542_v11 = vld [vmem:[%s12442_s1 + $0x318] sm:$0xff] }
 0x183   : > { %v9320_v31 = vpack.c.bf16 %v6542_v11, %v6541_v10  ;;  %v6553_v10 = vld [vmem:[%s12442_s1 + $0x370] sm:$0xff]  ;;  %v6554_v11 = vld [vmem:[%s12442_s1 + $0x378] sm:$0xff] }
 0x185   : > { %7990 = vmatmul.mubr.f32.gmra.mrb[22].mxu0 %v12541_v61  ;;  %v12555_v61 = vld [vmem:[#allocation23_spill] sm:$0xff] }
 0x186   : > { %7992 = vmatprep.mubr.f32.mxu0 %v12542_v1  ;;  %v12556_v1 = vld [vmem:[#allocation24_spill] sm:$0xff] }
 0x189   : > { %7993 = vmatmul.mubr.f32.gmra.mrb[24].mxu0 %v12543_v2 }
 0x18a   : > { %7995 = vmatprep.mubr.f32.mxu0 %v12544_v4  ;;  %v6551_v4 = vld [vmem:[%s12442_s1 + $0x360] sm:$0xff] }
 0x18d   : > { %7996 = vmatmul.mubr.f32.gmra.mrb[26].mxu0 %v12545_v5  ;;  %v6552_v5 = vld [vmem:[%s12442_s1 + $0x368] sm:$0xff] }
 0x18e   : > { %7998 = vmatprep.mubr.f32.mxu0 %v12546_v6  ;;  %v12557_v6 = vld [vmem:[#allocation25_spill] sm:$0xff] }
 0x191   : > { %7999 = vmatmul.mubr.f32.gmra.mrb[28].mxu0 %v12547_v8  ;;  %v9340_v8 = vpack.c.bf16 %v6552_v5, %v6551_v4  ;;  %v6592_v4 = vld [vmem:[%s12442_s1 + $0x3a8] sm:$0xff] }
 0x192   : > { %8001 = vmatprep.mubr.f32.mxu0 %v11374_v7 }
 0x195   : > { %8002 = vmatmul.mubr.f32.gmra.mrb[30].mxu0 %v11379_v9 }
 0x196   : > { %8036 = vmatprep.mubr.f32.mxu0 %v12548_v15  ;;  %v12558_v15 = vld [vmem:[#allocation26_spill] sm:$0xff] }
 0x199   : > { %8037 = vmatmul.mubr.f32.vlgmr.msra.gmra.mrb[0].mxu0 %v12549_v36 }
 0x19a   : > { %9319 = vmatpush3.bf16.msra.mxu0 %v9316_v60  ;;  %8039 = vmatprep.mubr.f32.mxu0 %v12550_v26  ;;  %v6550_v60 = vld [vmem:[%s12442_s1 + $0x358] sm:$0xff]  ;;  %v12560_v26 = vld [vmem:[#allocation28_spill] sm:$0xff] }
 0x19b   : > { %9321 = vmatprep.subr.bf16.mxu0 %v9320_v31  ;;  %v9336_v2 = vpack.c.bf16 %v6550_v60, %v6549_v14  ;;  %v11460_v14 = vld [vmem:[%s10662_s16 + $0x182] sm:$0xff]  ;;  %v11465_v60 = vld [vmem:[%s10662_s16 + $0x18a] sm:$0xff] }
 0x19d   : > { %8040 = vmatmul.mubr.f32.gmra.mrb[2].mxu0 %v12551_v45  ;;  %v12566_v45 = vld [vmem:[#allocation34_spill] sm:$0xff] }
 0x19e   : > { %8042 = vmatprep.mubr.f32.mxu0 %v12552_v46  ;;  %9323 = vmatpush3.bf16.msra.mxu0 %v9320_v31  ;;  %v6587_v31 = vld [vmem:[%s12442_s1 + $0x380] sm:$0xff] }
 0x19f   : > { %9325 = vmatprep.subr.bf16.mxu0 %v9324_v40  ;;  %v9348_v36 = vpack.c.bf16 %v6588_v20, %v6587_v31  ;;  %v12567_v46 = vld [vmem:[#allocation35_spill] sm:$0xff]  ;;  %v3216_v31 = vld [vmem:[#allocation3 + $0xa8] sm:$0xff] }
 0x1a0   : > { %v6559_v20 = vld [vmem:[%s10662_s16 + $0x61] sm:$0xff] }
 0x1a1   : > { %8043 = vmatmul.mubr.f32.gmra.mrb[4].mxu0 %v12553_v18  ;;  %v12571_v18 = vld [vmem:[#allocation39_spill] sm:$0xff] }
 0x1a2   : > { %8045 = vmatprep.mubr.f32.mxu0 %v12554_v55  ;;  %9327 = vmatpush3.bf16.msra.mxu0 %v9324_v40  ;;  %v12562_v40 = vld [vmem:[#allocation30_spill] sm:$0xff]  ;;  %v12572_v55 = vld [vmem:[#allocation40_spill] sm:$0xff] }
 0x1a3   : > { %9329 = vmatprep.subr.bf16.mxu0 %v9328_v21 }
 0x1a5   : > { %8046 = vmatmul.mubr.f32.gmra.mrb[6].mxu0 %v12555_v61  ;;  %v6589_v61 = vld [vmem:[%s12442_s1 + $0x390] sm:$0xff] }
 0x1a6   : > { %8048 = vmatprep.mubr.f32.mxu0 %v12556_v1  ;;  %9331 = vmatpush3.bf16.msra.mxu0 %v9328_v21  ;;  %v12568_v21 = vld [vmem:[#allocation36_spill] sm:$0xff]  ;;  %v6590_v1 = vld [vmem:[%s12442_s1 + $0x398] sm:$0xff] }
 0x1a7   : > { %9333 = vmatprep.subr.bf16.mxu0 %v9332_v56 }
 0x1a9   : > { %8049 = vmatmul.mubr.f32.gmra.mrb[8].mxu0 %v11115_v16  ;;  %v9344_v16 = vpack.c.bf16 %v6554_v11, %v6553_v10  ;;  %v6598_v10 = vld [vmem:[%s12442_s1 + $0x3d8] sm:$0xff]  ;;  %v6600_v11 = vld [vmem:[%s12442_s1 + $0x3e8] sm:$0xff] }
 0x1aa   : > { %8051 = vmatprep.mubr.f32.mxu0 %v12557_v6  ;;  %9335 = vmatpush3.bf16.msra.mxu0 %v9332_v56  ;;  %v12573_v56 = vld [vmem:[#allocation41_spill] sm:$0xff]  ;;  %v6594_v6 = vld [vmem:[%s12442_s1 + $0x3b8] sm:$0xff] }
 0x1ab   : > { %9337 = vmatprep.subr.bf16.mxu0 %v9336_v2 }
 0x1ad   : > { %8052 = vmatmul.mubr.f32.gmra.mrb[10].mxu0 %v12558_v15  ;;  %v6602_v15 = vld [vmem:[%s12442_s1 + $0x3f8] sm:$0xff] }
 0x1ae   : > { %8054 = vmatprep.mubr.f32.mxu0 %v11132_v12  ;;  %9339 = vmatpush3.bf16.msra.mxu0 %v9336_v2  ;;  %v12561_v12 = vld [vmem:[#allocation29_spill] sm:$0xff]  ;;  %v9352_v2 = vpack.c.bf16 %v6590_v1, %v6589_v61 }
 0x1af   : > { %9341 = vmatprep.subr.bf16.mxu0 %v9340_v8  ;;  %v6645_v1 = vld [vmem:[%s12442_s1 + $0x450] sm:$0xff] }
 0x1b1   : > { %8055 = vmatmul.mubr.f32.gmra.mrb[12].mxu0 %v11143_v17  ;;  %v12565_v17 = vld [vmem:[#allocation33_spill] sm:$0xff] }
 0x1b2   : > { %8057 = vmatprep.mubr.f32.mxu0 %v12559_v35  ;;  %9343 = vmatpush3.bf16.msra.mxu0 %v9340_v8  ;;  %v6596_v8 = vld [vmem:[%s12442_s1 + $0x3c8] sm:$0xff] }
 0x1b3   : > { %9345 = vmatprep.subr.bf16.mxu0 %v9344_v16 }
 0x1b5   : > { %8058 = vmatmul.mubr.f32.gmra.mrb[14].mxu0 %v12560_v26  ;;  %v6642_v26 = vld [vmem:[%s12442_s1 + $0x438] sm:$0xff] }
 0x1b6   : > { %8060 = vmatprep.mubr.f32.mxu0 %v12561_v12  ;;  %9347 = vmatpush3.bf16.msra.mxu0 %v9344_v16  ;;  %v6636_v16 = vld [vmem:[%s12442_s1 + $0x408] sm:$0xff] }
 0x1b7   : > { %9349 = vmatprep.subr.bf16.mxu0 %v9348_v36 }
 0x1b9   : > { %8061 = vmatmul.mubr.f32.gmra.mrb[16].mxu0 %v12562_v40  ;;  %v6560_v40 = vld [vmem:[%s10662_s16 + $0x69] sm:$0xff] }
 0x1ba   : > { %8063 = vmatprep.mubr.f32.mxu0 %v12563_v41  ;;  %v3217_v41 = vld [vmem:[#allocation3 + $0xb0] sm:$0xff] }
 0x1bd   : > { %8064 = vmatmul.mubr.f32.gmra.mrb[18].mxu0 %v12564_v27  ;;  %v3218_v27 = vld [vmem:[#allocation3 + $0xb8] sm:$0xff] }
 0x1be   : > { %8066 = vmatprep.mubr.f32.mxu0 %v12565_v17  ;;  %v6561_v17 = vld [vmem:[%s10662_s16 + $0x79] sm:$0xff] }
 0x1c1   : > { %8067 = vmatmul.mubr.f32.gmra.mrb[20].mxu0 %v12566_v45 }
 0x1c2   : > { %8069 = vmatprep.mubr.f32.mxu0 %v12567_v46  ;;  %v6643_v46 = vld [vmem:[%s12442_s1 + $0x440] sm:$0xff] }
 0x1c5   : > { %8070 = vmatmul.mubr.f32.gmra.mrb[22].mxu0 %v12568_v21  ;;  %v6644_v21 = vld [vmem:[%s12442_s1 + $0x448] sm:$0xff] }
 0x1c6   : > { %8072 = vmatprep.mubr.f32.mxu0 %v12569_v50  ;;  %v11590_v50 = vpack.c.bf16 %v3218_v27, %v3217_v41  ;;  %v9396_v61 = vpack.c.bf16 %v6644_v21, %v6643_v46  ;;  %v6619_v41 = vld [vmem:[%s10662_s16 + $0xf2] sm:$0xff]  ;;  %v6620_v27 = vld [vmem:[%s10662_s16 + $0xfa] sm:$0xff]  ;;  %v6623_v46 = vld [vmem:[%s10662_s16 + $0x122] sm:$0xff] }
 0x1c7   : > { %v6624_v21 = vld [vmem:[%s10662_s16 + $0x12a] sm:$0xff] }
 0x1c9   : > { %8073 = vmatmul.mubr.f32.gmra.mrb[24].mxu0 %v12570_v51  ;;  %v6562_v51 = vld [vmem:[%s10662_s16 + $0x81] sm:$0xff] }
 0x1ca   : > { %8075 = vmatprep.mubr.f32.mxu0 %v12571_v18  ;;  %v3219_v18 = vld [vmem:[#allocation3 + $0xc0] sm:$0xff] }
 0x1cd   : > { %8076 = vmatmul.mubr.f32.gmra.mrb[26].mxu0 %v12572_v55  ;;  %v3220_v55 = vld [vmem:[#allocation3 + $0xc8] sm:$0xff] }
 0x1ce   : > { %8078 = vmatprep.mubr.f32.mxu0 %v12573_v56  ;;  %v6563_v56 = vld [vmem:[%s10662_s16 + $0x91] sm:$0xff] }
 0x1d1   : > { %8079 = vmatmul.mubr.f32.gmra.mrb[28].mxu0 %v11207_v22  ;;  %v6591_v22 = vld [vmem:[%s12442_s1 + $0x3a0] sm:$0xff] }
 0x1d2   : > { %8081 = vmatprep.mubr.f32.mxu0 %v11460_v14  ;;  %v9356_v5 = vpack.c.bf16 %v6592_v4, %v6591_v22  ;;  %v11602_v22 = vpack.c.bf16 %v3220_v55, %v3219_v18  ;;  %v6564_v4 = vld [vmem:[%s10662_s16 + $0x99] sm:$0xff] }
 0x1d3   : > { %v6627_v18 = vld [vmem:[%s10662_s16 + $0x152] sm:$0xff]  ;;  %v6628_v55 = vld [vmem:[%s10662_s16 + $0x15a] sm:$0xff] }
 0x1d5   : > { %8082 = vmatmul.mubr.f32.gmra.mrb[30].mxu0 %v11465_v60 }
 0x1d6   : > { %8116 = vmatprep.mubr.f32.mxu0 %v10892_v28  ;;  %v6593_v28 = vld [vmem:[%s12442_s1 + $0x3b0] sm:$0xff] }
 0x1d9   : > { %8117 = vmatmul.mubr.f32.vlgmr.msra.gmra.mrb[0].mxu0 %v10903_v33  ;;  %v9360_v33 = vpack.c.bf16 %v6594_v6, %v6593_v28  ;;  %v3222_v28 = vld [vmem:[#allocation3 + $0xd8] sm:$0xff] }
 0x1da   : > { %9351 = vmatpush3.bf16.msra.mxu0 %v9348_v36  ;;  %8119 = vmatprep.mubr.f32.mxu0 %v10906_v34  ;;  %v6595_v34 = vld [vmem:[%s12442_s1 + $0x3c0] sm:$0xff]  ;;  %v6641_v36 = vld [vmem:[%s12442_s1 + $0x430] sm:$0xff] }
 0x1db   : > { %9353 = vmatprep.subr.bf16.mxu0 %v9352_v2  ;;  %v9392_v45 = vpack.c.bf16 %v6642_v26, %v6641_v36  ;;  %v6565_v6 = vld [vmem:[%s10662_s16 + $0xa9] sm:$0xff] }
 0x1dc   : > { %v6615_v36 = vld [vmem:[%s10662_s16 + $0xc2] sm:$0xff]  ;;  %v6616_v26 = vld [vmem:[%s10662_s16 + $0xca] sm:$0xff] }
 0x1dd   : > { %8120 = vmatmul.mubr.f32.gmra.mrb[2].mxu0 %v10917_v42  ;;  %v9364_v42 = vpack.c.bf16 %v6596_v8, %v6595_v34  ;;  %v6647_v34 = vld [vmem:[%s12442_s1 + $0x460] sm:$0xff]  ;;  %v6648_v8 = vld [vmem:[%s12442_s1 + $0x468] sm:$0xff] }
 0x1de   : > { %8122 = vmatprep.mubr.f32.mxu0 %v10920_v43  ;;  %9355 = vmatpush3.bf16.msra.mxu0 %v9352_v2  ;;  %v6597_v43 = vld [vmem:[%s12442_s1 + $0x3d0] sm:$0xff]  ;;  %v6646_v2 = vld [vmem:[%s12442_s1 + $0x458] sm:$0xff] }
 0x1df   : > { %9357 = vmatprep.subr.bf16.mxu0 %v9356_v5 }
 0x1e1   : > { %8123 = vmatmul.mubr.f32.gmra.mrb[4].mxu0 %v10931_v49  ;;  %v9368_v49 = vpack.c.bf16 %v6598_v10, %v6597_v43  ;;  %v6566_v43 = vld [vmem:[%s10662_s16 + $0xb1] sm:$0xff]  ;;  %v6567_v10 = vld [vmem:[%s10662_s16 + $0xc1] sm:$0xff] }
 0x1e2   : > { %8125 = vmatprep.mubr.f32.mxu0 %v10934_v52  ;;  %9359 = vmatpush3.bf16.msra.mxu0 %v9356_v5  ;;  %v6599_v52 = vld [vmem:[%s12442_s1 + $0x3e0] sm:$0xff] }
 0x1e3   : > { %9361 = vmatprep.subr.bf16.mxu0 %v9360_v33  ;;  %v3221_v5 = vld [vmem:[#allocation3 + $0xd0] sm:$0xff] }
 0x1e5   : > { %8126 = vmatmul.mubr.f32.gmra.mrb[6].mxu0 %v10945_v58  ;;  %v9372_v58 = vpack.c.bf16 %v6600_v11, %v6599_v52  ;;  %v6649_v52 = vld [vmem:[%s12442_s1 + $0x470] sm:$0xff]  ;;  %v6650_v11 = vld [vmem:[%s12442_s1 + $0x478] sm:$0xff] }
 0x1e6   : > { %8128 = vmatprep.mubr.f32.mxu0 %v10948_v59  ;;  %9363 = vmatpush3.bf16.msra.mxu0 %v9360_v33  ;;  %v6601_v59 = vld [vmem:[%s12442_s1 + $0x3f0] sm:$0xff]  ;;  %v9400_v33 = vpack.c.bf16 %v6646_v2, %v6645_v1  ;;  %v6633_v1 = vld [vmem:[%s10662_s16 + $0x19a] sm:$0xff]  ;;  %v6634_v2 = vld [vmem:[%s10662_s16 + $0x1a2] sm:$0xff] }
 0x1e7   : > { %9365 = vmatprep.subr.bf16.mxu0 %v9364_v42 }
 0x1e9   : > { %8129 = vmatmul.mubr.f32.gmra.mrb[8].mxu0 %v10959_v3  ;;  %v9376_v3 = vpack.c.bf16 %v6602_v15, %v6601_v59  ;;  %v6569_v59 = vld [vmem:[%s10662_s16 + $0xd9] sm:$0xff]  ;;  %v9408_v15 = vpack.c.bf16 %v6650_v11, %v6649_v52 }
 0x1ea   : > { %8131 = vmatprep.mubr.f32.mxu0 %v10962_v19  ;;  %9367 = vmatpush3.bf16.msra.mxu0 %v9364_v42  ;;  %v6635_v19 = vld [vmem:[%s12442_s1 + $0x400] sm:$0xff]  ;;  %v11614_v42 = vpack.c.bf16 %v3222_v28, %v3221_v5  ;;  %v10512_v28 = vmov 0.0  }
 0x1eb   : > { %9369 = vmatprep.subr.bf16.mxu0 %v9368_v49  ;;  %3054 = vst [vmem:[#allocation2] sm:$0xff] %v10512_v28  ;;  %3055 = vst [vmem:[#allocation2 + $0x8] sm:$0xff] %v10512_v28 }
 0x1ec   : > { %3056 = vst [vmem:[#allocation2 + $0x10] sm:$0x3] %v10512_v28  ;;  %3058 = vst [vmem:[#allocation2 + $0x198] sm:$0xff] %v10512_v28 }
 0x1ed   : > { %8132 = vmatmul.mubr.f32.gmra.mrb[10].mxu0 %v10973_v24  ;;  %v9380_v24 = vpack.c.bf16 %v6636_v16, %v6635_v19  ;;  %v6571_v19 = vld [vmem:[%s10662_s16 + $0xf1] sm:$0xff]  ;;  %v6572_v16 = vld [vmem:[%s10662_s16 + $0xf9] sm:$0xff]  ;;  %3059 = vst [vmem:[#allocation2 + $0x1a0] sm:$0xff] %v10512_v28  ;;  %3060 = vst [vmem:[#allocation2 + $0x1a8] sm:$0x3] %v10512_v28 }
 0x1ee   : > { %8134 = vmatprep.mubr.f32.mxu0 %v10976_v25  ;;  %9371 = vmatpush3.bf16.msra.mxu0 %v9368_v49  ;;  %v6537_v25 = vld [vmem:[%s10662_s16 + $0x198] sm:$0xff]  ;;  %v9404_v49 = vpack.c.bf16 %v6648_v8, %v6647_v34  ;;  %3062 = vst [vmem:[#allocation2 + $0x18] sm:$0x1] %v10512_v28  ;;  %3063 = vst [vmem:[#allocation2 + $0x30] sm:$0x1] %v10512_v28  ;;  %v3162_v8 = vld [vmem:[#allocation3] sm:$0xff] }
 0x1ef   : > { %9373 = vmatprep.subr.bf16.mxu0 %v9372_v58  ;;  %3064 = vst [vmem:[#allocation2 + $0x48] sm:$0x1] %v10512_v28  ;;  %3065 = vst [vmem:[#allocation2 + $0x60] sm:$0x1] %v10512_v28 }
 0x1f0   : > { %3066 = vst [vmem:[#allocation2 + $0x78] sm:$0x1] %v10512_v28  ;;  %3067 = vst [vmem:[#allocation2 + $0x90] sm:$0x1] %v10512_v28 }
 0x1f1   : > { %8135 = vmatmul.mubr.f32.gmra.mrb[12].mxu0 %v10981_v29  ;;  %v6538_v29 = vld [vmem:[%s10662_s16 + $0x1a0] sm:$0xff]  ;;  %3068 = vst [vmem:[#allocation2 + $0xa8] sm:$0x1] %v10512_v28  ;;  %3069 = vst [vmem:[#allocation2 + $0xc0] sm:$0x1] %v10512_v28 }
 0x1f2   : > { %8137 = vmatprep.mubr.f32.mxu0 %v10984_v30  ;;  %9375 = vmatpush3.bf16.msra.mxu0 %v9372_v58  ;;  %v6555_v30 = vld [vmem:[%s10662_s16 + $0x31] sm:$0xff]  ;;  %v6568_v58 = vld [vmem:[%s10662_s16 + $0xc9] sm:$0xff]  ;;  %3070 = vst [vmem:[#allocation2 + $0xd8] sm:$0x1] %v10512_v28  ;;  %3071 = vst [vmem:[#allocation2 + $0xf0] sm:$0x1] %v10512_v28 }
 0x1f3   : > { %9377 = vmatprep.subr.bf16.mxu0 %v9376_v3  ;;  %3072 = vst [vmem:[#allocation2 + $0x108] sm:$0x1] %v10512_v28  ;;  %3073 = vst [vmem:[#allocation2 + $0x120] sm:$0x1] %v10512_v28  ;;  %v3179_v34 = vld [vmem:[#allocation2 + $0x9] sm:$0xff] }
 0x1f4   : > { %3074 = vst [vmem:[#allocation2 + $0x138] sm:$0x1] %v10512_v28  ;;  %3075 = vst [vmem:[#allocation2 + $0x150] sm:$0x1] %v10512_v28 }
 0x1f5   : > { %8138 = vmatmul.mubr.f32.gmra.mrb[14].mxu0 %v10989_v32  ;;  %v6637_v32 = vld [vmem:[%s12442_s1 + $0x410] sm:$0xff]  ;;  %3076 = vst [vmem:[#allocation2 + $0x168] sm:$0x1] %v10512_v28  ;;  %3077 = vst [vmem:[#allocation2 + $0x180] sm:$0x1] %v10512_v28 }
 0x1f6   : > { %8140 = vmatprep.mubr.f32.mxu0 %v10992_v37  ;;  %9379 = vmatpush3.bf16.msra.mxu0 %v9376_v3  ;;  %v6638_v37 = vld [vmem:[%s12442_s1 + $0x418] sm:$0xff]  ;;  %v6570_v3 = vld [vmem:[%s10662_s16 + $0xe1] sm:$0xff]  ;;  %3080 = vst [vmem:[#allocation2 + $0x29] sm:$0x1] %v10512_v28  ;;  %3081 = vst [vmem:[#allocation2 + $0x41] sm:$0x1] %v10512_v28 }
 0x1f7   : > { %9381 = vmatprep.subr.bf16.mxu0 %v9380_v24  ;;  %3082 = vst [vmem:[#allocation2 + $0x59] sm:$0x1] %v10512_v28  ;;  %3083 = vst [vmem:[#allocation2 + $0x71] sm:$0x1] %v10512_v28 }
 0x1f8   : > { %3084 = vst [vmem:[#allocation2 + $0x89] sm:$0x1] %v10512_v28  ;;  %3085 = vst [vmem:[#allocation2 + $0xa1] sm:$0x1] %v10512_v28 }
 0x1f9   : > { %8141 = vmatmul.mubr.f32.gmra.mrb[16].mxu0 %v10997_v38  ;;  %v3211_v38 = vld [vmem:[#allocation3 + $0x80] sm:$0xff]  ;;  %3086 = vst [vmem:[#allocation2 + $0xb9] sm:$0x1] %v10512_v28  ;;  %3087 = vst [vmem:[#allocation2 + $0xd1] sm:$0x1] %v10512_v28 }
 0x1fa   : > { %8143 = vmatprep.mubr.f32.mxu0 %v11000_v39  ;;  %v3212_v39 = vld [vmem:[#allocation3 + $0x88] sm:$0xff]  ;;  %3088 = vst [vmem:[#allocation2 + $0xe9] sm:$0x1] %v10512_v28  ;;  %3089 = vst [vmem:[#allocation2 + $0x101] sm:$0x1] %v10512_v28 }
 0x1fb   : > { %3090 = vst [vmem:[#allocation2 + $0x119] sm:$0x1] %v10512_v28  ;;  %3091 = vst [vmem:[#allocation2 + $0x131] sm:$0x1] %v10512_v28 }
 0x1fc   : > { %3092 = vst [vmem:[#allocation2 + $0x149] sm:$0x1] %v10512_v28  ;;  %3093 = vst [vmem:[#allocation2 + $0x161] sm:$0x1] %v10512_v28 }
 0x1fd   : > { %8144 = vmatmul.mubr.f32.gmra.mrb[18].mxu0 %v11005_v44  ;;  %v6556_v44 = vld [vmem:[%s10662_s16 + $0x39] sm:$0xff]  ;;  %3094 = vst [vmem:[#allocation2 + $0x179] sm:$0x1] %v10512_v28  ;;  %3095 = vst [vmem:[#allocation2 + $0x191] sm:$0x1] %v10512_v28 }
 0x1fe   : > { %8146 = vmatprep.mubr.f32.mxu0 %v11008_v47  ;;  %v11556_v47 = vpack.c.bf16 %v3212_v39, %v3211_v38  ;;  %v6579_v38 = vld [vmem:[%s10662_s16 + $0x151] sm:$0xff]  ;;  %v6580_v39 = vld [vmem:[%s10662_s16 + $0x159] sm:$0xff]  ;;  %3061 = vst [vmem:[#allocation2] sm:$0x1] %v10512_v28  ;;  %3078 = vst [vmem:[#allocation2 + $0x198] sm:$0x1] %v10512_v28 }
 0x1ff   : > { %3079 = vst [vmem:[#allocation2 + $0x11] sm:$0x1] %v10512_v28  ;;  %3096 = vst [vmem:[#allocation2 + $0x1a9] sm:$0x1] %v10512_v28 }
 0x200   : > { %9732 = vmatprep.subr.bf16.mxu1 %v11556_v47 }
 0x201   : > { %8147 = vmatmul.mubr.f32.gmra.mrb[20].mxu0 %v11013_v48  ;;  %v3213_v48 = vld [vmem:[#allocation3 + $0x90] sm:$0xff]  ;;  %9740 = vmatpush3.bf16.msra.mxu1 %v11556_v47 }
 0x202   : > { %8149 = vmatprep.mubr.f32.mxu0 %v11016_v53  ;;  %v3214_v53 = vld [vmem:[#allocation3 + $0x98] sm:$0xff] }
 0x205   : > { %8150 = vmatmul.mubr.f32.gmra.mrb[22].mxu0 %v11021_v54  ;;  %v6557_v54 = vld [vmem:[%s10662_s16 + $0x49] sm:$0xff] }
 0x206   : > { %8152 = vmatprep.mubr.f32.mxu0 %v11024_v57  ;;  %v9384_v57 = vpack.c.bf16 %v6638_v37, %v6637_v32  ;;  %v6577_v32 = vld [vmem:[%s10662_s16 + $0x139] sm:$0xff]  ;;  %v6578_v37 = vld [vmem:[%s10662_s16 + $0x141] sm:$0xff] }
 0x209   : > { %8153 = vmatmul.mubr.f32.gmra.mrb[24].mxu0 %v11029_v62  ;;  %v6639_v62 = vld [vmem:[%s12442_s1 + $0x420] sm:$0xff] }
 0x20a   : > { %8155 = vmatprep.mubr.f32.mxu0 %v11032_v63  ;;  %v6640_v63 = vld [vmem:[%s12442_s1 + $0x428] sm:$0xff] }
 0x20b   : > { %v9388_v35 = vpack.c.bf16 %v6640_v63, %v6639_v62  ;;  %v6604_v62 = vld [vmem:[%s10662_s16 + $0x3a] sm:$0xff]  ;;  %v6605_v63 = vld [vmem:[%s10662_s16 + $0x4a] sm:$0xff] }
 0x20d   : > { %8156 = vmatmul.mubr.f32.gmra.mrb[26].mxu0 %v11037_v0  ;;  %v11566_v0 = vpack.c.bf16 %v3214_v53, %v3213_v48  ;;  %v6582_v48 = vld [vmem:[%s10662_s16 + $0x171] sm:$0xff]  ;;  %v6585_v53 = vld [vmem:[%s10662_s16 + $0x199] sm:$0xff] }
 0x20e   : > { %8158 = vmatprep.mubr.f32.mxu0 %v11288_v23  ;;  %v6558_v23 = vld [vmem:[%s10662_s16 + $0x51] sm:$0xff] }
 0x20f   : > { %9733 = vmatprep.subr.bf16.mxu1 %v11566_v0 }
 0x210   : > { %9741 = vmatpush3.bf16.msra.mxu1 %v11566_v0 }
 0x211   : > { %8159 = vmatmul.mubr.f32.gmra.mrb[28].mxu0 %v11293_v13  ;;  %v3215_v13 = vld [vmem:[#allocation3 + $0xa0] sm:$0xff] }
 0x212   : > { %8161 = vmatprep.mubr.f32.mxu0 %v6537_v25  ;;  %v11578_v12 = vpack.c.bf16 %v3216_v31, %v3215_v13  ;;  %v6574_v25 = vld [vmem:[%s10662_s16 + $0x111] sm:$0xff]  ;;  %v6609_v13 = vld [vmem:[%s10662_s16 + $0x7a] sm:$0xff]  ;;  %v6610_v31 = vld [vmem:[%s10662_s16 + $0x82] sm:$0xff] }
 0x214   : > { %9734 = vmatprep.subr.bf16.mxu1 %v11578_v12 }
 0x215   : > { %8162 = vmatmul.mubr.f32.gmra.mrb[30].mxu0 %v6538_v29  ;;  %9742 = vmatpush3.bf16.msra.mxu1 %v11578_v12  ;;  %v6575_v29 = vld [vmem:[%s10662_s16 + $0x121] sm:$0xff] }
 0x216   : > { %8196 = vmatprep.mubr.f32.mxu0 %v6555_v30  ;;  %9735 = vmatprep.subr.bf16.mxu1 %v11590_v50  ;;  %v6576_v30 = vld [vmem:[%s10662_s16 + $0x129] sm:$0xff] }
 0x219   : > { %8197 = vmatmul.mubr.f32.vlgmr.msra.gmra.mrb[0].mxu0 %v6556_v44  ;;  %9743 = vmatpush3.bf16.msra.mxu1 %v11590_v50  ;;  %v6581_v44 = vld [vmem:[%s10662_s16 + $0x169] sm:$0xff] }
 0x21a   : > { %9383 = vmatpush3.bf16.msra.mxu0 %v9380_v24  ;;  %8199 = vmatprep.mubr.f32.mxu0 %v6557_v54  ;;  %v6573_v24 = vld [vmem:[%s10662_s16 + $0x109] sm:$0xff]  ;;  %v6586_v54 = vld [vmem:[%s10662_s16 + $0x1a1] sm:$0xff] }
 0x21b   : > { %9385 = vmatprep.subr.bf16.mxu0 %v9384_v57  ;;  %9736 = vmatprep.subr.bf16.mxu1 %v11602_v22 }
 0x21d   : > { %8200 = vmatmul.mubr.f32.gmra.mrb[2].mxu0 %v6558_v23  ;;  %9744 = vmatpush3.bf16.msra.mxu1 %v11602_v22  ;;  %v6606_v23 = vld [vmem:[%s10662_s16 + $0x52] sm:$0xff] }
 0x21e   : > { %8202 = vmatprep.mubr.f32.mxu0 %v6559_v20  ;;  %9387 = vmatpush3.bf16.msra.mxu0 %v9384_v57  ;;  %v6603_v57 = vld [vmem:[%s10662_s16 + $0x32] sm:$0xff]  ;;  %v6612_v20 = vld [vmem:[%s10662_s16 + $0x9a] sm:$0xff] }
 0x21f   : > { %9389 = vmatprep.subr.bf16.mxu0 %v9388_v35  ;;  %9737 = vmatprep.subr.bf16.mxu1 %v11614_v42 }
 0x221   : > { %8203 = vmatmul.mubr.f32.gmra.mrb[4].mxu0 %v6560_v40  ;;  %9745 = vmatpush3.bf16.msra.mxu1 %v11614_v42  ;;  %v6618_v40 = vld [vmem:[%s10662_s16 + $0xe2] sm:$0xff] }
 0x222   : > { %8205 = vmatprep.mubr.f32.mxu0 %v6561_v17  ;;  %9391 = vmatpush3.bf16.msra.mxu0 %v9388_v35  ;;  %v6614_v35 = vld [vmem:[%s10662_s16 + $0xb2] sm:$0xff]  ;;  %v6621_v17 = vld [vmem:[%s10662_s16 + $0x10a] sm:$0xff] }
 0x223   : > { %9393 = vmatprep.subr.bf16.mxu0 %v9392_v45 }
 0x225   : > { %8206 = vmatmul.mubr.f32.gmra.mrb[6].mxu0 %v6562_v51  ;;  %v6626_v51 = vld [vmem:[%s10662_s16 + $0x142] sm:$0xff] }
 0x226   : > { %8208 = vmatprep.mubr.f32.mxu0 %v6563_v56  ;;  %9395 = vmatpush3.bf16.msra.mxu0 %v9392_v45  ;;  %v6622_v45 = vld [vmem:[%s10662_s16 + $0x112] sm:$0xff]  ;;  %v6629_v56 = vld [vmem:[%s10662_s16 + $0x16a] sm:$0xff] }
 0x227   : > { %9397 = vmatprep.subr.bf16.mxu0 %v9396_v61 }
 0x229   : > { %8209 = vmatmul.mubr.f32.gmra.mrb[8].mxu0 %v6564_v4  ;;  %v3224_v4 = vld [vmem:[#allocation3 + $0xe8] sm:$0xff] }
 0x22a   : > { %8211 = vmatprep.mubr.f32.mxu0 %v6565_v6  ;;  %9399 = vmatpush3.bf16.msra.mxu0 %v9396_v61  ;;  %v6630_v61 = vld [vmem:[%s10662_s16 + $0x172] sm:$0xff] }
 0x22b   : > { %9401 = vmatprep.subr.bf16.mxu0 %v9400_v33 }
 0x22d   : > { %8212 = vmatmul.mubr.f32.gmra.mrb[10].mxu0 %v6566_v43 }
 0x22e   : > { %8214 = vmatprep.mubr.f32.mxu0 %v6567_v10  ;;  %9403 = vmatpush3.bf16.msra.mxu0 %v9400_v33  ;;  %v3178_v33 = vld [vmem:[#allocation2 + $0x1] sm:$0xff]  ;;  %v11738_v10 = vld [vmem:[%s12443_s2] ss:$0 sm:$0xff] }
 0x22f   : > { %9405 = vmatprep.subr.bf16.mxu0 %v9404_v49 }
 0x231   : > { %8215 = vmatmul.mubr.f32.gmra.mrb[12].mxu0 %v6568_v58 }
 0x232   : > { %8217 = vmatprep.mubr.f32.mxu0 %v6569_v59  ;;  %9407 = vmatpush3.bf16.msra.mxu0 %v9404_v49 }
 0x233   : > { %9409 = vmatprep.subr.bf16.mxu0 %v9408_v15 }
 0x235   : > { %8218 = vmatmul.mubr.f32.gmra.mrb[14].mxu0 %v6570_v3 }
 0x236   : > { %8220 = vmatprep.mubr.f32.mxu0 %v6571_v19  ;;  %9411 = vmatpush3.bf16.msra.mxu0 %v9408_v15 }
 0x237   : > { %9413 = vmatprep.subr.bf16.mxu0 %v11556_v47 }
 0x239   : > { %8221 = vmatmul.mubr.f32.gmra.mrb[16].mxu0 %v6572_v16 }
 0x23a   : > { %8223 = vmatprep.mubr.f32.mxu0 %v6573_v24 }
 0x23d   : > { %8224 = vmatmul.mubr.f32.gmra.mrb[18].mxu0 %v6574_v25 }
 0x23e   : > { %8226 = vmatprep.mubr.f32.mxu0 %v6575_v29 }
 0x241   : > { %8227 = vmatmul.mubr.f32.gmra.mrb[20].mxu0 %v6576_v30 }
 0x242   : > { %8229 = vmatprep.mubr.f32.mxu0 %v6577_v32 }
 0x245   : > { %8230 = vmatmul.mubr.f32.gmra.mrb[22].mxu0 %v6578_v37 }
 0x246   : > { %8232 = vmatprep.mubr.f32.mxu0 %v6579_v38 }
 0x249   : > { %8233 = vmatmul.mubr.f32.gmra.mrb[24].mxu0 %v6580_v39 }
 0x24a   : > { %8235 = vmatprep.mubr.f32.mxu0 %v6581_v44 }
 0x24d   : > { %8236 = vmatmul.mubr.f32.gmra.mrb[26].mxu0 %v6582_v48 }
 0x24e   : > { %8238 = vmatprep.mubr.f32.mxu0 %v11374_v7  ;;  %v6607_v7 = vld [vmem:[%s10662_s16 + $0x62] sm:$0xff] }
 0x251   : > { %8239 = vmatmul.mubr.f32.gmra.mrb[28].mxu0 %v11379_v9  ;;  %v6608_v9 = vld [vmem:[%s10662_s16 + $0x6a] sm:$0xff] }
 0x252   : > { %8241 = vmatprep.mubr.f32.mxu0 %v6585_v53 }
 0x255   : > { %8242 = vmatmul.mubr.f32.gmra.mrb[30].mxu0 %v6586_v54 }
 0x256   : > { %8276 = vmatprep.mubr.f32.mxu0 %v6603_v57 }
 0x259   : > { %8277 = vmatmul.mubr.f32.vlgmr.msra.gmra.mrb[0].mxu0 %v6604_v62 }
 0x25a   : > { %8279 = vmatprep.mubr.f32.mxu0 %v6605_v63  ;;  %9415 = vmatpush3.bf16.msra.mxu0 %v11556_v47  ;;  %v6611_v47 = vld [vmem:[%s10662_s16 + $0x92] sm:$0xff] }
 0x25b   : > { %9417 = vmatprep.subr.bf16.mxu0 %v11566_v0 }
 0x25d   : > { %8280 = vmatmul.mubr.f32.gmra.mrb[2].mxu0 %v6606_v23 }
 0x25e   : > { %8282 = vmatprep.mubr.f32.mxu0 %v6607_v7  ;;  %9419 = vmatpush3.bf16.msra.mxu0 %v11566_v0  ;;  %v6613_v0 = vld [vmem:[%s10662_s16 + $0xaa] sm:$0xff] }
 0x25f   : > { %9421 = vmatprep.subr.bf16.mxu0 %v11578_v12 }
 0x261   : > { %8283 = vmatmul.mubr.f32.gmra.mrb[4].mxu0 %v6608_v9 }
 0x262   : > { %8285 = vmatprep.mubr.f32.mxu0 %v6609_v13  ;;  %9423 = vmatpush3.bf16.msra.mxu0 %v11578_v12  ;;  %v6617_v12 = vld [vmem:[%s10662_s16 + $0xda] sm:$0xff] }
 0x263   : > { %9425 = vmatprep.subr.bf16.mxu0 %v11590_v50 }
 0x265   : > { %8286 = vmatmul.mubr.f32.gmra.mrb[6].mxu0 %v6610_v31 }
 0x266   : > { %8288 = vmatprep.mubr.f32.mxu0 %v6611_v47  ;;  %9427 = vmatpush3.bf16.msra.mxu0 %v11590_v50  ;;  %v6625_v50 = vld [vmem:[%s10662_s16 + $0x13a] sm:$0xff] }
 0x267   : > { %9429 = vmatprep.subr.bf16.mxu0 %v11602_v22 }
 0x269   : > { %8289 = vmatmul.mubr.f32.gmra.mrb[8].mxu0 %v6612_v20 }
 0x26a   : > { %8291 = vmatprep.mubr.f32.mxu0 %v6613_v0  ;;  %9431 = vmatpush3.bf16.msra.mxu0 %v11602_v22  ;;  %v3223_v22 = vld [vmem:[#allocation3 + $0xe0] sm:$0xff] }
 0x26b   : > { %9433 = vmatprep.subr.bf16.mxu0 %v11614_v42  ;;  %v9436_v5 = vpack.c.bf16 %v3224_v4, %v3223_v22 }
 0x26d   : > { %8292 = vmatmul.mubr.f32.gmra.mrb[10].mxu0 %v6614_v35  ;;  %9738 = vmatprep.subr.bf16.mxu1 %v9436_v5 }
 0x26e   : > { %8294 = vmatprep.mubr.f32.mxu0 %v6615_v36  ;;  %9435 = vmatpush3.bf16.msra.mxu0 %v11614_v42  ;;  %v3163_v42 = vld [vmem:[#allocation3 + $0x8] sm:$0xff] }
 0x26f   : > { %9437 = vmatprep.subr.bf16.mxu0 %v9436_v5  ;;  %9746 = vmatpush3.bf16.msra.mxu1 %v9436_v5  ;;  %v11732_v43 = vpack.c.bf16 %v3163_v42, %v3162_v8 }
 0x271   : > { %8295 = vmatmul.mubr.f32.gmra.mrb[12].mxu0 %v6616_v26 }
 0x272   : > { %8297 = vmatprep.mubr.f32.mxu0 %v6617_v12  ;;  %9439 = vmatpush3.bf16.msra.mxu0 %v9436_v5 }
 0x275   : > { %8298 = vmatmul.mubr.f32.gmra.mrb[14].mxu0 %v6618_v40 }
 0x276   : > { %8300 = vmatprep.mubr.f32.mxu0 %v6619_v41 }
 0x279   : > { %8301 = vmatmul.mubr.f32.gmra.mrb[16].mxu0 %v6620_v27 }
 0x27a   : > { %8303 = vmatprep.mubr.f32.mxu0 %v6621_v17 }
 0x27d   : > { %8304 = vmatmul.mubr.f32.gmra.mrb[18].mxu0 %v6622_v45 }
 0x27e   : > { %8306 = vmatprep.mubr.f32.mxu0 %v6623_v46 }
 0x281   : > { %8307 = vmatmul.mubr.f32.gmra.mrb[20].mxu0 %v6624_v21 }
 0x282   : > { %8309 = vmatprep.mubr.f32.mxu0 %v6625_v50 }
 0x285   : > { %8310 = vmatmul.mubr.f32.gmra.mrb[22].mxu0 %v6626_v51 }
 0x286   : > { %8312 = vmatprep.mubr.f32.mxu0 %v6627_v18 }
 0x289   : > { %8313 = vmatmul.mubr.f32.gmra.mrb[24].mxu0 %v6628_v55  ;;  %v3164_v55 = vld [vmem:[#allocation3 + $0x10] sm:$0xff] }
 0x28a   : > { %8315 = vmatprep.mubr.f32.mxu0 %v6629_v56  ;;  %v3165_v56 = vld [vmem:[#allocation3 + $0x18] sm:$0xff] }
 0x28b   : > { %v9448_v5 = vpack.c.bf16 %v3165_v56, %v3164_v55  ;;  %v3710_v56 = vld [vmem:[#allocation3 + $0x100] sm:$0xff] }
 0x28d   : > { %8316 = vmatmul.mubr.f32.gmra.mrb[26].mxu0 %v6630_v61 }
 0x28e   : > { %8318 = vmatprep.mubr.f32.mxu0 %v11460_v14  ;;  %v3225_v14 = vld [vmem:[#allocation3 + $0xf0] sm:$0xff] }
 0x291   : > { %8319 = vmatmul.mubr.f32.gmra.mrb[28].mxu0 %v11465_v60  ;;  %v3226_v60 = vld [vmem:[#allocation3 + $0xf8] sm:$0xff] }
 0x292   : > { %8321 = vmatprep.mubr.f32.mxu0 %v6633_v1  ;;  %v9440_v6 = vpack.c.bf16 %v3226_v60, %v3225_v14  ;;  %v3166_v60 = vld [vmem:[#allocation3 + $0x20] sm:$0xff] }
 0x294   : > { %9441 = vmatprep.subr.bf16.mxu0 %v9440_v6  ;;  %9739 = vmatprep.subr.bf16.mxu1 %v9440_v6 }
 0x295   : > { %8322 = vmatmul.mubr.f32.gmra.mrb[30].mxu0 %v6634_v2  ;;  %9747 = vmatpush3.bf16.msra.mxu1 %v9440_v6 }
 0x296   : > { %9443 = vmatpush3.bf16.msra.mxu0 %v9440_v6  ;;  %8356 = vmatprep.mubr.f32.mxu0 %v3178_v33  ;;  %v3167_v6 = vld [vmem:[#allocation3 + $0x28] sm:$0xff] }
 0x297   : > { %9445 = vmatprep.subr.bf16.mxu1 %v11732_v43 }
 0x299   : > { %8357 = vmatmul.mubr.f32.vlgmr.msra.gmra.mrb[32].mxu0 %v3179_v34 }
 0x32c   : > { %v8278_v49 = vpop.f32.mrb[0].mxu0 }
 0x32d   : > { %v2991_v52 = vadd.f32 %v8278_v49, %v11738_v10  ;;  %v2792_v11 = vpop.f32.mrb[1].mxu0 }
 0x32e   : > { %v2990_v58 = vadd.f32 %v11738_v10, %v2792_v11 }
 0x32f   : > { %v3023_v59 = vmax.f32 %v2991_v52, 0.0  ;;  %v9452_v52 = vpack.c.bf16 %v3167_v6, %v3166_v60 }
 0x330   : > { %v3022_v15 = vmax.f32 %v2990_v58, 0.0  ;;  %v8281_v3 = vpop.f32.mrb[2].mxu0  ;;  %v3168_v58 = vld [vmem:[#allocation3 + $0x30] sm:$0xff] }
 0x331   : > { %3099 = vst [vmem:[#allocation2 + $0x21] sm:$0xff] %v3023_v59  ;;  %v2993_v19 = vadd.f32 %v8281_v3, %v11738_v10  ;;  %v2802_v16 = vpop.f32.mrb[3].mxu0 }
 0x332   : > { %3098 = vst [vmem:[#allocation2 + $0x19] sm:$0xff] %v3022_v15  ;;  %v2992_v24 = vadd.f32 %v11738_v10, %v2802_v16  ;;  %8359 = vmatprep.mubr.f32.mxu0 %v3022_v15 }
 0x333   : > { %v3025_v25 = vmax.f32 %v2993_v19, 0.0  ;;  %8360 = vmatmul.mubr.f32.gmra.mrb[34].mxu0 %v3023_v59  ;;  %v3169_v59 = vld [vmem:[#allocation3 + $0x38] sm:$0xff] }
 0x334   : > { %v3024_v29 = vmax.f32 %v2992_v24, 0.0  ;;  %v8284_v30 = vpop.f32.mrb[4].mxu0  ;;  %v9456_v24 = vpack.c.bf16 %v3169_v59, %v3168_v58 }
 0x335   : > { %3101 = vst [vmem:[#allocation2 + $0x39] sm:$0xff] %v3025_v25  ;;  %v2995_v32 = vadd.f32 %v8284_v30, %v11738_v10  ;;  %v2812_v37 = vpop.f32.mrb[5].mxu0  ;;  %v3171_v30 = vld [vmem:[#allocation3 + $0x48] sm:$0xff] }
 0x336   : > { %3100 = vst [vmem:[#allocation2 + $0x31] sm:$0xff] %v3024_v29  ;;  %v2994_v38 = vadd.f32 %v11738_v10, %v2812_v37  ;;  %8362 = vmatprep.mubr.f32.mxu0 %v3024_v29  ;;  %v3170_v29 = vld [vmem:[#allocation3 + $0x40] sm:$0xff] }
 0x337   : > { %v3027_v39 = vmax.f32 %v2995_v32, 0.0  ;;  %8363 = vmatmul.mubr.f32.gmra.mrb[36].mxu0 %v3025_v25 }
 0x338   : > { %v3026_v44 = vmax.f32 %v2994_v38, 0.0  ;;  %v8287_v48 = vpop.f32.mrb[6].mxu0 }
 0x339   : > { %3103 = vst [vmem:[#allocation2 + $0x51] sm:$0xff] %v3027_v39  ;;  %v2997_v53 = vadd.f32 %v8287_v48, %v11738_v10  ;;  %v2822_v54 = vpop.f32.mrb[7].mxu0  ;;  %v9460_v48 = vpack.c.bf16 %v3171_v30, %v3170_v29  ;;  %v11811_v59 = vld [vmem:[#allocation2 + $0x20] sm:$0xff] }
 0x33a   : > { %3102 = vst [vmem:[#allocation2 + $0x49] sm:$0xff] %v3026_v44  ;;  %v2996_v57 = vadd.f32 %v11738_v10, %v2822_v54  ;;  %8365 = vmatprep.mubr.f32.mxu0 %v3026_v44  ;;  %v3172_v54 = vld [vmem:[#allocation3 + $0x50] sm:$0xff] }
 0x33b   : > { %v3029_v62 = vmax.f32 %v2997_v53, 0.0  ;;  %8366 = vmatmul.mubr.f32.gmra.mrb[38].mxu0 %v3027_v39 }
 0x33c   : > { %v3028_v63 = vmax.f32 %v2996_v57, 0.0  ;;  %v8290_v23 = vpop.f32.mrb[8].mxu0  ;;  %v3173_v57 = vld [vmem:[#allocation3 + $0x58] sm:$0xff] }
 0x33d   : > { %3105 = vst [vmem:[#allocation2 + $0x69] sm:$0xff] %v3029_v62  ;;  %v2999_v7 = vadd.f32 %v8290_v23, %v11738_v10  ;;  %v2832_v9 = vpop.f32.mrb[9].mxu0 }
 0x33e   : > { %3104 = vst [vmem:[#allocation2 + $0x61] sm:$0xff] %v3028_v63  ;;  %v2998_v13 = vadd.f32 %v11738_v10, %v2832_v9  ;;  %8368 = vmatprep.mubr.f32.mxu0 %v3028_v63 }
 0x33f   : > { %v3031_v31 = vmax.f32 %v2999_v7, 0.0  ;;  %8369 = vmatmul.mubr.f32.gmra.mrb[40].mxu0 %v3029_v62 }
 0x340   : > { %v3030_v47 = vmax.f32 %v2998_v13, 0.0  ;;  %v8293_v20 = vpop.f32.mrb[10].mxu0  ;;  %v9464_v13 = vpack.c.bf16 %v3173_v57, %v3172_v54 }
 0x341   : > { %3107 = vst [vmem:[#allocation2 + $0x81] sm:$0xff] %v3031_v31  ;;  %v3001_v0 = vadd.f32 %v8293_v20, %v11738_v10  ;;  %v2842_v35 = vpop.f32.mrb[11].mxu0  ;;  %v3175_v20 = vld [vmem:[#allocation3 + $0x68] sm:$0xff]  ;;  %v11823_v30 = vld [vmem:[#allocation2 + $0x50] sm:$0xff] }
 0x342   : > { %3106 = vst [vmem:[#allocation2 + $0x79] sm:$0xff] %v3030_v47  ;;  %v3000_v36 = vadd.f32 %v11738_v10, %v2842_v35  ;;  %8371 = vmatprep.mubr.f32.mxu0 %v3030_v47  ;;  %v3174_v47 = vld [vmem:[#allocation3 + $0x60] sm:$0xff] }
 0x343   : > { %v3033_v26 = vmax.f32 %v3001_v0, 0.0  ;;  %8372 = vmatmul.mubr.f32.gmra.mrb[42].mxu0 %v3031_v31 }
 0x344   : > { %v3032_v12 = vmax.f32 %v3000_v36, 0.0  ;;  %v8296_v40 = vpop.f32.mrb[12].mxu0 }
 0x345   : > { %3109 = vst [vmem:[#allocation2 + $0x99] sm:$0xff] %v3033_v26  ;;  %v3003_v41 = vadd.f32 %v8296_v40, %v11738_v10  ;;  %v2852_v27 = vpop.f32.mrb[13].mxu0  ;;  %v9468_v40 = vpack.c.bf16 %v3175_v20, %v3174_v47  ;;  %v4016_v20 = vld [vmem:[#allocation3 + $0x180] sm:$0xff] }
 0x346   : > { %3108 = vst [vmem:[#allocation2 + $0x91] sm:$0xff] %v3032_v12  ;;  %v3002_v17 = vadd.f32 %v11738_v10, %v2852_v27  ;;  %8374 = vmatprep.mubr.f32.mxu0 %v3032_v12  ;;  %v3176_v27 = vld [vmem:[#allocation3 + $0x70] sm:$0xff] }
 0x347   : > { %v3035_v45 = vmax.f32 %v3003_v41, 0.0  ;;  %8375 = vmatmul.mubr.f32.gmra.mrb[44].mxu0 %v3033_v26 }
 0x348   : > { %v3034_v46 = vmax.f32 %v3002_v17, 0.0  ;;  %v8299_v21 = vpop.f32.mrb[14].mxu0  ;;  %v3177_v17 = vld [vmem:[#allocation3 + $0x78] sm:$0xff] }
 0x349   : > { %3111 = vst [vmem:[#allocation2 + $0xb1] sm:$0xff] %v3035_v45  ;;  %v3005_v50 = vadd.f32 %v8299_v21, %v11738_v10  ;;  %v2862_v51 = vpop.f32.mrb[15].mxu0  ;;  %v11832_v54 = vld [vmem:[#allocation2 + $0x78] sm:$0xff] }
 0x34a   : > { %3110 = vst [vmem:[#allocation2 + $0xa9] sm:$0xff] %v3034_v46  ;;  %v3004_v18 = vadd.f32 %v11738_v10, %v2862_v51  ;;  %8377 = vmatprep.mubr.f32.mxu0 %v3034_v46 }
 0x34b   : > { %v3037_v61 = vmax.f32 %v3005_v50, 0.0  ;;  %8378 = vmatmul.mubr.f32.gmra.mrb[46].mxu0 %v3035_v45 }
 0x34c   : > { %v3036_v1 = vmax.f32 %v3004_v18, 0.0  ;;  %v8302_v2 = vpop.f32.mrb[16].mxu0  ;;  %v9472_v18 = vpack.c.bf16 %v3177_v17, %v3176_v27 }
 0x34d   : > { %3113 = vst [vmem:[#allocation2 + $0xc9] sm:$0xff] %v3037_v61  ;;  %v3007_v22 = vadd.f32 %v8302_v2, %v11738_v10  ;;  %v2872_v4 = vpop.f32.mrb[17].mxu0  ;;  %v11845_v47 = vld [vmem:[#allocation2 + $0x98] sm:$0xff] }
 0x34e   : > { %3112 = vst [vmem:[#allocation2 + $0xc1] sm:$0xff] %v3036_v1  ;;  %v3006_v14 = vadd.f32 %v11738_v10, %v2872_v4  ;;  %8380 = vmatprep.mubr.f32.mxu1 %v3036_v1 }
 0x34f   : > { %v3039_v33 = vmax.f32 %v3007_v22, 0.0  ;;  %8381 = vmatmul.mubr.f32.vlgmr.msra.gmra.mrb[0].mxu1 %v3037_v61  ;;  %v3711_v61 = vld [vmem:[#allocation3 + $0x108] sm:$0xff] }
 0x350   : > { %v3038_v34 = vmax.f32 %v3006_v14, 0.0  ;;  %v8305_v8 = vpop.f32.mrb[18].mxu0  ;;  %9447 = vmatpush3.bf16.msra.mxu1 %v11732_v43  ;;  %v3130_v14 = vld [vmem:[#allocation2] sm:$0xff]  ;;  %v9476_v60 = vpack.c.bf16 %v3711_v61, %v3710_v56 }
 0x351   : > { %3115 = vst [vmem:[#allocation2 + $0xe1] sm:$0xff] %v3039_v33  ;;  %v3009_v42 = vadd.f32 %v8305_v8, %v11738_v10  ;;  %v2882_v49 = vpop.f32.mrb[19].mxu0  ;;  %9449 = vmatprep.subr.bf16.mxu1 %v9448_v5 }
 0x352   : > { %3114 = vst [vmem:[#allocation2 + $0xd9] sm:$0xff] %v3038_v34  ;;  %v3008_v11 = vadd.f32 %v11738_v10, %v2882_v49  ;;  %8383 = vmatprep.mubr.f32.mxu1 %v3038_v34  ;;  %v3713_v34 = vld [vmem:[#allocation3 + $0x118] sm:$0xff] }
 0x353   : > { %v3041_v15 = vmax.f32 %v3009_v42, 0.0  ;;  %8384 = vmatmul.mubr.f32.gmra.mrb[2].mxu1 %v3039_v33  ;;  %v3712_v33 = vld [vmem:[#allocation3 + $0x110] sm:$0xff] }
 0x354   : > { %v3040_v3 = vmax.f32 %v3008_v11, 0.0  ;;  %v8308_v19 = vpop.f32.mrb[20].mxu0  ;;  %9451 = vmatpush3.bf16.msra.mxu1 %v9448_v5  ;;  %v9480_v49 = vpack.c.bf16 %v3713_v34, %v3712_v33  ;;  %v11808_v11 = vld [vmem:[#allocation2 + $0x18] sm:$0xff]  ;;  %v3677_v34 = vld [vmem:[#allocation2 + $0x2] sm:$0xff] }
 0x355   : > { %3117 = vst [vmem:[#allocation2 + $0xf9] sm:$0xff] %v3041_v15  ;;  %v3011_v43 = vadd.f32 %v8308_v19, %v11738_v10  ;;  %v2892_v16 = vpop.f32.mrb[21].mxu0  ;;  %9453 = vmatprep.subr.bf16.mxu1 %v9452_v52  ;;  %v11814_v19 = vld [vmem:[#allocation2 + $0x30] sm:$0xff]  ;;  %v11857_v27 = vld [vmem:[#allocation2 + $0xc8] sm:$0xff] }
 0x356   : > { %3116 = vst [vmem:[#allocation2 + $0xf1] sm:$0xff] %v3040_v3  ;;  %v3010_v25 = vadd.f32 %v11738_v10, %v2892_v16  ;;  %8386 = vmatprep.mubr.f32.mxu1 %v3040_v3  ;;  %v3717_v3 = vld [vmem:[#allocation3 + $0x138] sm:$0xff]  ;;  %v3718_v16 = vld [vmem:[#allocation3 + $0x140] sm:$0xff] }
 0x357   : > { %v3043_v32 = vmax.f32 %v3011_v43, 0.0  ;;  %8387 = vmatmul.mubr.f32.gmra.mrb[4].mxu1 %v3041_v15  ;;  %v3716_v15 = vld [vmem:[#allocation3 + $0x130] sm:$0xff]  ;;  %v11817_v43 = vld [vmem:[#allocation2 + $0x38] sm:$0xff] }
 0x358   : > { %v3042_v37 = vmax.f32 %v3010_v25, 0.0  ;;  %v8311_v38 = vpop.f32.mrb[22].mxu0  ;;  %9455 = vmatpush3.bf16.msra.mxu1 %v9452_v52  ;;  %v3715_v52 = vld [vmem:[#allocation3 + $0x128] sm:$0xff]  ;;  %v11820_v25 = vld [vmem:[#allocation2 + $0x48] sm:$0xff] }
 0x359   : > { %3119 = vst [vmem:[#allocation2 + $0x111] sm:$0xff] %v3043_v32  ;;  %v3013_v39 = vadd.f32 %v8311_v38, %v11738_v10  ;;  %v2902_v44 = vpop.f32.mrb[23].mxu0  ;;  %9457 = vmatprep.subr.bf16.mxu1 %v9456_v24  ;;  %v11826_v38 = vld [vmem:[#allocation2 + $0x60] sm:$0xff]  ;;  %v11860_v17 = vld [vmem:[#allocation2 + $0xd8] sm:$0xff] }
 0x35a   : > { %3118 = vst [vmem:[#allocation2 + $0x109] sm:$0xff] %v3042_v37  ;;  %v3012_v53 = vadd.f32 %v11738_v10, %v2902_v44  ;;  %8389 = vmatprep.mubr.f32.mxu1 %v3042_v37  ;;  %v3721_v37 = vld [vmem:[#allocation3 + $0x158] sm:$0xff] }
 0x35b   : > { %v3045_v62 = vmax.f32 %v3013_v39, 0.0  ;;  %8390 = vmatmul.mubr.f32.gmra.mrb[6].mxu1 %v3043_v32  ;;  %v3720_v32 = vld [vmem:[#allocation3 + $0x150] sm:$0xff]  ;;  %v11829_v44 = vld [vmem:[#allocation2 + $0x68] sm:$0xff] }
 0x35c   : > { %v3044_v63 = vmax.f32 %v3012_v53, 0.0  ;;  %v8314_v23 = vpop.f32.mrb[24].mxu0  ;;  %9459 = vmatpush3.bf16.msra.mxu1 %v9456_v24  ;;  %v3719_v24 = vld [vmem:[#allocation3 + $0x148] sm:$0xff]  ;;  %v9496_v39 = vpack.c.bf16 %v3721_v37, %v3720_v32  ;;  %v4022_v32 = vld [vmem:[#allocation3 + $0x1b0] sm:$0xff]  ;;  %v4023_v37 = vld [vmem:[#allocation3 + $0x1b8] sm:$0xff] }
 0x35d   : > { %3121 = vst [vmem:[#allocation2 + $0x129] sm:$0xff] %v3045_v62  ;;  %v3015_v7 = vadd.f32 %v8314_v23, %v11738_v10  ;;  %v2912_v9 = vpop.f32.mrb[25].mxu0  ;;  %9461 = vmatprep.subr.bf16.mxu1 %v9460_v48  ;;  %v9492_v29 = vpack.c.bf16 %v3719_v24, %v3718_v16  ;;  %v3723_v53 = vld [vmem:[#allocation3 + $0x168] sm:$0xff]  ;;  %v3725_v23 = vld [vmem:[#allocation3 + $0x178] sm:$0xff] }
 0x35e   : > { %3120 = vst [vmem:[#allocation2 + $0x121] sm:$0xff] %v3044_v63  ;;  %v3014_v31 = vadd.f32 %v11738_v10, %v2912_v9  ;;  %8392 = vmatprep.mubr.f32.mxu1 %v3044_v63  ;;  %v3724_v63 = vld [vmem:[#allocation3 + $0x170] sm:$0xff] }
 0x35f   : > { %v11767_v0 = vmax.f32 %v3015_v7, 0.0  ;;  %8393 = vmatmul.mubr.f32.gmra.mrb[8].mxu1 %v3045_v62  ;;  %v11835_v62 = vld [vmem:[#allocation2 + $0x80] sm:$0xff]  ;;  %v11838_v7 = vld [vmem:[#allocation2 + $0x90] sm:$0xff] }
 0x360   : > { %v11769_v35 = vmax.f32 %v3014_v31, 0.0  ;;  %v8317_v36 = vpop.f32.mrb[26].mxu0  ;;  %9463 = vmatpush3.bf16.msra.mxu1 %v9460_v48  ;;  %v3722_v48 = vld [vmem:[#allocation3 + $0x160] sm:$0xff]  ;;  %v9504_v31 = vpack.c.bf16 %v3725_v23, %v3724_v63  ;;  %v11902_v16 = vld [vmem:[#allocation2 + $0x1a] sm:$0xff] }
 0x361   : > { %3123 = vst [vmem:[#allocation2 + $0x141] sm:$0xff] %v11767_v0  ;;  %v3017_v26 = vadd.f32 %v8317_v36, %v11738_v10  ;;  %v2922_v12 = vpop.f32.mrb[27].mxu0  ;;  %9465 = vmatprep.subr.bf16.mxu1 %v9464_v13  ;;  %v9500_v57 = vpack.c.bf16 %v3723_v53, %v3722_v48  ;;  %v4017_v36 = vld [vmem:[#allocation3 + $0x188] sm:$0xff]  ;;  %v9520_v48 = vpack.c.bf16 %v4023_v37, %v4022_v32  ;;  %v11914_v23 = vld [vmem:[#allocation2 + $0x4a] sm:$0xff]  ;;  %v4030_v32 = vld [vmem:[#allocation3 + $0x1f0] sm:$0xff] }
 0x362   : > { %3122 = vst [vmem:[#allocation2 + $0x139] sm:$0xff] %v11769_v35  ;;  %v3016_v41 = vadd.f32 %v11738_v10, %v2922_v12  ;;  %8395 = vmatprep.mubr.f32.mxu1 %v11769_v35  ;;  %v9508_v12 = vpack.c.bf16 %v4017_v36, %v4016_v20  ;;  %v11911_v53 = vld [vmem:[#allocation2 + $0x3a] sm:$0xff]  ;;  %v11917_v20 = vld [vmem:[#allocation2 + $0x52] sm:$0xff]  ;;  %v4031_v37 = vld [vmem:[#allocation3 + $0x1f8] sm:$0xff] }
 0x363   : > { %v11776_v45 = vmax.f32 %v3017_v26, 0.0  ;;  %8396 = vmatmul.mubr.f32.gmra.mrb[10].mxu1 %v11767_v0  ;;  %v11848_v26 = vld [vmem:[#allocation2 + $0xa8] sm:$0xff]  ;;  %v4025_v63 = vld [vmem:[#allocation3 + $0x1c8] sm:$0xff]  ;;  %v4026_v36 = vld [vmem:[#allocation3 + $0x1d0] sm:$0xff] }
 0x364   : > { %v11779_v46 = vmax.f32 %v3016_v41, 0.0  ;;  %v8320_v21 = vpop.f32.mrb[28].mxu0  ;;  %9467 = vmatpush3.bf16.msra.mxu1 %v9464_v13  ;;  %v11854_v41 = vld [vmem:[#allocation2 + $0xc0] sm:$0xff] }
 0x365   : > { %3125 = vst [vmem:[#allocation2 + $0x159] sm:$0xff] %v11776_v45  ;;  %v3019_v50 = vadd.f32 %v8320_v21, %v11738_v10  ;;  %v2932_v51 = vpop.f32.mrb[29].mxu0  ;;  %9469 = vmatprep.subr.bf16.mxu1 %v9468_v40  ;;  %v11863_v21 = vld [vmem:[#allocation2 + $0xe0] sm:$0xff]  ;;  %v11881_v61 = vld [vmem:[#allocation2 + $0x128] sm:$0xff] }
 0x366   : > { %3124 = vst [vmem:[#allocation2 + $0x151] sm:$0xff] %v11779_v46  ;;  %v3018_v55 = vadd.f32 %v11738_v10, %v2932_v51  ;;  %8398 = vmatprep.mubr.f32.mxu1 %v11779_v46  ;;  %v11869_v51 = vld [vmem:[#allocation2 + $0xf8] sm:$0xff]  ;;  %v11878_v56 = vld [vmem:[#allocation2 + $0x120] sm:$0xff] }
 0x367   : > { %v11786_v1 = vmax.f32 %v3019_v50, 0.0  ;;  %8399 = vmatmul.mubr.f32.gmra.mrb[12].mxu1 %v11776_v45  ;;  %v11866_v50 = vld [vmem:[#allocation2 + $0xf0] sm:$0xff] }
 0x368   : > { %v11789_v2 = vmax.f32 %v3018_v55, 0.0  ;;  %v8323_v22 = vpop.f32.mrb[30].mxu0  ;;  %9471 = vmatpush3.bf16.msra.mxu1 %v9468_v40  ;;  %v11851_v40 = vld [vmem:[#allocation2 + $0xb0] sm:$0xff] }
 0x369   : > { %3127 = vst [vmem:[#allocation2 + $0x171] sm:$0xff] %v11786_v1  ;;  %v11793_v4 = vadd.f32 %v8323_v22, %v11738_v10  ;;  %v2942_v5 = vpop.f32.mrb[31].mxu0  ;;  %9473 = vmatprep.subr.bf16.mxu1 %v9472_v18  ;;  %v11875_v55 = vld [vmem:[#allocation2 + $0x110] sm:$0xff]  ;;  %v11884_v22 = vld [vmem:[#allocation2 + $0x138] sm:$0xff] }
 0x36a   : > { %3126 = vst [vmem:[#allocation2 + $0x169] sm:$0xff] %v11789_v2  ;;  %v11797_v6 = vadd.f32 %v11738_v10, %v2942_v5  ;;  %8401 = vmatprep.mubr.f32.mxu1 %v11789_v2  ;;  %v3714_v10 = vld [vmem:[#allocation3 + $0x120] sm:$0xff]  ;;  %v11887_v5 = vld [vmem:[#allocation2 + $0x140] sm:$0xff] }
 0x36b   : > { %v12485_v8 = vmax.f32 %v11793_v4, 0.0  ;;  %8402 = vmatmul.mubr.f32.gmra.mrb[14].mxu1 %v11786_v1  ;;  %v9484_v58 = vpack.c.bf16 %v3715_v52, %v3714_v10  ;;  %v4018_v10 = vld [vmem:[#allocation3 + $0x190] sm:$0xff]  ;;  %v4019_v52 = vld [vmem:[#allocation3 + $0x198] sm:$0xff] }
 0x36c   : > { %v12486_v42 = vmax.f32 %v11797_v6, 0.0  ;;  %9475 = vmatpush3.bf16.msra.mxu1 %v9472_v18  ;;  %8436 = vmatprep.mubr.f32.mxu1 %v3130_v14  ;;  %v11840_v9 = vpop.f32.mrb[32].mxu0  ;;  %v11872_v18 = vld [vmem:[#allocation2 + $0x108] sm:$0xff] }
 0x36d   : > { %3129 = vst [vmem:[#allocation2 + $0x189] sm:$0xff] %v12485_v8  ;;  %9477 = vmatprep.subr.bf16.mxu1 %v9476_v60  ;;  %12574 = vst [vmem:[#allocation9_spill] sm:$0xff] %v11840_v9  ;;  %v11843_v13 = vpop.f32.mrb[33].mxu0  ;;  %v11890_v14 = vld [vmem:[#allocation2 + $0x150] sm:$0xff]  ;;  %v11974_v9 = vld [vmem:[#allocation2 + $0x13a] sm:$0xff] }
 0x36e   : > { %3128 = vst [vmem:[#allocation2 + $0x181] sm:$0xff] %v12486_v42  ;;  %12575 = vst [vmem:[#allocation10_spill] sm:$0xff] %v11843_v13  ;;  %v11965_v8 = vld [vmem:[#allocation2 + $0x112] sm:$0xff]  ;;  %v11968_v42 = vld [vmem:[#allocation2 + $0x122] sm:$0xff] }
 0x36f   : > { %8437 = vmatmul.mubr.f32.vlgmr.msra.gmra.mrb[16].mxu1 %v10512_v28  ;;  %v9488_v28 = vpack.c.bf16 %v3717_v3, %v3716_v15  ;;  %v9512_v15 = vpack.c.bf16 %v4019_v52, %v4018_v10  ;;  %v4020_v3 = vld [vmem:[#allocation3 + $0x1a0] sm:$0xff]  ;;  %12581 = vst [vmem:[#allocation16_spill] sm:$0xff] %v11965_v8  ;;  %12582 = vst [vmem:[#allocation17_spill] sm:$0xff] %v11968_v42 }
 0x370   : > { %8439 = vmatprep.mubr.f32.mxu1 %v11808_v11  ;;  %9479 = vmatpush3.bf16.msra.mxu1 %v9476_v60  ;;  %v11893_v60 = vld [vmem:[#allocation2 + $0x158] sm:$0xff]  ;;  %v11923_v52 = vld [vmem:[#allocation2 + $0x6a] sm:$0xff]  ;;  %12584 = vst [vmem:[#allocation19_spill] sm:$0xff] %v11974_v9 }
 0x371   : > { %9481 = vmatprep.subr.bf16.mxu1 %v9480_v49  ;;  %v11896_v33 = vld [vmem:[#allocation2 + $0x168] sm:$0xff] }
 0x372   : > { %v11971_v13 = vld [vmem:[#allocation2 + $0x12a] sm:$0xff] }
 0x373   : > { %8440 = vmatmul.mubr.f32.gmra.mrb[18].mxu1 %v11811_v59  ;;  %12583 = vst [vmem:[#allocation18_spill] sm:$0xff] %v11971_v13 }
 0x374   : > { %8442 = vmatprep.mubr.f32.mxu1 %v11814_v19  ;;  %9483 = vmatpush3.bf16.msra.mxu1 %v9480_v49  ;;  %v11899_v49 = vld [vmem:[#allocation2 + $0x170] sm:$0xff] }
 0x375   : > { %9485 = vmatprep.subr.bf16.mxu1 %v9484_v58 }
 0x377   : > { %8443 = vmatmul.mubr.f32.gmra.mrb[20].mxu1 %v11817_v43 }
 0x378   : > { %8445 = vmatprep.mubr.f32.mxu1 %v11820_v25  ;;  %9487 = vmatpush3.bf16.msra.mxu1 %v9484_v58  ;;  %v3678_v58 = vld [vmem:[#allocation2 + $0xa] sm:$0xff] }
 0x379   : > { %9489 = vmatprep.subr.bf16.mxu1 %v9488_v28 }
 0x37b   : > { %8446 = vmatmul.mubr.f32.gmra.mrb[22].mxu1 %v11823_v30 }
 0x37c   : > { %8448 = vmatprep.mubr.f32.mxu1 %v11826_v38  ;;  %9491 = vmatpush3.bf16.msra.mxu1 %v9488_v28  ;;  %v4021_v28 = vld [vmem:[#allocation3 + $0x1a8] sm:$0xff] }
 0x37d   : > { %9493 = vmatprep.subr.bf16.mxu1 %v9492_v29  ;;  %v9516_v24 = vpack.c.bf16 %v4021_v28, %v4020_v3  ;;  %v11926_v3 = vld [vmem:[#allocation2 + $0x7a] sm:$0xff] }
 0x37f   : > { %8449 = vmatmul.mubr.f32.gmra.mrb[24].mxu1 %v11829_v44 }
 0x380   : > { %8451 = vmatprep.mubr.f32.mxu1 %v11832_v54  ;;  %9495 = vmatpush3.bf16.msra.mxu1 %v9492_v29  ;;  %v11905_v29 = vld [vmem:[#allocation2 + $0x22] sm:$0xff] }
 0x381   : > { %9497 = vmatprep.subr.bf16.mxu1 %v9496_v39 }
 0x383   : > { %8452 = vmatmul.mubr.f32.gmra.mrb[26].mxu1 %v11835_v62 }
 0x384   : > { %8454 = vmatprep.mubr.f32.mxu1 %v11838_v7  ;;  %9499 = vmatpush3.bf16.msra.mxu1 %v9496_v39  ;;  %v11908_v39 = vld [vmem:[#allocation2 + $0x32] sm:$0xff] }
 0x385   : > { %9501 = vmatprep.subr.bf16.mxu1 %v9500_v57 }
 0x387   : > { %8455 = vmatmul.mubr.f32.gmra.mrb[28].mxu1 %v11845_v47 }
 0x388   : > { %8457 = vmatprep.mubr.f32.mxu1 %v11848_v26  ;;  %9503 = vmatpush3.bf16.msra.mxu1 %v9500_v57  ;;  %v4024_v57 = vld [vmem:[#allocation3 + $0x1c0] sm:$0xff] }
 0x389   : > { %9505 = vmatprep.subr.bf16.mxu1 %v9504_v31 }
 0x38b   : > { %8458 = vmatmul.mubr.f32.gmra.mrb[30].mxu1 %v11851_v40 }
 0x38c   : > { %8460 = vmatprep.mubr.f32.mxu1 %v11854_v41  ;;  %9507 = vmatpush3.bf16.msra.mxu1 %v9504_v31  ;;  %v9524_v31 = vpack.c.bf16 %v4025_v63, %v4024_v57  ;;  %v9536_v57 = vpack.c.bf16 %v4031_v37, %v4030_v32  ;;  %v11935_v63 = vld [vmem:[#allocation2 + $0x9a] sm:$0xff]  ;;  %v11947_v32 = vld [vmem:[#allocation2 + $0xca] sm:$0xff] }
 0x38d   : > { %9509 = vmatprep.subr.bf16.mxu1 %v9508_v12  ;;  %v11950_v37 = vld [vmem:[#allocation2 + $0xda] sm:$0xff] }
 0x38e   : > { %12576 = vst [vmem:[#allocation11_spill] sm:$0xff] %v11950_v37 }
 0x38f   : > { %8461 = vmatmul.mubr.f32.gmra.mrb[0].mxu1 %v11857_v27 }
 0x390   : > { %8463 = vmatprep.mubr.f32.mxu1 %v11860_v17 }
 0x393   : > { %8464 = vmatmul.mubr.f32.gmra.mrb[2].mxu1 %v11863_v21 }
 0x394   : > { %8466 = vmatprep.mubr.f32.mxu1 %v11866_v50 }
 0x397   : > { %8467 = vmatmul.mubr.f32.gmra.mrb[4].mxu1 %v11869_v51 }
 0x398   : > { %8469 = vmatprep.mubr.f32.mxu1 %v11872_v18 }
 0x39b   : > { %8470 = vmatmul.mubr.f32.gmra.mrb[6].mxu1 %v11875_v55 }
 0x39c   : > { %8472 = vmatprep.mubr.f32.mxu1 %v11878_v56 }
 0x39f   : > { %8473 = vmatmul.mubr.f32.gmra.mrb[8].mxu1 %v11881_v61 }
 0x3a0   : > { %8475 = vmatprep.mubr.f32.mxu1 %v11884_v22 }
 0x3a3   : > { %8476 = vmatmul.mubr.f32.gmra.mrb[10].mxu1 %v11887_v5 }
 0x3a4   : > { %8478 = vmatprep.mubr.f32.mxu1 %v11890_v14 }
 0x3a7   : > { %8479 = vmatmul.mubr.f32.gmra.mrb[12].mxu1 %v11893_v60 }
 0x3a8   : > { %8481 = vmatprep.mubr.f32.mxu1 %v11896_v33 }
 0x3ab   : > { %8482 = vmatmul.mubr.f32.gmra.mrb[14].mxu1 %v11899_v49 }
 0x3ac   : > { %8516 = vmatprep.mubr.f32.mxu1 %v3677_v34  ;;  %v11920_v34 = vld [vmem:[#allocation2 + $0x62] sm:$0xff] }
 0x3af   : > { %8517 = vmatmul.mubr.f32.vlgmr.msra.gmra.mrb[16].mxu1 %v3678_v58  ;;  %v4028_v58 = vld [vmem:[#allocation3 + $0x1e0] sm:$0xff] }
 0x3b0   : > { %8519 = vmatprep.mubr.f32.mxu1 %v11902_v16  ;;  %9511 = vmatpush3.bf16.msra.mxu1 %v9508_v12  ;;  %v4027_v12 = vld [vmem:[#allocation3 + $0x1d8] sm:$0xff] }
 0x3b1   : > { %9513 = vmatprep.subr.bf16.mxu1 %v9512_v15  ;;  %v9528_v10 = vpack.c.bf16 %v4027_v12, %v4026_v36  ;;  %v4322_v36 = vld [vmem:[#allocation3 + $0x200] sm:$0xff]  ;;  %v4323_v12 = vld [vmem:[#allocation3 + $0x208] sm:$0xff] }
 0x3b3   : > { %8520 = vmatmul.mubr.f32.gmra.mrb[18].mxu1 %v11905_v29 }
 0x3b4   : > { %8522 = vmatprep.mubr.f32.mxu1 %v11908_v39  ;;  %9515 = vmatpush3.bf16.msra.mxu1 %v9512_v15  ;;  %v4029_v15 = vld [vmem:[#allocation3 + $0x1e8] sm:$0xff] }
 0x3b5   : > { %9517 = vmatprep.subr.bf16.mxu1 %v9516_v24  ;;  %v9532_v28 = vpack.c.bf16 %v4029_v15, %v4028_v58  ;;  %v9540_v58 = vpack.c.bf16 %v4323_v12, %v4322_v36  ;;  %v11941_v15 = vld [vmem:[#allocation2 + $0xb2] sm:$0xff]  ;;  %v11959_v12 = vld [vmem:[#allocation2 + $0xfa] sm:$0xff] }
 0x3b6   : > { %v11956_v36 = vld [vmem:[#allocation2 + $0xf2] sm:$0xff]  ;;  %12579 = vst [vmem:[#allocation14_spill] sm:$0xff] %v11959_v12 }
 0x3b7   : > { %8523 = vmatmul.mubr.f32.gmra.mrb[20].mxu1 %v11911_v53  ;;  %12578 = vst [vmem:[#allocation13_spill] sm:$0xff] %v11956_v36 }
 0x3b8   : > { %8525 = vmatprep.mubr.f32.mxu1 %v11914_v23  ;;  %9519 = vmatpush3.bf16.msra.mxu1 %v9516_v24  ;;  %v11929_v24 = vld [vmem:[#allocation2 + $0x82] sm:$0xff] }
 0x3b9   : > { %9521 = vmatprep.subr.bf16.mxu1 %v9520_v48 }
 0x3bb   : > { %8526 = vmatmul.mubr.f32.gmra.mrb[22].mxu1 %v11917_v20 }
 0x3bc   : > { %8528 = vmatprep.mubr.f32.mxu1 %v11920_v34  ;;  %9523 = vmatpush3.bf16.msra.mxu1 %v9520_v48  ;;  %v11932_v48 = vld [vmem:[#allocation2 + $0x92] sm:$0xff] }
 0x3bd   : > { %9525 = vmatprep.subr.bf16.mxu1 %v9524_v31 }
 0x3bf   : > { %8529 = vmatmul.mubr.f32.gmra.mrb[24].mxu1 %v11923_v52 }
 0x3c0   : > { %8531 = vmatprep.mubr.f32.mxu1 %v11926_v3  ;;  %9527 = vmatpush3.bf16.msra.mxu1 %v9524_v31  ;;  %v11938_v31 = vld [vmem:[#allocation2 + $0xaa] sm:$0xff] }
 0x3c1   : > { %9529 = vmatprep.subr.bf16.mxu1 %v9528_v10 }
 0x3c3   : > { %8532 = vmatmul.mubr.f32.gmra.mrb[26].mxu1 %v11929_v24 }
 0x3c4   : > { %8534 = vmatprep.mubr.f32.mxu1 %v11932_v48  ;;  %9531 = vmatpush3.bf16.msra.mxu1 %v9528_v10  ;;  %v11944_v10 = vld [vmem:[#allocation2 + $0xc2] sm:$0xff] }
 0x3c5   : > { %9533 = vmatprep.subr.bf16.mxu1 %v9532_v28 }
 0x3c7   : > { %8535 = vmatmul.mubr.f32.gmra.mrb[28].mxu1 %v11935_v63 }
 0x3c8   : > { %8537 = vmatprep.mubr.f32.mxu1 %v11938_v31  ;;  %9535 = vmatpush3.bf16.msra.mxu1 %v9532_v28  ;;  %v11953_v28 = vld [vmem:[#allocation2 + $0xe2] sm:$0xff] }
 0x3c9   : > { %9537 = vmatprep.subr.bf16.mxu1 %v9536_v57  ;;  %12577 = vst [vmem:[#allocation12_spill] sm:$0xff] %v11953_v28 }
 0x3cb   : > { %8538 = vmatmul.mubr.f32.gmra.mrb[30].mxu1 %v11941_v15 }
 0x3cc   : > { %8540 = vmatprep.mubr.f32.mxu1 %v11944_v10  ;;  %9539 = vmatpush3.bf16.msra.mxu1 %v9536_v57  ;;  %v11962_v57 = vld [vmem:[#allocation2 + $0x10a] sm:$0xff] }
 0x3cd   : > { %9541 = vmatprep.subr.bf16.mxu1 %v9540_v58  ;;  %12580 = vst [vmem:[#allocation15_spill] sm:$0xff] %v11962_v57 }
 0x3cf   : > { %8541 = vmatmul.mubr.f32.gmra.mrb[0].mxu1 %v11947_v32 }
 0x3d0   : > { %8543 = vmatprep.mubr.f32.mxu1 %v11950_v37  ;;  %v4327_v37 = vld [vmem:[#allocation3 + $0x228] sm:$0xff] }
 0x3d3   : > { %8544 = vmatmul.mubr.f32.gmra.mrb[2].mxu1 %v11953_v28  ;;  %v4326_v28 = vld [vmem:[#allocation3 + $0x220] sm:$0xff] }
 0x3d4   : > { %8546 = vmatprep.mubr.f32.mxu1 %v11956_v36  ;;  %v4324_v36 = vld [vmem:[#allocation3 + $0x210] sm:$0xff] }
 0x3d7   : > { %8547 = vmatmul.mubr.f32.gmra.mrb[4].mxu1 %v11959_v12  ;;  %v11977_v12 = vld [vmem:[#allocation2 + $0x142] sm:$0xff] }
 0x3d8   : > { %8549 = vmatprep.mubr.f32.mxu1 %v11962_v57  ;;  %12585 = vst [vmem:[#allocation20_spill] sm:$0xff] %v11977_v12  ;;  %v11980_v57 = vld [vmem:[#allocation2 + $0x152] sm:$0xff] }
 0x3d9   : > { %12586 = vst [vmem:[#allocation21_spill] sm:$0xff] %v11980_v57 }
 0x3db   : > { %8550 = vmatmul.mubr.f32.gmra.mrb[6].mxu1 %v11965_v8  ;;  %v11983_v8 = vld [vmem:[#allocation2 + $0x15a] sm:$0xff] }
 0x3dc   : > { %8552 = vmatprep.mubr.f32.mxu1 %v11968_v42  ;;  %12587 = vst [vmem:[#allocation22_spill] sm:$0xff] %v11983_v8  ;;  %v11986_v42 = vld [vmem:[#allocation2 + $0x16a] sm:$0xff] }
 0x3dd   : > { %12588 = vst [vmem:[#allocation23_spill] sm:$0xff] %v11986_v42 }
 0x3df   : > { %8553 = vmatmul.mubr.f32.gmra.mrb[8].mxu1 %v11971_v13  ;;  %v11989_v13 = vld [vmem:[#allocation2 + $0x172] sm:$0xff] }
 0x3e0   : > { %8555 = vmatprep.mubr.f32.mxu1 %v11974_v9  ;;  %12589 = vst [vmem:[#allocation24_spill] sm:$0xff] %v11989_v13  ;;  %v4325_v9 = vld [vmem:[#allocation3 + $0x218] sm:$0xff] }
 0x3e3   : > { %8556 = vmatmul.mubr.f32.gmra.mrb[10].mxu1 %v11977_v12  ;;  %v9544_v12 = vpack.c.bf16 %v4325_v9, %v4324_v36  ;;  %v4331_v9 = vld [vmem:[#allocation3 + $0x248] sm:$0xff] }
 0x3e4   : > { %8558 = vmatprep.mubr.f32.mxu1 %v11980_v57  ;;  %v4328_v57 = vld [vmem:[#allocation3 + $0x230] sm:$0xff] }
 0x3e7   : > { %8559 = vmatmul.mubr.f32.gmra.mrb[12].mxu1 %v11983_v8  ;;  %v9548_v8 = vpack.c.bf16 %v4327_v37, %v4326_v28  ;;  %v4629_v37 = vld [vmem:[#allocation3 + $0x288] sm:$0xff] }
 0x3e8   : > { %8561 = vmatprep.mubr.f32.mxu1 %v11986_v42  ;;  %v4329_v42 = vld [vmem:[#allocation3 + $0x238] sm:$0xff] }
 0x3eb   : > { %8562 = vmatmul.mubr.f32.gmra.mrb[14].mxu1 %v11989_v13  ;;  %v9552_v13 = vpack.c.bf16 %v4329_v42, %v4328_v57  ;;  %v4335_v42 = vld [vmem:[#allocation3 + $0x268] sm:$0xff]  ;;  %v4632_v57 = vld [vmem:[#allocation3 + $0x2a0] sm:$0xff] }
 0x3ec   : > { %8596 = vmatprep.mubr.f32.mxu1 %v11808_v11  ;;  %v4330_v11 = vld [vmem:[#allocation3 + $0x240] sm:$0xff] }
 0x3ef   : > { %8597 = vmatmul.mubr.f32.vlgmr.msra.gmra.mrb[16].mxu1 %v11811_v59  ;;  %v9556_v59 = vpack.c.bf16 %v4331_v9, %v4330_v11  ;;  %v12059_v11 = vld [vmem:[#allocation2 + $0x39] sm:$0xff] }
 0x3f0   : > { %8599 = vmatprep.mubr.f32.mxu1 %v11814_v19  ;;  %9543 = vmatpush3.bf16.msra.mxu1 %v9540_v58  ;;  %v4332_v19 = vld [vmem:[#allocation3 + $0x250] sm:$0xff]  ;;  %v4333_v58 = vld [vmem:[#allocation3 + $0x258] sm:$0xff] }
 0x3f1   : > { %9545 = vmatprep.subr.bf16.mxu1 %v9544_v12  ;;  %v4634_v9 = vld [vmem:[#allocation3 + $0x2b0] sm:$0xff] }
 0x3f3   : > { %8600 = vmatmul.mubr.f32.gmra.mrb[18].mxu1 %v11817_v43  ;;  %v9560_v43 = vpack.c.bf16 %v4333_v58, %v4332_v19  ;;  %v12062_v19 = vld [vmem:[#allocation2 + $0x49] sm:$0xff] }
 0x3f4   : > { %8602 = vmatprep.mubr.f32.mxu1 %v11820_v25  ;;  %9547 = vmatpush3.bf16.msra.mxu1 %v9544_v12  ;;  %v4334_v25 = vld [vmem:[#allocation3 + $0x260] sm:$0xff] }
 0x3f5   : > { %9549 = vmatprep.subr.bf16.mxu1 %v9548_v8 }
 0x3f7   : > { %8603 = vmatmul.mubr.f32.gmra.mrb[20].mxu1 %v11823_v30  ;;  %v4336_v30 = vld [vmem:[#allocation3 + $0x270] sm:$0xff] }
 0x3f8   : > { %8605 = vmatprep.mubr.f32.mxu1 %v11826_v38  ;;  %9551 = vmatpush3.bf16.msra.mxu1 %v9548_v8  ;;  %v9564_v8 = vpack.c.bf16 %v4335_v42, %v4334_v25  ;;  %v4337_v38 = vld [vmem:[#allocation3 + $0x278] sm:$0xff]  ;;  %v4636_v25 = vld [vmem:[#allocation3 + $0x2c0] sm:$0xff]  ;;  %v4637_v42 = vld [vmem:[#allocation3 + $0x2c8] sm:$0xff] }
 0x3f9   : > { %9553 = vmatprep.subr.bf16.mxu1 %v9552_v13 }
 0x3fb   : > { %8606 = vmatmul.mubr.f32.gmra.mrb[22].mxu1 %v11829_v44  ;;  %v9568_v44 = vpack.c.bf16 %v4337_v38, %v4336_v30  ;;  %v9588_v30 = vpack.c.bf16 %v4637_v42, %v4636_v25  ;;  %v12071_v38 = vld [vmem:[#allocation2 + $0x69] sm:$0xff]  ;;  %v4936_v42 = vld [vmem:[#allocation3 + $0x308] sm:$0xff] }
 0x3fc   : > { %8608 = vmatprep.mubr.f32.mxu1 %v11832_v54  ;;  %9555 = vmatpush3.bf16.msra.mxu1 %v9552_v13  ;;  %v4628_v13 = vld [vmem:[#allocation3 + $0x280] sm:$0xff] }
 0x3fd   : > { %9557 = vmatprep.subr.bf16.mxu1 %v9556_v59  ;;  %v4935_v25 = vld [vmem:[#allocation3 + $0x300] sm:$0xff] }
 0x3ff   : > { %8609 = vmatmul.mubr.f32.gmra.mrb[24].mxu1 %v11835_v62  ;;  %v9572_v62 = vpack.c.bf16 %v4629_v37, %v4628_v13  ;;  %v4639_v13 = vld [vmem:[#allocation3 + $0x2d8] sm:$0xff]  ;;  %v12074_v37 = vld [vmem:[#allocation2 + $0x79] sm:$0xff] }
 0x400   : > { %8611 = vmatprep.mubr.f32.mxu1 %v11838_v7  ;;  %9559 = vmatpush3.bf16.msra.mxu1 %v9556_v59  ;;  %v4635_v59 = vld [vmem:[#allocation3 + $0x2b8] sm:$0xff] }
 0x401   : > { %9561 = vmatprep.subr.bf16.mxu1 %v9560_v43  ;;  %v9584_v58 = vpack.c.bf16 %v4635_v59, %v4634_v9  ;;  %v12086_v9 = vld [vmem:[#allocation2 + $0xa9] sm:$0xff] }
 0x403   : > { %8612 = vmatmul.mubr.f32.gmra.mrb[26].mxu1 %v11845_v47 }
 0x404   : > { %8614 = vmatprep.mubr.f32.mxu1 %v11848_v26  ;;  %9563 = vmatpush3.bf16.msra.mxu1 %v9560_v43  ;;  %v12065_v43 = vld [vmem:[#allocation2 + $0x51] sm:$0xff] }
 0x405   : > { %9565 = vmatprep.subr.bf16.mxu1 %v9564_v8 }
 0x406   : > { %v12005_v54 = vpop.f32.mrb[34].mxu0 }
 0x407   : > { %v12007_v28 = vpop.f32.mrb[35].mxu0  ;;  %8615 = vmatmul.mubr.f32.gmra.mrb[28].mxu1 %v11851_v40 }
 0x408   : > { %8617 = vmatprep.mubr.f32.mxu1 %v11854_v41  ;;  %9567 = vmatpush3.bf16.msra.mxu1 %v9564_v8  ;;  %v12068_v8 = vld [vmem:[#allocation2 + $0x61] sm:$0xff] }
 0x409   : > { %9569 = vmatprep.subr.bf16.mxu1 %v9568_v44 }
 0x40a   : > { %v12011_v7 = vpop.f32.mrb[36].mxu0 }
 0x40b   : > { %v12013_v47 = vpop.f32.mrb[37].mxu0  ;;  %8618 = vmatmul.mubr.f32.gmra.mrb[30].mxu1 %v11857_v27 }
 0x40c   : > { %8620 = vmatprep.mubr.f32.mxu1 %v11860_v17  ;;  %9571 = vmatpush3.bf16.msra.mxu1 %v9568_v44  ;;  %v4638_v44 = vld [vmem:[#allocation3 + $0x2d0] sm:$0xff] }
 0x40d   : > { %9573 = vmatprep.subr.bf16.mxu1 %v9572_v62 }
 0x40e   : > { %v12017_v26 = vpop.f32.mrb[38].mxu0 }
 0x40f   : > { %v12019_v36 = vpop.f32.mrb[39].mxu0  ;;  %8621 = vmatmul.mubr.f32.gmra.mrb[0].mxu1 %v11863_v21 }
 0x410   : > { %8623 = vmatprep.mubr.f32.mxu1 %v11866_v50 }
 0x412   : > { %v12023_v40 = vpop.f32.mrb[40].mxu0 }
 0x413   : > { %v12025_v41 = vpop.f32.mrb[41].mxu0  ;;  %8624 = vmatmul.mubr.f32.gmra.mrb[2].mxu1 %v11869_v51 }
 0x414   : > { %8626 = vmatprep.mubr.f32.mxu1 %v11872_v18  ;;  %v12050_v18 = vld [vmem:[#allocation2 + $0x180] sm:$0xff] }
 0x416   : > { %v12029_v27 = vpop.f32.mrb[42].mxu0 }
 0x417   : > { %v12031_v17 = vpop.f32.mrb[43].mxu0  ;;  %8627 = vmatmul.mubr.f32.gmra.mrb[4].mxu1 %v11875_v55  ;;  %v12053_v55 = vld [vmem:[#allocation2 + $0x188] sm:$0xff] }
 0x418   : > { %8629 = vmatprep.mubr.f32.mxu1 %v11878_v56  ;;  %v4630_v56 = vld [vmem:[#allocation3 + $0x290] sm:$0xff] }
 0x41a   : > { %v12035_v12 = vpop.f32.mrb[44].mxu0 }
 0x41b   : > { %12590 = vst [vmem:[#allocation25_spill] sm:$0xff] %v12035_v12  ;;  %v12037_v21 = vpop.f32.mrb[45].mxu0  ;;  %8630 = vmatmul.mubr.f32.gmra.mrb[6].mxu1 %v11881_v61  ;;  %v4631_v61 = vld [vmem:[#allocation3 + $0x298] sm:$0xff]  ;;  %v4940_v12 = vld [vmem:[#allocation3 + $0x328] sm:$0xff] }
 0x41c   : > { %12591 = vst [vmem:[#allocation26_spill] sm:$0xff] %v12037_v21  ;;  %8632 = vmatprep.mubr.f32.mxu1 %v11884_v22  ;;  %v4289_v22 = vld [vmem:[#allocation2 + $0x19] sm:$0xff]  ;;  %v12595_v21 = vmax.f32 %v11793_v4, 0.0  ;;  %v4943_v4 = vld [vmem:[#allocation3 + $0x340] sm:$0xff] }
 0x41e   : > { %v12041_v50 = vpop.f32.mrb[46].mxu0 }
 0x41f   : > { %12592 = vst [vmem:[#allocation27_spill] sm:$0xff] %v12041_v50  ;;  %v12043_v51 = vpop.f32.mrb[47].mxu0  ;;  %8633 = vmatmul.mubr.f32.gmra.mrb[8].mxu1 %v11887_v5  ;;  %v9576_v5 = vpack.c.bf16 %v4631_v61, %v4630_v56  ;;  %v12077_v56 = vld [vmem:[#allocation2 + $0x81] sm:$0xff]  ;;  %v4640_v61 = vld [vmem:[#allocation3 + $0x2e0] sm:$0xff] }
 0x420   : > { %12593 = vst [vmem:[#allocation28_spill] sm:$0xff] %v12043_v51  ;;  %8635 = vmatprep.mubr.f32.mxu1 %v11890_v14  ;;  %v4290_v14 = vld [vmem:[#allocation2 + $0x21] sm:$0xff] }
 0x421   : > { %v4937_v51 = vld [vmem:[#allocation3 + $0x310] sm:$0xff]  ;;  %v4938_v50 = vld [vmem:[#allocation3 + $0x318] sm:$0xff] }
 0x423   : > { %8636 = vmatmul.mubr.f32.gmra.mrb[10].mxu1 %v11893_v60  ;;  %v4633_v60 = vld [vmem:[#allocation3 + $0x2a8] sm:$0xff] }
 0x424   : > { %8638 = vmatprep.mubr.f32.mxu1 %v11896_v33  ;;  %v12056_v33 = vld [vmem:[#allocation2 + $0x31] sm:$0xff] }
 0x427   : > { %8639 = vmatmul.mubr.f32.gmra.mrb[12].mxu1 %v11899_v49  ;;  %v9580_v49 = vpack.c.bf16 %v4633_v60, %v4632_v57  ;;  %v12083_v57 = vld [vmem:[#allocation2 + $0x99] sm:$0xff] }
 0x428   : > { %8641 = vmatprep.mubr.f32.mxu1 %v12050_v18  ;;  %v4642_v60 = vld [vmem:[#allocation3 + $0x2f0] sm:$0xff] }
 0x42b   : > { %8642 = vmatmul.mubr.f32.gmra.mrb[14].mxu1 %v12053_v55 }
 0x42c   : > { %8676 = vmatprep.mubr.f32.mxu1 %v4289_v22  ;;  %v4641_v22 = vld [vmem:[#allocation3 + $0x2e8] sm:$0xff] }
 0x42f   : > { %8677 = vmatmul.mubr.f32.vlgmr.msra.gmra.mrb[16].mxu1 %v4290_v14  ;;  %v9596_v14 = vpack.c.bf16 %v4641_v22, %v4640_v61  ;;  %v12101_v61 = vld [vmem:[#allocation2 + $0xe1] sm:$0xff]  ;;  %v12104_v22 = vld [vmem:[#allocation2 + $0xf1] sm:$0xff] }
 0x430   : > { %8679 = vmatprep.mubr.f32.mxu1 %v12056_v33  ;;  %9575 = vmatpush3.bf16.msra.mxu1 %v9572_v62  ;;  %v9592_v62 = vpack.c.bf16 %v4639_v13, %v4638_v44  ;;  %v9604_v44 = vpack.c.bf16 %v4936_v42, %v4935_v25  ;;  %v12095_v13 = vld [vmem:[#allocation2 + $0xc9] sm:$0xff]  ;;  %v12594_v42 = vmax.f32 %v11797_v6, 0.0  ;;  %v4944_v6 = vld [vmem:[#allocation3 + $0x348] sm:$0xff] }
 0x431   : > { %9577 = vmatprep.subr.bf16.mxu1 %v9576_v5  ;;  %v12119_v25 = vld [vmem:[#allocation2 + $0x129] sm:$0xff] }
 0x433   : > { %8680 = vmatmul.mubr.f32.gmra.mrb[18].mxu1 %v12059_v11 }
 0x434   : > { %8682 = vmatprep.mubr.f32.mxu1 %v12062_v19  ;;  %9579 = vmatpush3.bf16.msra.mxu1 %v9576_v5  ;;  %v12080_v5 = vld [vmem:[#allocation2 + $0x91] sm:$0xff] }
 0x435   : > { %9581 = vmatprep.subr.bf16.mxu1 %v9580_v49 }
 0x437   : > { %8683 = vmatmul.mubr.f32.gmra.mrb[20].mxu1 %v12065_v43 }
 0x438   : > { %8685 = vmatprep.mubr.f32.mxu1 %v12068_v8  ;;  %9583 = vmatpush3.bf16.msra.mxu1 %v9580_v49  ;;  %v4643_v49 = vld [vmem:[#allocation3 + $0x2f8] sm:$0xff] }
 0x439   : > { %9585 = vmatprep.subr.bf16.mxu1 %v9584_v58  ;;  %v9600_v59 = vpack.c.bf16 %v4643_v49, %v4642_v60  ;;  %v12110_v60 = vld [vmem:[#allocation2 + $0x109] sm:$0xff]  ;;  %v12113_v49 = vld [vmem:[#allocation2 + $0x111] sm:$0xff] }
 0x43b   : > { %8686 = vmatmul.mubr.f32.gmra.mrb[22].mxu1 %v12071_v38 }
 0x43c   : > { %8688 = vmatprep.mubr.f32.mxu1 %v12074_v37  ;;  %9587 = vmatpush3.bf16.msra.mxu1 %v9584_v58  ;;  %v12089_v58 = vld [vmem:[#allocation2 + $0xb1] sm:$0xff] }
 0x43d   : > { %9589 = vmatprep.subr.bf16.mxu1 %v9588_v30 }
 0x43f   : > { %8689 = vmatmul.mubr.f32.gmra.mrb[24].mxu1 %v12077_v56 }
 0x440   : > { %8691 = vmatprep.mubr.f32.mxu1 %v12080_v5  ;;  %9591 = vmatpush3.bf16.msra.mxu1 %v9588_v30  ;;  %v12092_v30 = vld [vmem:[#allocation2 + $0xc1] sm:$0xff] }
 0x441   : > { %9593 = vmatprep.subr.bf16.mxu1 %v9592_v62 }
 0x443   : > { %8692 = vmatmul.mubr.f32.gmra.mrb[26].mxu1 %v12083_v57 }
 0x444   : > { %8694 = vmatprep.mubr.f32.mxu1 %v12086_v9  ;;  %9595 = vmatpush3.bf16.msra.mxu1 %v9592_v62  ;;  %v12098_v62 = vld [vmem:[#allocation2 + $0xd9] sm:$0xff] }
 0x445   : > { %9597 = vmatprep.subr.bf16.mxu1 %v9596_v14 }
 0x447   : > { %8695 = vmatmul.mubr.f32.gmra.mrb[28].mxu1 %v12089_v58 }
 0x448   : > { %8697 = vmatprep.mubr.f32.mxu1 %v12092_v30  ;;  %9599 = vmatpush3.bf16.msra.mxu1 %v9596_v14  ;;  %v12107_v14 = vld [vmem:[#allocation2 + $0xf9] sm:$0xff] }
 0x449   : > { %9601 = vmatprep.subr.bf16.mxu1 %v9600_v59 }
 0x44b   : > { %8698 = vmatmul.mubr.f32.gmra.mrb[30].mxu1 %v12095_v13 }
 0x44c   : > { %8700 = vmatprep.mubr.f32.mxu1 %v12098_v62  ;;  %9603 = vmatpush3.bf16.msra.mxu1 %v9600_v59  ;;  %v12116_v59 = vld [vmem:[#allocation2 + $0x121] sm:$0xff] }
 0x44d   : > { %9605 = vmatprep.subr.bf16.mxu1 %v9604_v44 }
 0x44f   : > { %8701 = vmatmul.mubr.f32.gmra.mrb[0].mxu1 %v12101_v61 }
 0x450   : > { %8703 = vmatprep.mubr.f32.mxu1 %v12104_v22 }
 0x453   : > { %8704 = vmatmul.mubr.f32.gmra.mrb[2].mxu1 %v12107_v14 }
 0x454   : > { %8706 = vmatprep.mubr.f32.mxu1 %v12110_v60 }
 0x457   : > { %8707 = vmatmul.mubr.f32.gmra.mrb[4].mxu1 %v12113_v49 }
 0x458   : > { %8709 = vmatprep.mubr.f32.mxu1 %v12116_v59 }
 0x45b   : > { %8710 = vmatmul.mubr.f32.gmra.mrb[6].mxu1 %v12119_v25 }
 0x45c   : > { %8712 = vmatprep.mubr.f32.mxu1 %v11769_v35  ;;  %v9608_v35 = vpack.c.bf16 %v4938_v50, %v4937_v51  ;;  %v5242_v50 = vld [vmem:[#allocation3 + $0x388] sm:$0xff] }
 0x45d   : > { %v12599_v51 = vld [vmem:[#allocation14_spill] sm:$0xff] }
 0x45f   : > { %8713 = vmatmul.mubr.f32.gmra.mrb[8].mxu1 %v11767_v0  ;;  %v4939_v0 = vld [vmem:[#allocation3 + $0x320] sm:$0xff] }
 0x460   : > { %8715 = vmatprep.mubr.f32.mxu1 %v11779_v46  ;;  %v4941_v46 = vld [vmem:[#allocation3 + $0x330] sm:$0xff] }
 0x463   : > { %8716 = vmatmul.mubr.f32.gmra.mrb[10].mxu1 %v11776_v45  ;;  %v9612_v45 = vpack.c.bf16 %v4940_v12, %v4939_v0  ;;  %v4948_v12 = vld [vmem:[#allocation3 + $0x368] sm:$0xff]  ;;  %v12606_v0 = vld [vmem:[#allocation21_spill] sm:$0xff] }
 0x464   : > { %8718 = vmatprep.mubr.f32.mxu1 %v11789_v2 }
 0x467   : > { %8719 = vmatmul.mubr.f32.gmra.mrb[12].mxu1 %v11786_v1  ;;  %v4942_v1 = vld [vmem:[#allocation3 + $0x338] sm:$0xff] }
 0x468   : > { %8721 = vmatprep.mubr.f32.mxu1 %v12594_v42  ;;  %v9616_v2 = vpack.c.bf16 %v4942_v1, %v4941_v46  ;;  %v12603_v42 = vld [vmem:[#allocation18_spill] sm:$0xff]  ;;  %v12608_v46 = vld [vmem:[#allocation23_spill] sm:$0xff]  ;;  %v12609_v1 = vld [vmem:[#allocation24_spill] sm:$0xff] }
 0x46b   : > { %8722 = vmatmul.mubr.f32.gmra.mrb[14].mxu1 %v12595_v21  ;;  %v4950_v21 = vld [vmem:[#allocation3 + $0x378] sm:$0xff] }
 0x46c   : > { %8756 = vmatprep.mubr.f32.mxu1 %v11902_v16  ;;  %v9620_v16 = vpack.c.bf16 %v4944_v6, %v4943_v4  ;;  %v12165_v4 = vld [vmem:[#allocation2 + $0x18a] sm:$0xff]  ;;  %v5243_v6 = vld [vmem:[#allocation3 + $0x390] sm:$0xff] }
 0x46f   : > { %8757 = vmatmul.mubr.f32.vlgmr.msra.gmra.mrb[16].mxu1 %v11905_v29  ;;  %v4945_v29 = vld [vmem:[#allocation3 + $0x350] sm:$0xff] }
 0x470   : > { %8759 = vmatprep.mubr.f32.mxu1 %v11908_v39  ;;  %9607 = vmatpush3.bf16.msra.mxu1 %v9604_v44  ;;  %v4946_v39 = vld [vmem:[#allocation3 + $0x358] sm:$0xff]  ;;  %v12600_v44 = vld [vmem:[#allocation15_spill] sm:$0xff] }
 0x471   : > { %9609 = vmatprep.subr.bf16.mxu1 %v9608_v35 }
 0x473   : > { %8760 = vmatmul.mubr.f32.gmra.mrb[18].mxu1 %v11911_v53  ;;  %v9624_v53 = vpack.c.bf16 %v4946_v39, %v4945_v29  ;;  %v4902_v29 = vld [vmem:[#allocation2 + $0x30] sm:$0xff] }
 0x474   : > { %8762 = vmatprep.mubr.f32.mxu1 %v11914_v23  ;;  %9611 = vmatpush3.bf16.msra.mxu1 %v9608_v35  ;;  %v4947_v23 = vld [vmem:[#allocation3 + $0x360] sm:$0xff]  ;;  %v12604_v35 = vld [vmem:[#allocation19_spill] sm:$0xff] }
 0x475   : > { %9613 = vmatprep.subr.bf16.mxu1 %v9612_v45 }
 0x477   : > { %8763 = vmatmul.mubr.f32.gmra.mrb[20].mxu1 %v11917_v20  ;;  %v9628_v20 = vpack.c.bf16 %v4948_v12, %v4947_v23  ;;  %v5245_v23 = vld [vmem:[#allocation3 + $0x3a0] sm:$0xff]  ;;  %v5246_v12 = vld [vmem:[#allocation3 + $0x3a8] sm:$0xff] }
 0x478   : > { %8765 = vmatprep.mubr.f32.mxu1 %v11920_v34  ;;  %9615 = vmatpush3.bf16.msra.mxu1 %v9612_v45  ;;  %v4949_v34 = vld [vmem:[#allocation3 + $0x370] sm:$0xff]  ;;  %v12607_v45 = vld [vmem:[#allocation22_spill] sm:$0xff] }
 0x479   : > { %9617 = vmatprep.subr.bf16.mxu1 %v9616_v2 }
 0x47b   : > { %8766 = vmatmul.mubr.f32.gmra.mrb[22].mxu1 %v11923_v52  ;;  %v9632_v52 = vpack.c.bf16 %v4950_v21, %v4949_v34  ;;  %v9644_v34 = vpack.c.bf16 %v5246_v12, %v5245_v23  ;;  %v4905_v21 = vld [vmem:[#allocation2 + $0x50] sm:$0xff]  ;;  %v4915_v12 = vld [vmem:[#allocation2 + $0xc8] sm:$0xff] }
 0x47c   : > { %8768 = vmatprep.mubr.f32.mxu1 %v11926_v3  ;;  %9619 = vmatpush3.bf16.msra.mxu1 %v9616_v2  ;;  %v5241_v3 = vld [vmem:[#allocation3 + $0x380] sm:$0xff]  ;;  %v12162_v2 = vld [vmem:[#allocation2 + $0x182] sm:$0xff] }
 0x47d   : > { %9621 = vmatprep.subr.bf16.mxu1 %v9620_v16 }
 0x47f   : > { %8769 = vmatmul.mubr.f32.gmra.mrb[24].mxu1 %v11929_v24  ;;  %v9636_v24 = vpack.c.bf16 %v5242_v50, %v5241_v3  ;;  %v5248_v3 = vld [vmem:[#allocation3 + $0x3b8] sm:$0xff]  ;;  %v4906_v50 = vld [vmem:[#allocation2 + $0x60] sm:$0xff] }
 0x480   : > { %8771 = vmatprep.mubr.f32.mxu1 %v11932_v48  ;;  %9623 = vmatpush3.bf16.msra.mxu1 %v9620_v16  ;;  %v12596_v48 = vld [vmem:[#allocation11_spill] sm:$0xff]  ;;  %v5244_v16 = vld [vmem:[#allocation3 + $0x398] sm:$0xff] }
 0x481   : > { %9625 = vmatprep.subr.bf16.mxu1 %v9624_v53  ;;  %v9640_v39 = vpack.c.bf16 %v5244_v16, %v5243_v6  ;;  %v4913_v16 = vld [vmem:[#allocation2 + $0xb0] sm:$0xff] }
 0x483   : > { %8772 = vmatmul.mubr.f32.gmra.mrb[26].mxu1 %v11935_v63  ;;  %v12597_v63 = vld [vmem:[#allocation12_spill] sm:$0xff] }
 0x484   : > { %8774 = vmatprep.mubr.f32.mxu1 %v11938_v31  ;;  %9627 = vmatpush3.bf16.msra.mxu1 %v9624_v53  ;;  %v12598_v31 = vld [vmem:[#allocation13_spill] sm:$0xff]  ;;  %v4903_v53 = vld [vmem:[#allocation2 + $0x38] sm:$0xff] }
 0x485   : > { %9629 = vmatprep.subr.bf16.mxu1 %v9628_v20 }
 0x487   : > { %8775 = vmatmul.mubr.f32.gmra.mrb[28].mxu1 %v11941_v15  ;;  %v12601_v15 = vld [vmem:[#allocation16_spill] sm:$0xff] }
 0x488   : > { %8777 = vmatprep.mubr.f32.mxu1 %v11944_v10  ;;  %9631 = vmatpush3.bf16.msra.mxu1 %v9628_v20  ;;  %v12602_v10 = vld [vmem:[#allocation17_spill] sm:$0xff]  ;;  %v4904_v20 = vld [vmem:[#allocation2 + $0x48] sm:$0xff] }
 0x489   : > { %9633 = vmatprep.subr.bf16.mxu1 %v9632_v52 }
 0x48b   : > { %8778 = vmatmul.mubr.f32.gmra.mrb[30].mxu1 %v11947_v32  ;;  %v12605_v32 = vld [vmem:[#allocation20_spill] sm:$0xff] }
 0x48c   : > { %8780 = vmatprep.mubr.f32.mxu1 %v12596_v48  ;;  %9635 = vmatpush3.bf16.msra.mxu1 %v9632_v52  ;;  %v5247_v52 = vld [vmem:[#allocation3 + $0x3b0] sm:$0xff] }
 0x48d   : > { %9637 = vmatprep.subr.bf16.mxu1 %v9636_v24  ;;  %v9648_v48 = vpack.c.bf16 %v5248_v3, %v5247_v52  ;;  %v4917_v3 = vld [vmem:[#allocation2 + $0xe0] sm:$0xff] }
 0x48f   : > { %8781 = vmatmul.mubr.f32.gmra.mrb[0].mxu1 %v12597_v63  ;;  %v4907_v63 = vld [vmem:[#allocation2 + $0x68] sm:$0xff] }
 0x490   : > { %8783 = vmatprep.mubr.f32.mxu1 %v12598_v31  ;;  %v5249_v31 = vld [vmem:[#allocation3 + $0x3c0] sm:$0xff] }
 0x493   : > { %8784 = vmatmul.mubr.f32.gmra.mrb[2].mxu1 %v12599_v51  ;;  %v5250_v51 = vld [vmem:[#allocation3 + $0x3c8] sm:$0xff] }
 0x494   : > { %8786 = vmatprep.mubr.f32.mxu1 %v12600_v44  ;;  %v4908_v44 = vld [vmem:[#allocation2 + $0x78] sm:$0xff] }
 0x497   : > { %8787 = vmatmul.mubr.f32.gmra.mrb[4].mxu1 %v12601_v15  ;;  %v4909_v15 = vld [vmem:[#allocation2 + $0x80] sm:$0xff] }
 0x498   : > { %8789 = vmatprep.mubr.f32.mxu1 %v12602_v10  ;;  %v5251_v10 = vld [vmem:[#allocation3 + $0x3d0] sm:$0xff] }
 0x49b   : > { %8790 = vmatmul.mubr.f32.gmra.mrb[6].mxu1 %v12603_v42  ;;  %v5252_v42 = vld [vmem:[#allocation3 + $0x3d8] sm:$0xff] }
 0x49c   : > { %8792 = vmatprep.mubr.f32.mxu1 %v12604_v35  ;;  %v4910_v35 = vld [vmem:[#allocation2 + $0x90] sm:$0xff] }
 0x49f   : > { %8793 = vmatmul.mubr.f32.gmra.mrb[8].mxu1 %v12605_v32  ;;  %v9656_v32 = vpack.c.bf16 %v5252_v42, %v5251_v10  ;;  %v4926_v10 = vld [vmem:[#allocation2 + $0x150] sm:$0xff]  ;;  %v4927_v42 = vld [vmem:[#allocation2 + $0x158] sm:$0xff] }
 0x4a0   : > { %8795 = vmatprep.mubr.f32.mxu1 %v12606_v0  ;;  %v4911_v0 = vld [vmem:[#allocation2 + $0x98] sm:$0xff] }
 0x4a3   : > { %8796 = vmatmul.mubr.f32.gmra.mrb[10].mxu1 %v12607_v45  ;;  %v5253_v45 = vld [vmem:[#allocation3 + $0x3e0] sm:$0xff] }
 0x4a4   : > { %8798 = vmatprep.mubr.f32.mxu1 %v12608_v46  ;;  %v5254_v46 = vld [vmem:[#allocation3 + $0x3e8] sm:$0xff] }
 0x4a5   : > { %v9660_v6 = vpack.c.bf16 %v5254_v46, %v5253_v45  ;;  %v5549_v45 = vld [vmem:[#allocation3 + $0x410] sm:$0xff]  ;;  %v5550_v46 = vld [vmem:[#allocation3 + $0x418] sm:$0xff] }
 0x4a7   : > { %8799 = vmatmul.mubr.f32.gmra.mrb[12].mxu1 %v12609_v1  ;;  %v4912_v1 = vld [vmem:[#allocation2 + $0xa8] sm:$0xff] }
 0x4a8   : > { %8801 = vmatprep.mubr.f32.mxu1 %v12162_v2 }
 0x4ab   : > { %8802 = vmatmul.mubr.f32.gmra.mrb[14].mxu1 %v12165_v4 }
 0x4ac   : > { %8836 = vmatprep.mubr.f32.mxu1 %v4902_v29  ;;  %v5255_v29 = vld [vmem:[#allocation3 + $0x3f0] sm:$0xff] }
 0x4af   : > { %8837 = vmatmul.mubr.f32.vlgmr.msra.gmra.mrb[16].mxu1 %v4903_v53  ;;  %v4914_v53 = vld [vmem:[#allocation2 + $0xc0] sm:$0xff] }
 0x4b0   : > { %8839 = vmatprep.mubr.f32.mxu1 %v4904_v20  ;;  %9639 = vmatpush3.bf16.msra.mxu1 %v9636_v24  ;;  %v9652_v24 = vpack.c.bf16 %v5250_v51, %v5249_v31  ;;  %v5547_v20 = vld [vmem:[#allocation3 + $0x400] sm:$0xff]  ;;  %v4922_v51 = vld [vmem:[#allocation2 + $0x120] sm:$0xff] }
 0x4b1   : > { %9641 = vmatprep.subr.bf16.mxu1 %v9640_v39  ;;  %v4921_v31 = vld [vmem:[#allocation2 + $0x110] sm:$0xff] }
 0x4b3   : > { %8840 = vmatmul.mubr.f32.gmra.mrb[18].mxu1 %v4905_v21  ;;  %v4916_v21 = vld [vmem:[#allocation2 + $0xd8] sm:$0xff] }
 0x4b4   : > { %8842 = vmatprep.mubr.f32.mxu1 %v4906_v50  ;;  %9643 = vmatpush3.bf16.msra.mxu1 %v9640_v39  ;;  %v5256_v39 = vld [vmem:[#allocation3 + $0x3f8] sm:$0xff]  ;;  %v4918_v50 = vld [vmem:[#allocation2 + $0xf0] sm:$0xff] }
 0x4b5   : > { %9645 = vmatprep.subr.bf16.mxu1 %v9644_v34  ;;  %v9664_v23 = vpack.c.bf16 %v5256_v39, %v5255_v29  ;;  %v5552_v29 = vld [vmem:[#allocation3 + $0x428] sm:$0xff]  ;;  %v5553_v39 = vld [vmem:[#allocation3 + $0x430] sm:$0xff] }
 0x4b7   : > { %8843 = vmatmul.mubr.f32.gmra.mrb[20].mxu1 %v4907_v63  ;;  %v4920_v63 = vld [vmem:[#allocation2 + $0x108] sm:$0xff] }
 0x4b8   : > { %8845 = vmatprep.mubr.f32.mxu1 %v4908_v44  ;;  %9647 = vmatpush3.bf16.msra.mxu1 %v9644_v34  ;;  %v5548_v34 = vld [vmem:[#allocation3 + $0x408] sm:$0xff]  ;;  %v4923_v44 = vld [vmem:[#allocation2 + $0x128] sm:$0xff] }
 0x4b9   : > { %9649 = vmatprep.subr.bf16.mxu1 %v9648_v48  ;;  %v9668_v52 = vpack.c.bf16 %v5548_v34, %v5547_v20  ;;  %v5560_v20 = vld [vmem:[#allocation3 + $0x468] sm:$0xff]  ;;  %v5562_v34 = vld [vmem:[#allocation3 + $0x478] sm:$0xff] }
 0x4bb   : > { %8846 = vmatmul.mubr.f32.gmra.mrb[22].mxu1 %v4909_v15  ;;  %v4925_v15 = vld [vmem:[#allocation2 + $0x140] sm:$0xff] }
 0x4bc   : > { %8848 = vmatprep.mubr.f32.mxu1 %v4910_v35  ;;  %9651 = vmatpush3.bf16.msra.mxu1 %v9648_v48  ;;  %v4919_v48 = vld [vmem:[#allocation2 + $0xf8] sm:$0xff]  ;;  %v4928_v35 = vld [vmem:[#allocation2 + $0x168] sm:$0xff] }
 0x4bd   : > { %9653 = vmatprep.subr.bf16.mxu1 %v9652_v24 }
 0x4bf   : > { %8849 = vmatmul.mubr.f32.gmra.mrb[24].mxu1 %v4911_v0  ;;  %v4932_v0 = vld [vmem:[#allocation2 + $0x198] sm:$0xff] }
 0x4c0   : > { %8851 = vmatprep.mubr.f32.mxu1 %v4912_v1  ;;  %9655 = vmatpush3.bf16.msra.mxu1 %v9652_v24  ;;  %v4924_v24 = vld [vmem:[#allocation2 + $0x138] sm:$0xff]  ;;  %v10412_v1 = vld [vmem:[#allocation2 + $0x8] sm:$0xff] }
 0x4c1   : > { %9657 = vmatprep.subr.bf16.mxu1 %v9656_v32 }
 0x4c3   : > { %8852 = vmatmul.mubr.f32.gmra.mrb[26].mxu1 %v4913_v16  ;;  %v5551_v16 = vld [vmem:[#allocation3 + $0x420] sm:$0xff] }
 0x4c4   : > { %8854 = vmatprep.mubr.f32.mxu1 %v4914_v53  ;;  %9659 = vmatpush3.bf16.msra.mxu1 %v9656_v32  ;;  %v4929_v32 = vld [vmem:[#allocation2 + $0x170] sm:$0xff]  ;;  %v5554_v53 = vld [vmem:[#allocation3 + $0x438] sm:$0xff] }
 0x4c5   : > { %9661 = vmatprep.subr.bf16.mxu1 %v9660_v6 }
 0x4c7   : > { %8855 = vmatmul.mubr.f32.gmra.mrb[28].mxu1 %v4915_v12  ;;  %v5558_v12 = vld [vmem:[#allocation3 + $0x458] sm:$0xff] }
 0x4c8   : > { %8857 = vmatprep.mubr.f32.mxu1 %v4916_v21  ;;  %9663 = vmatpush3.bf16.msra.mxu1 %v9660_v6  ;;  %v9672_v6 = vpack.c.bf16 %v5550_v46, %v5549_v45  ;;  %v5894_v21 = vld [vmem:[%s12446_s5 + $0x18] sm:$0xff] }
 0x4c9   : > { %9665 = vmatprep.subr.bf16.mxu1 %v9664_v23  ;;  %v5520_v45 = vld [vmem:[#allocation2 + $0x7a] sm:$0xff] }
 0x4cb   : > { %8858 = vmatmul.mubr.f32.gmra.mrb[30].mxu1 %v4917_v3 }
 0x4cc   : > { %8860 = vmatprep.mubr.f32.mxu1 %v4918_v50  ;;  %9667 = vmatpush3.bf16.msra.mxu1 %v9664_v23  ;;  %v5556_v23 = vld [vmem:[#allocation3 + $0x448] sm:$0xff] }
 0x4cd   : > { %9669 = vmatprep.subr.bf16.mxu1 %v9668_v52  ;;  %v5515_v50 = vld [vmem:[#allocation2 + $0x3a] sm:$0xff] }
 0x4cf   : > { %8861 = vmatmul.mubr.f32.gmra.mrb[0].mxu1 %v4919_v48  ;;  %v5895_v48 = vld [vmem:[%s12446_s5 + $0x20] sm:$0xff] }
 0x4d0   : > { %8863 = vmatprep.mubr.f32.mxu1 %v4920_v63  ;;  %v5896_v63 = vld [vmem:[%s12446_s5 + $0x28] sm:$0xff] }
 0x4d3   : > { %8864 = vmatmul.mubr.f32.gmra.mrb[2].mxu1 %v4921_v31  ;;  %v5516_v31 = vld [vmem:[#allocation2 + $0x4a] sm:$0xff] }
 0x4d4   : > { %8866 = vmatprep.mubr.f32.mxu1 %v4922_v51  ;;  %v9708_v51 = vpack.c.bf16 %v5896_v63, %v5895_v48  ;;  %v6661_v48 = vld [vmem:[%s10662_s16 + $0x79] sm:$0xff]  ;;  %v6662_v63 = vld [vmem:[%s10662_s16 + $0x81] sm:$0xff] }
 0x4d7   : > { %8867 = vmatmul.mubr.f32.gmra.mrb[4].mxu1 %v4923_v44  ;;  %v5517_v44 = vld [vmem:[#allocation2 + $0x52] sm:$0xff] }
 0x4d8   : > { %8869 = vmatprep.mubr.f32.mxu1 %v4924_v24  ;;  %v5897_v24 = vld [vmem:[%s12446_s5 + $0x30] sm:$0xff] }
 0x4db   : > { %8870 = vmatmul.mubr.f32.gmra.mrb[6].mxu1 %v4925_v15  ;;  %v5898_v15 = vld [vmem:[%s12446_s5 + $0x38] sm:$0xff] }
 0x4dc   : > { %8872 = vmatprep.mubr.f32.mxu1 %v4926_v10  ;;  %v5518_v10 = vld [vmem:[#allocation2 + $0x62] sm:$0xff] }
 0x4df   : > { %8873 = vmatmul.mubr.f32.gmra.mrb[8].mxu1 %v4927_v42  ;;  %v9712_v42 = vpack.c.bf16 %v5898_v15, %v5897_v24  ;;  %v6666_v24 = vld [vmem:[%s10662_s16 + $0xb1] sm:$0xff]  ;;  %v6667_v15 = vld [vmem:[%s10662_s16 + $0xc1] sm:$0xff] }
 0x4e0   : > { %8875 = vmatprep.mubr.f32.mxu1 %v4928_v35  ;;  %v5519_v35 = vld [vmem:[#allocation2 + $0x6a] sm:$0xff] }
 0x4e3   : > { %8876 = vmatmul.mubr.f32.gmra.mrb[10].mxu1 %v4929_v32  ;;  %v5899_v32 = vld [vmem:[%s12446_s5 + $0x40] sm:$0xff] }
 0x4e4   : > { %8878 = vmatprep.mubr.f32.mxu1 %v12050_v18  ;;  %v9676_v18 = vpack.c.bf16 %v5552_v29, %v5551_v16  ;;  %v5902_v16 = vld [vmem:[%s12446_s5 + $0x58] sm:$0xff] }
 0x4e5   : > { %v5522_v29 = vld [vmem:[#allocation2 + $0x92] sm:$0xff] }
 0x4e7   : > { %8879 = vmatmul.mubr.f32.gmra.mrb[12].mxu1 %v12053_v55  ;;  %v9680_v55 = vpack.c.bf16 %v5554_v53, %v5553_v39  ;;  %v5523_v39 = vld [vmem:[#allocation2 + $0x9a] sm:$0xff] }
 0x4e8   : > { %8881 = vmatprep.mubr.f32.mxu1 %v4932_v0  ;;  %v5900_v0 = vld [vmem:[%s12446_s5 + $0x48] sm:$0xff]  ;;  %v5903_v53 = vld [vmem:[%s12446_s5 + $0x60] sm:$0xff] }
 0x4e9   : > { %v9716_v46 = vpack.c.bf16 %v5900_v0, %v5899_v32  ;;  %v6671_v32 = vld [vmem:[%s10662_s16 + $0xf1] sm:$0xff]  ;;  %v6672_v0 = vld [vmem:[%s10662_s16 + $0xf9] sm:$0xff] }
 0x4eb   : > { %8882 = vmatmul.mubr.f32.gmra.mrb[14].mxu1 %v10412_v1  ;;  %v5521_v1 = vld [vmem:[#allocation2 + $0x82] sm:$0xff] }
 0x4ec   : > { %8916 = vmatprep.mubr.f32.mxu1 %v12056_v33  ;;  %v5555_v33 = vld [vmem:[#allocation3 + $0x440] sm:$0xff] }
 0x4ef   : > { %8917 = vmatmul.mubr.f32.vlgmr.msra.gmra.mrb[16].mxu1 %v12059_v11  ;;  %v9684_v11 = vpack.c.bf16 %v5556_v23, %v5555_v33  ;;  %v5524_v33 = vld [vmem:[#allocation2 + $0xaa] sm:$0xff] }
 0x4f0   : > { %8919 = vmatprep.mubr.f32.mxu1 %v12062_v19  ;;  %9671 = vmatpush3.bf16.msra.mxu1 %v9668_v52  ;;  %v5557_v19 = vld [vmem:[#allocation3 + $0x450] sm:$0xff]  ;;  %v5514_v52 = vld [vmem:[#allocation2 + $0x32] sm:$0xff] }
 0x4f1   : > { %9673 = vmatprep.subr.bf16.mxu1 %v9672_v6 }
 0x4f3   : > { %8920 = vmatmul.mubr.f32.gmra.mrb[18].mxu1 %v12065_v43  ;;  %v9688_v43 = vpack.c.bf16 %v5558_v12, %v5557_v19  ;;  %v5905_v19 = vld [vmem:[%s12446_s5 + $0x70] sm:$0xff]  ;;  %v5906_v12 = vld [vmem:[%s12446_s5 + $0x78] sm:$0xff] }
 0x4f4   : > { %8922 = vmatprep.mubr.f32.mxu1 %v12068_v8  ;;  %9675 = vmatpush3.bf16.msra.mxu1 %v9672_v6  ;;  %v5559_v8 = vld [vmem:[#allocation3 + $0x460] sm:$0xff] }
 0x4f5   : > { %9677 = vmatprep.subr.bf16.mxu1 %v9676_v18  ;;  %v5901_v6 = vld [vmem:[%s12446_s5 + $0x50] sm:$0xff] }
 0x4f7   : > { %8923 = vmatmul.mubr.f32.gmra.mrb[20].mxu1 %v12071_v38  ;;  %v9692_v38 = vpack.c.bf16 %v5560_v20, %v5559_v8  ;;  %v9728_v8 = vpack.c.bf16 %v5906_v12, %v5905_v19  ;;  %v5527_v20 = vld [vmem:[#allocation2 + $0xca] sm:$0xff] }
 0x4f8   : > { %8925 = vmatprep.mubr.f32.mxu1 %v12074_v37  ;;  %9679 = vmatpush3.bf16.msra.mxu1 %v9676_v18  ;;  %v5561_v37 = vld [vmem:[#allocation3 + $0x470] sm:$0xff]  ;;  %v9720_v18 = vpack.c.bf16 %v5902_v16, %v5901_v6  ;;  %v6676_v6 = vld [vmem:[%s10662_s16 + $0x129] sm:$0xff] }
 0x4f9   : > { %9681 = vmatprep.subr.bf16.mxu1 %v9680_v55  ;;  %v6677_v16 = vld [vmem:[%s10662_s16 + $0x139] sm:$0xff]  ;;  %v12610_v19 = vld [vmem:[#allocation9_spill] sm:$0xff] }
 0x4fb   : > { %8926 = vmatmul.mubr.f32.gmra.mrb[22].mxu1 %v12077_v56  ;;  %v9696_v56 = vpack.c.bf16 %v5562_v34, %v5561_v37  ;;  %v5529_v37 = vld [vmem:[#allocation2 + $0xe2] sm:$0xff]  ;;  %v5530_v34 = vld [vmem:[#allocation2 + $0xf2] sm:$0xff] }
 0x4fc   : > { %8928 = vmatprep.mubr.f32.mxu1 %v12080_v5  ;;  %9683 = vmatpush3.bf16.msra.mxu1 %v9680_v55  ;;  %v5891_v5 = vld [vmem:[%s12446_s5] sm:$0xff]  ;;  %v5904_v55 = vld [vmem:[%s12446_s5 + $0x68] sm:$0xff] }
 0x4fd   : > { %9685 = vmatprep.subr.bf16.mxu1 %v9684_v11  ;;  %v9724_v23 = vpack.c.bf16 %v5904_v55, %v5903_v53  ;;  %v6681_v53 = vld [vmem:[%s10662_s16 + $0x169] sm:$0xff]  ;;  %v6682_v55 = vld [vmem:[%s10662_s16 + $0x171] sm:$0xff] }
 0x4ff   : > { %8929 = vmatmul.mubr.f32.gmra.mrb[24].mxu1 %v12083_v57  ;;  %v5892_v57 = vld [vmem:[%s12446_s5 + $0x8] sm:$0xff] }
 0x500   : > { %8931 = vmatprep.mubr.f32.mxu1 %v12086_v9  ;;  %9687 = vmatpush3.bf16.msra.mxu1 %v9684_v11  ;;  %v9700_v9 = vpack.c.bf16 %v5892_v57, %v5891_v5  ;;  %v5525_v11 = vld [vmem:[#allocation2 + $0xb2] sm:$0xff]  ;;  %v5532_v5 = vld [vmem:[#allocation2 + $0x10a] sm:$0xff] }
 0x501   : > { %9689 = vmatprep.subr.bf16.mxu1 %v9688_v43  ;;  %v5533_v57 = vld [vmem:[#allocation2 + $0x112] sm:$0xff] }
 0x503   : > { %8932 = vmatmul.mubr.f32.gmra.mrb[26].mxu1 %v12089_v58  ;;  %v5230_v58 = vld [vmem:[#allocation2 + $0x139] sm:$0xff] }
 0x504   : > { %8934 = vmatprep.mubr.f32.mxu1 %v12092_v30  ;;  %9691 = vmatpush3.bf16.msra.mxu1 %v9688_v43  ;;  %v5231_v30 = vld [vmem:[#allocation2 + $0x141] sm:$0xff] }
 0x505   : > { %9693 = vmatprep.subr.bf16.mxu1 %v9692_v38  ;;  %v5526_v43 = vld [vmem:[#allocation2 + $0xc2] sm:$0xff] }
 0x507   : > { %8935 = vmatmul.mubr.f32.gmra.mrb[28].mxu1 %v12095_v13  ;;  %v5232_v13 = vld [vmem:[#allocation2 + $0x151] sm:$0xff] }
 0x508   : > { %8937 = vmatprep.mubr.f32.mxu1 %v12098_v62  ;;  %9695 = vmatpush3.bf16.msra.mxu1 %v9692_v38  ;;  %v5233_v62 = vld [vmem:[#allocation2 + $0x159] sm:$0xff] }
 0x509   : > { %9697 = vmatprep.subr.bf16.mxu1 %v9696_v56  ;;  %v5528_v38 = vld [vmem:[#allocation2 + $0xda] sm:$0xff] }
 0x50b   : > { %8938 = vmatmul.mubr.f32.gmra.mrb[30].mxu1 %v12101_v61  ;;  %v5234_v61 = vld [vmem:[#allocation2 + $0x169] sm:$0xff] }
 0x50c   : > { %8940 = vmatprep.mubr.f32.mxu1 %v12104_v22  ;;  %9699 = vmatpush3.bf16.msra.mxu1 %v9696_v56  ;;  %v5235_v22 = vld [vmem:[#allocation2 + $0x171] sm:$0xff]  ;;  %v5531_v56 = vld [vmem:[#allocation2 + $0xfa] sm:$0xff] }
 0x50d   : > { %9701 = vmatprep.subr.bf16.mxu1 %v9700_v9 }
 0x50f   : > { %8941 = vmatmul.mubr.f32.gmra.mrb[0].mxu1 %v12107_v14  ;;  %v5236_v14 = vld [vmem:[#allocation2 + $0x181] sm:$0xff] }
 0x510   : > { %8943 = vmatprep.mubr.f32.mxu1 %v12110_v60  ;;  %v5238_v60 = vld [vmem:[#allocation2 + $0x199] sm:$0xff] }
 0x513   : > { %8944 = vmatmul.mubr.f32.gmra.mrb[2].mxu1 %v12113_v49  ;;  %v5237_v49 = vld [vmem:[#allocation2 + $0x189] sm:$0xff] }
 0x514   : > { %8946 = vmatprep.mubr.f32.mxu1 %v12116_v59  ;;  %v5239_v59 = vld [vmem:[#allocation2 + $0x1a1] sm:$0xff] }
 0x517   : > { %8947 = vmatmul.mubr.f32.gmra.mrb[4].mxu1 %v12119_v25  ;;  %v5893_v25 = vld [vmem:[%s12446_s5 + $0x10] sm:$0xff] }
 0x518   : > { %8949 = vmatprep.mubr.f32.mxu1 %v5230_v58  ;;  %v9704_v3 = vpack.c.bf16 %v5894_v21, %v5893_v25  ;;  %v5535_v58 = vld [vmem:[#allocation2 + $0x12a] sm:$0xff]  ;;  %v6654_v25 = vld [vmem:[%s10662_s16 + $0x21] sm:$0xff] }
 0x519   : > { %v6655_v21 = vld [vmem:[%s10662_s16 + $0x31] sm:$0xff] }
 0x51b   : > { %8950 = vmatmul.mubr.f32.gmra.mrb[6].mxu1 %v5231_v30  ;;  %v5536_v30 = vld [vmem:[#allocation2 + $0x13a] sm:$0xff] }
 0x51c   : > { %8952 = vmatprep.mubr.f32.mxu1 %v5232_v13  ;;  %v5537_v13 = vld [vmem:[#allocation2 + $0x142] sm:$0xff] }
 0x51f   : > { %8953 = vmatmul.mubr.f32.gmra.mrb[8].mxu1 %v5233_v62  ;;  %v5538_v62 = vld [vmem:[#allocation2 + $0x152] sm:$0xff] }
 0x520   : > { %8955 = vmatprep.mubr.f32.mxu1 %v5234_v61  ;;  %v5539_v61 = vld [vmem:[#allocation2 + $0x15a] sm:$0xff] }
 0x523   : > { %8956 = vmatmul.mubr.f32.gmra.mrb[10].mxu1 %v5235_v22  ;;  %v5540_v22 = vld [vmem:[#allocation2 + $0x16a] sm:$0xff] }
 0x524   : > { %8958 = vmatprep.mubr.f32.mxu1 %v5236_v14  ;;  %v5541_v14 = vld [vmem:[#allocation2 + $0x172] sm:$0xff] }
 0x527   : > { %8959 = vmatmul.mubr.f32.gmra.mrb[12].mxu1 %v5237_v49  ;;  %v5545_v49 = vld [vmem:[#allocation2 + $0x1a2] sm:$0xff] }
 0x528   : > { %8961 = vmatprep.mubr.f32.mxu1 %v5238_v60  ;;  %v5544_v60 = vld [vmem:[#allocation2 + $0x19a] sm:$0xff] }
 0x52b   : > { %8962 = vmatmul.mubr.f32.gmra.mrb[14].mxu1 %v5239_v59  ;;  %v6653_v59 = vld [vmem:[%s10662_s16 + $0x19] sm:$0xff] }
 0x52c   : > { %8996 = vmatprep.mubr.f32.mxu1 %v5514_v52  ;;  %v6656_v52 = vld [vmem:[%s10662_s16 + $0x39] sm:$0xff] }
 0x52f   : > { %8997 = vmatmul.mubr.f32.vlgmr.msra.gmra.mrb[16].mxu1 %v5515_v50  ;;  %v6660_v50 = vld [vmem:[%s10662_s16 + $0x69] sm:$0xff] }
 0x530   : > { %8999 = vmatprep.mubr.f32.mxu1 %v5516_v31  ;;  %9703 = vmatpush3.bf16.msra.mxu1 %v9700_v9  ;;  %v5534_v9 = vld [vmem:[#allocation2 + $0x122] sm:$0xff]  ;;  %v6663_v31 = vld [vmem:[%s10662_s16 + $0x91] sm:$0xff] }
 0x531   : > { %9705 = vmatprep.subr.bf16.mxu1 %v9704_v3 }
 0x533   : > { %9000 = vmatmul.mubr.f32.gmra.mrb[18].mxu1 %v5517_v44  ;;  %v6665_v44 = vld [vmem:[%s10662_s16 + $0xa9] sm:$0xff] }
 0x534   : > { %9002 = vmatprep.mubr.f32.mxu1 %v5518_v10  ;;  %9707 = vmatpush3.bf16.msra.mxu1 %v9704_v3  ;;  %v6659_v3 = vld [vmem:[%s10662_s16 + $0x61] sm:$0xff]  ;;  %v6668_v10 = vld [vmem:[%s10662_s16 + $0xc9] sm:$0xff] }
 0x535   : > { %9709 = vmatprep.subr.bf16.mxu1 %v9708_v51 }
 0x537   : > { %9003 = vmatmul.mubr.f32.gmra.mrb[20].mxu1 %v5519_v35  ;;  %v6670_v35 = vld [vmem:[%s10662_s16 + $0xe1] sm:$0xff] }
 0x538   : > { %9005 = vmatprep.mubr.f32.mxu1 %v5520_v45  ;;  %9711 = vmatpush3.bf16.msra.mxu1 %v9708_v51  ;;  %v6664_v51 = vld [vmem:[%s10662_s16 + $0x99] sm:$0xff]  ;;  %v6673_v45 = vld [vmem:[%s10662_s16 + $0x109] sm:$0xff] }
 0x539   : > { %9713 = vmatprep.subr.bf16.mxu1 %v9712_v42 }
 0x53b   : > { %9006 = vmatmul.mubr.f32.gmra.mrb[22].mxu1 %v5521_v1  ;;  %v6675_v1 = vld [vmem:[%s10662_s16 + $0x121] sm:$0xff] }
 0x53c   : > { %9008 = vmatprep.mubr.f32.mxu1 %v5522_v29  ;;  %9715 = vmatpush3.bf16.msra.mxu1 %v9712_v42  ;;  %v6669_v42 = vld [vmem:[%s10662_s16 + $0xd9] sm:$0xff]  ;;  %v6678_v29 = vld [vmem:[%s10662_s16 + $0x141] sm:$0xff] }
 0x53d   : > { %9717 = vmatprep.subr.bf16.mxu1 %v9716_v46 }
 0x53f   : > { %9009 = vmatmul.mubr.f32.gmra.mrb[24].mxu1 %v5523_v39  ;;  %v6680_v39 = vld [vmem:[%s10662_s16 + $0x159] sm:$0xff] }
 0x540   : > { %9011 = vmatprep.mubr.f32.mxu1 %v5524_v33  ;;  %9719 = vmatpush3.bf16.msra.mxu1 %v9716_v46  ;;  %v6674_v46 = vld [vmem:[%s10662_s16 + $0x111] sm:$0xff]  ;;  %v6683_v33 = vld [vmem:[%s10662_s16 + $0x181] sm:$0xff] }
 0x541   : > { %9721 = vmatprep.subr.bf16.mxu1 %v9720_v18 }
 0x543   : > { %9012 = vmatmul.mubr.f32.gmra.mrb[26].mxu1 %v5525_v11  ;;  %v12277_v11 = vld [vmem:[%s12445_s4] ss:$0 sm:$0xff] }
 0x544   : > { %9014 = vmatprep.mubr.f32.mxu1 %v5526_v43  ;;  %9723 = vmatpush3.bf16.msra.mxu1 %v9720_v18  ;;  %v6679_v18 = vld [vmem:[%s10662_s16 + $0x151] sm:$0xff]  ;;  %v9748_v12 = vadd.f32 %v12610_v19, %v12277_v11 }
 0x545   : > { %9725 = vmatprep.subr.bf16.mxu1 %v9724_v23  ;;  %v12611_v43 = vld [vmem:[#allocation10_spill] sm:$0xff] }
 0x547   : > { %9015 = vmatmul.mubr.f32.gmra.mrb[28].mxu1 %v5527_v20  ;;  %v9754_v20 = vadd.f32 %v12005_v54, %v12277_v11 }
 0x548   : > { %9017 = vmatprep.mubr.f32.mxu1 %v5528_v38  ;;  %9727 = vmatpush3.bf16.msra.mxu1 %v9724_v23  ;;  %v6684_v23 = vld [vmem:[%s10662_s16 + $0x189] sm:$0xff]  ;;  %v9757_v38 = vadd.f32 %v12277_v11, %v12007_v28  ;;  %v9763_v28 = vadd.f32 %v12277_v11, %v12013_v47 }
 0x549   : > { %9729 = vmatprep.subr.bf16.mxu1 %v9728_v8 }
 0x54b   : > { %9018 = vmatmul.mubr.f32.gmra.mrb[30].mxu1 %v5529_v37 }
 0x54c   : > { %9020 = vmatprep.mubr.f32.mxu1 %v5530_v34  ;;  %9731 = vmatpush3.bf16.msra.mxu1 %v9728_v8  ;;  %v9751_v8 = vadd.f32 %v12277_v11, %v12611_v43  ;;  %v12291_v34 = vld [vmem:[%s12447_s6] ss:$0 sm:$0xff] }
 0x54d   : > { %v9755_v54 = vadd.f32 %v9754_v20, %v12291_v34  ;;  %v12614_v43 = vld [vmem:[#allocation27_spill] sm:$0xff] }
 0x54f   : > { %9021 = vmatmul.mubr.f32.gmra.mrb[0].mxu1 %v5531_v56 }
 0x550   : > { %9023 = vmatprep.mubr.f32.mxu1 %v5532_v5 }
 0x553   : > { %9024 = vmatmul.mubr.f32.gmra.mrb[2].mxu1 %v5533_v57 }
 0x554   : > { %9026 = vmatprep.mubr.f32.mxu1 %v5534_v9  ;;  %v9760_v9 = vadd.f32 %v12011_v7, %v12277_v11  ;;  %v9766_v7 = vadd.f32 %v12017_v26, %v12277_v11 }
 0x557   : > { %9027 = vmatmul.mubr.f32.gmra.mrb[4].mxu1 %v5535_v58 }
 0x558   : > { %9029 = vmatprep.mubr.f32.mxu1 %v5536_v30 }
 0x55b   : > { %9030 = vmatmul.mubr.f32.gmra.mrb[6].mxu1 %v5537_v13 }
 0x55c   : > { %9032 = vmatprep.mubr.f32.mxu1 %v5538_v62  ;;  %v9758_v62 = vadd.f32 %v9757_v38, %v12291_v34 }
 0x55f   : > { %9033 = vmatmul.mubr.f32.gmra.mrb[8].mxu1 %v5539_v61 }
 0x560   : > { %9035 = vmatprep.mubr.f32.mxu1 %v5540_v22 }
 0x563   : > { %9036 = vmatmul.mubr.f32.gmra.mrb[10].mxu1 %v5541_v14 }
 0x564   : > { %9038 = vmatprep.mubr.f32.mxu1 %v12162_v2  ;;  %v6657_v2 = vld [vmem:[%s10662_s16 + $0x49] sm:$0xff] }
 0x567   : > { %9039 = vmatmul.mubr.f32.gmra.mrb[12].mxu1 %v12165_v4  ;;  %v6658_v4 = vld [vmem:[%s10662_s16 + $0x51] sm:$0xff] }
 0x568   : > { %9041 = vmatprep.mubr.f32.mxu1 %v5544_v60 }
 0x56b   : > { %9042 = vmatmul.mubr.f32.gmra.mrb[14].mxu1 %v5545_v49 }
 0x56c   : > { %9076 = vmatprep.mubr.f32.mxu1 %v6653_v59  ;;  %v9761_v59 = vadd.f32 %v9760_v9, %v12291_v34 }
 0x56f   : > { %9077 = vmatmul.mubr.f32.vlgmr.msra.gmra.mrb[16].mxu1 %v6654_v25  ;;  %v9769_v25 = vadd.f32 %v12277_v11, %v12019_v36  ;;  %v9775_v36 = vadd.f32 %v12277_v11, %v12025_v41  ;;  %v9781_v41 = vadd.f32 %v12277_v11, %v12031_v17 }
 0x570   : > { %9079 = vmatprep.mubr.f32.mxu1 %v6655_v21 }
 0x573   : > { %9080 = vmatmul.mubr.f32.gmra.mrb[18].mxu1 %v6656_v52 }
 0x574   : > { %9082 = vmatprep.mubr.f32.mxu1 %v6657_v2  ;;  %v9764_v2 = vadd.f32 %v9763_v28, %v12291_v34 }
 0x577   : > { %9083 = vmatmul.mubr.f32.gmra.mrb[20].mxu1 %v6658_v4 }
 0x578   : > { %9085 = vmatprep.mubr.f32.mxu1 %v6659_v3 }
 0x57b   : > { %9086 = vmatmul.mubr.f32.gmra.mrb[22].mxu1 %v6660_v50  ;;  %v9772_v50 = vadd.f32 %v12023_v40, %v12277_v11  ;;  %v9778_v40 = vadd.f32 %v12029_v27, %v12277_v11 }
 0x57c   : > { %9088 = vmatprep.mubr.f32.mxu1 %v6661_v48 }
 0x57f   : > { %9089 = vmatmul.mubr.f32.gmra.mrb[24].mxu1 %v6662_v63  ;;  %v9767_v63 = vadd.f32 %v9766_v7, %v12291_v34 }
 0x580   : > { %9091 = vmatprep.mubr.f32.mxu1 %v6663_v31 }
 0x583   : > { %9092 = vmatmul.mubr.f32.gmra.mrb[26].mxu1 %v6664_v51 }
 0x584   : > { %9094 = vmatprep.mubr.f32.mxu1 %v6665_v44  ;;  %v9770_v44 = vadd.f32 %v9769_v25, %v12291_v34 }
 0x587   : > { %9095 = vmatmul.mubr.f32.gmra.mrb[28].mxu1 %v6666_v24 }
 0x588   : > { %9097 = vmatprep.mubr.f32.mxu1 %v6667_v15 }
 0x58b   : > { %9098 = vmatmul.mubr.f32.gmra.mrb[30].mxu1 %v6668_v10 }
 0x58c   : > { %9100 = vmatprep.mubr.f32.mxu1 %v6669_v42 }
 0x58f   : > { %9101 = vmatmul.mubr.f32.gmra.mrb[0].mxu1 %v6670_v35  ;;  %v9773_v35 = vadd.f32 %v9772_v50, %v12291_v34 }
 0x590   : > { %9103 = vmatprep.mubr.f32.mxu1 %v6671_v32 }
 0x593   : > { %9104 = vmatmul.mubr.f32.gmra.mrb[2].mxu1 %v6672_v0 }
 0x594   : > { %9106 = vmatprep.mubr.f32.mxu1 %v6673_v45  ;;  %v9776_v45 = vadd.f32 %v9775_v36, %v12291_v34 }
 0x597   : > { %9107 = vmatmul.mubr.f32.gmra.mrb[4].mxu1 %v6674_v46 }
 0x598   : > { %9109 = vmatprep.mubr.f32.mxu1 %v6675_v1 }
 0x59b   : > { %9110 = vmatmul.mubr.f32.gmra.mrb[6].mxu1 %v6676_v6 }
 0x59c   : > { %9112 = vmatprep.mubr.f32.mxu1 %v6677_v16  ;;  %v12612_v16 = vld [vmem:[#allocation25_spill] sm:$0xff] }
 0x59d   : > { %v9784_v27 = vadd.f32 %v12612_v16, %v12277_v11 }
 0x59f   : > { %9113 = vmatmul.mubr.f32.gmra.mrb[8].mxu1 %v6678_v29  ;;  %v9785_v38 = vadd.f32 %v9784_v27, %v12291_v34 }
 0x5a0   : > { %9115 = vmatprep.mubr.f32.mxu1 %v6679_v18  ;;  %v9779_v18 = vadd.f32 %v9778_v40, %v12291_v34 }
 0x5a3   : > { %9116 = vmatmul.mubr.f32.gmra.mrb[10].mxu1 %v6680_v39  ;;  %v12613_v39 = vld [vmem:[#allocation26_spill] sm:$0xff] }
 0x5a4   : > { %9118 = vmatprep.mubr.f32.mxu1 %v6681_v53  ;;  %v9787_v17 = vadd.f32 %v12277_v11, %v12613_v39 }
 0x5a6   : > { %v9788_v9 = vadd.f32 %v9787_v17, %v12291_v34 }
 0x5a7   : > { %9119 = vmatmul.mubr.f32.gmra.mrb[12].mxu1 %v6682_v55 }
 0x5a8   : > { %9121 = vmatprep.mubr.f32.mxu1 %v6683_v33  ;;  %v9782_v33 = vadd.f32 %v9781_v41, %v12291_v34 }
 0x5ab   : > { %9122 = vmatmul.mubr.f32.gmra.mrb[14].mxu1 %v6684_v23 }
 0x642   : > { %v9078_v37 = vpop.f32.mrb[16].mxu1 }
 0x643   : > { %v9749_v56 = vadd.f32 %v9748_v12, %v9078_v37  ;;  %v5980_v5 = vpop.f32.mrb[17].mxu1  ;;  %v12615_v37 = vld [vmem:[#allocation28_spill] sm:$0xff] }
 0x644   : > { %v9752_v57 = vadd.f32 %v9751_v8, %v5980_v5  ;;  %v9790_v8 = vadd.f32 %v12614_v43, %v12277_v11 }
 0x645   : > { %v9750_v58 = vadd.f32 %v9749_v56, %v12291_v34  ;;  %v9793_v56 = vadd.f32 %v12277_v11, %v12615_v37 }
 0x646   : > { %v9753_v30 = vadd.f32 %v9752_v57, %v12291_v34  ;;  %v9081_v13 = vpop.f32.mrb[18].mxu1 }
 0x647   : > { %v6172_v61 = vmax.f32 %v9750_v58, 0.0  ;;  %v9756_v22 = vadd.f32 %v9755_v54, %v9081_v13  ;;  %v5990_v14 = vpop.f32.mrb[19].mxu1  ;;  %v9791_v13 = vadd.f32 %v9790_v8, %v12291_v34 }
 0x648   : > { %v6171_v60 = vmax.f32 %v9753_v30, 0.0  ;;  %v9759_v49 = vadd.f32 %v9758_v62, %v5990_v14 }
 0x649   : > { %6204 = vst [vmem:[%s12305_s22 + $0x8] sm:$0xff] %v6172_v61  ;;  %v6174_v47 = vmax.f32 %v9756_v22, 0.0  ;;  %v9794_v22 = vadd.f32 %v9793_v56, %v12291_v34 }
 0x64a   : > { %6203 = vst [vmem:[%s12305_s22] sm:$0xff] %v6171_v60  ;;  %v6173_v21 = vmax.f32 %v9759_v49, 0.0  ;;  %v9084_v52 = vpop.f32.mrb[20].mxu1  ;;  %v12352_v49 = vadd.f32 %v12291_v34, %v12277_v11 }
 0x64b   : > { %6206 = vst [vmem:[%s12305_s22 + $0x18] sm:$0xff] %v6174_v47  ;;  %v9762_v26 = vadd.f32 %v9761_v59, %v9084_v52  ;;  %v6000_v4 = vpop.f32.mrb[21].mxu1 }
 0x64c   : > { %6205 = vst [vmem:[%s12305_s22 + $0x10] sm:$0xff] %v6173_v21  ;;  %v9765_v3 = vadd.f32 %v9764_v2, %v6000_v4 }
 0x64d   : > { %v6176_v48 = vmax.f32 %v9762_v26, 0.0 }
 0x64e   : > { %v6175_v31 = vmax.f32 %v9765_v3, 0.0  ;;  %v9087_v51 = vpop.f32.mrb[22].mxu1 }
 0x64f   : > { %6208 = vst [vmem:[%s12305_s22 + $0x28] sm:$0xff] %v6176_v48  ;;  %v9768_v24 = vadd.f32 %v9767_v63, %v9087_v51  ;;  %v6010_v15 = vpop.f32.mrb[23].mxu1 }
 0x650   : > { %6207 = vst [vmem:[%s12305_s22 + $0x20] sm:$0xff] %v6175_v31  ;;  %v9771_v10 = vadd.f32 %v9770_v44, %v6010_v15 }
 0x651   : > { %v6178_v42 = vmax.f32 %v9768_v24, 0.0 }
 0x652   : > { %v6177_v32 = vmax.f32 %v9771_v10, 0.0  ;;  %v9090_v0 = vpop.f32.mrb[24].mxu1 }
 0x653   : > { %6210 = vst [vmem:[%s12305_s22 + $0x38] sm:$0xff] %v6178_v42  ;;  %v9774_v46 = vadd.f32 %v9773_v35, %v9090_v0  ;;  %v6020_v1 = vpop.f32.mrb[25].mxu1 }
 0x654   : > { %6209 = vst [vmem:[%s12305_s22 + $0x30] sm:$0xff] %v6177_v32  ;;  %v9777_v6 = vadd.f32 %v9776_v45, %v6020_v1 }
 0x655   : > { %v6180_v29 = vmax.f32 %v9774_v46, 0.0 }
 0x656   : > { %v6179_v53 = vmax.f32 %v9777_v6, 0.0  ;;  %v9093_v55 = vpop.f32.mrb[26].mxu1 }
 0x657   : > { %6212 = vst [vmem:[%s12305_s22 + $0x48] sm:$0xff] %v6180_v29  ;;  %v9780_v23 = vadd.f32 %v9779_v18, %v9093_v55  ;;  %v6030_v19 = vpop.f32.mrb[27].mxu1 }
 0x658   : > { %6211 = vst [vmem:[%s12305_s22 + $0x40] sm:$0xff] %v6179_v53  ;;  %v9783_v12 = vadd.f32 %v9782_v33, %v6030_v19 }
 0x659   : > { %v6182_v20 = vmax.f32 %v9780_v23, 0.0 }
 0x65a   : > { %v6181_v5 = vmax.f32 %v9783_v12, 0.0  ;;  %v9096_v57 = vpop.f32.mrb[28].mxu1 }
 0x65b   : > { %6214 = vst [vmem:[%s12305_s22 + $0x58] sm:$0xff] %v6182_v20  ;;  %v9786_v58 = vadd.f32 %v9785_v38, %v9096_v57  ;;  %v6040_v54 = vpop.f32.mrb[29].mxu1 }
 0x65c   : > { %6213 = vst [vmem:[%s12305_s22 + $0x50] sm:$0xff] %v6181_v5  ;;  %v9789_v28 = vadd.f32 %v9788_v9, %v6040_v54 }
 0x65d   : > { %v6184_v30 = vmax.f32 %v9786_v58, 0.0 }
 0x65e   : > { %v6183_v62 = vmax.f32 %v9789_v28, 0.0  ;;  %v9099_v61 = vpop.f32.mrb[30].mxu1 }
 0x65f   : > { %6216 = vst [vmem:[%s12305_s22 + $0x68] sm:$0xff] %v6184_v30  ;;  %v9792_v14 = vadd.f32 %v9791_v13, %v9099_v61  ;;  %v6050_v60 = vpop.f32.mrb[31].mxu1 }
 0x660   : > { %6215 = vst [vmem:[%s12305_s22 + $0x60] sm:$0xff] %v6183_v62  ;;  %v9795_v7 = vadd.f32 %v9794_v22, %v6050_v60 }
 0x661   : > { %v6186_v47 = vmax.f32 %v9792_v14, 0.0 }
 0x662   : > { %v6185_v59 = vmax.f32 %v9795_v7, 0.0  ;;  %v9102_v25 = vpop.f32.mrb[0].mxu1 }
 0x663   : > { %6218 = vst [vmem:[%s12305_s22 + $0x78] sm:$0xff] %v6186_v47  ;;  %v9797_v21 = vadd.f32 %v12352_v49, %v9102_v25  ;;  %v6060_v52 = vpop.f32.mrb[1].mxu1 }
 0x664   : > { %6217 = vst [vmem:[%s12305_s22 + $0x70] sm:$0xff] %v6185_v59  ;;  %v9799_v2 = vadd.f32 %v12352_v49, %v6060_v52 }
 0x665   : > { %v6188_v26 = vmax.f32 %v9797_v21, 0.0 }
 0x666   : > { %v6187_v4 = vmax.f32 %v9799_v2, 0.0  ;;  %v9105_v3 = vpop.f32.mrb[2].mxu1 }
 0x667   : > { %6220 = vst [vmem:[%s12305_s22 + $0x88] sm:$0xff] %v6188_v26  ;;  %v9801_v11 = vadd.f32 %v12352_v49, %v9105_v3  ;;  %v6070_v34 = vpop.f32.mrb[3].mxu1 }
 0x668   : > { %6219 = vst [vmem:[%s12305_s22 + $0x80] sm:$0xff] %v6187_v4  ;;  %v9803_v50 = vadd.f32 %v12352_v49, %v6070_v34 }
 0x669   : > { %v6190_v48 = vmax.f32 %v9801_v11, 0.0 }
 0x66a   : > { %v6189_v63 = vmax.f32 %v9803_v50, 0.0  ;;  %v9108_v36 = vpop.f32.mrb[4].mxu1 }
 0x66b   : > { %6222 = vst [vmem:[%s12305_s22 + $0x98] sm:$0xff] %v6190_v48  ;;  %v9805_v31 = vadd.f32 %v12352_v49, %v9108_v36  ;;  %v6080_v51 = vpop.f32.mrb[5].mxu1 }
 0x66c   : > { %6221 = vst [vmem:[%s12305_s22 + $0x90] sm:$0xff] %v6189_v63  ;;  %v9807_v44 = vadd.f32 %v12352_v49, %v6080_v51 }
 0x66d   : > { %v6192_v24 = vmax.f32 %v9805_v31, 0.0 }
 0x66e   : > { %v6191_v15 = vmax.f32 %v9807_v44, 0.0  ;;  %v9111_v10 = vpop.f32.mrb[6].mxu1 }
 0x66f   : > { %6224 = vst [vmem:[%s12305_s22 + $0xa8] sm:$0xff] %v6192_v24  ;;  %v9809_v40 = vadd.f32 %v12352_v49, %v9111_v10  ;;  %v6090_v42 = vpop.f32.mrb[7].mxu1 }
 0x670   : > { %6223 = vst [vmem:[%s12305_s22 + $0xa0] sm:$0xff] %v6191_v15  ;;  %v9811_v35 = vadd.f32 %v12352_v49, %v6090_v42 }
 0x671   : > { %v6194_v41 = vmax.f32 %v9809_v40, 0.0 }
 0x672   : > { %v6193_v32 = vmax.f32 %v9811_v35, 0.0  ;;  %v9114_v0 = vpop.f32.mrb[8].mxu1 }
 0x673   : > { %6226 = vst [vmem:[%s12305_s22 + $0xb8] sm:$0xff] %v6194_v41  ;;  %v9813_v45 = vadd.f32 %v12352_v49, %v9114_v0  ;;  %v6100_v46 = vpop.f32.mrb[9].mxu1 }
 0x674   : > { %6225 = vst [vmem:[%s12305_s22 + $0xb0] sm:$0xff] %v6193_v32  ;;  %v9815_v1 = vadd.f32 %v12352_v49, %v6100_v46 }
 0x675   : > { %v6196_v6 = vmax.f32 %v9813_v45, 0.0 }
 0x676   : > { %v6195_v16 = vmax.f32 %v9815_v1, 0.0  ;;  %v9117_v27 = vpop.f32.mrb[10].mxu1 }
 0x677   : > { %6228 = vst [vmem:[%s12305_s22 + $0xc8] sm:$0xff] %v6196_v6  ;;  %v9817_v29 = vadd.f32 %v12352_v49, %v9117_v27  ;;  %v6110_v18 = vpop.f32.mrb[11].mxu1 }
 0x678   : > { %6227 = vst [vmem:[%s12305_s22 + $0xc0] sm:$0xff] %v6195_v16  ;;  %v9819_v39 = vadd.f32 %v12352_v49, %v6110_v18 }
 0x679   : > { %v6198_v17 = vmax.f32 %v9817_v29, 0.0 }
 0x67a   : > { %v6197_v53 = vmax.f32 %v9819_v39, 0.0  ;;  %v9120_v55 = vpop.f32.mrb[12].mxu1 }
 0x67b   : > { %6230 = vst [vmem:[%s12305_s22 + $0xd8] sm:$0xff] %v6198_v17  ;;  %v9821_v33 = vadd.f32 %v12352_v49, %v9120_v55  ;;  %v6120_v23 = vpop.f32.mrb[13].mxu1 }
 0x67c   : > { %6229 = vst [vmem:[%s12305_s22 + $0xd0] sm:$0xff] %v6197_v53  ;;  %v9823_v19 = vadd.f32 %v12352_v49, %v6120_v23 }
 0x67d   : > { %v6200_v12 = vmax.f32 %v9821_v33, 0.0 }
 0x67e   : > { %v6199_v43 = vmax.f32 %v9823_v19, 0.0  ;;  %v9123_v8 = vpop.f32.mrb[14].mxu1 }
 0x67f   : > { %6232 = vst [vmem:[%s12305_s22 + $0xe8] sm:$0xff] %v6200_v12  ;;  %v9825_v20 = vadd.f32 %v12352_v49, %v9123_v8  ;;  %v6130_v38 = vpop.f32.mrb[15].mxu1 }
 0x680   : > { %6231 = vst [vmem:[%s12305_s22 + $0xe0] sm:$0xff] %v6199_v43  ;;  %v9827_v37 = vadd.f32 %v12352_v49, %v6130_v38 }
 0x681   : > { %v6202_v56 = vmax.f32 %v9825_v20, 0.0 }
 0x682   : > { %v6201_v5 = vmax.f32 %v9827_v37, 0.0 }
 0x683   : > { %6234 = vst [vmem:[%s12305_s22 + $0xf8] sm:$0xff] %v6202_v56 }
 0x684   : > { %6233 = vst [vmem:[%s12305_s22 + $0xf0] sm:$0xff] %v6201_v5 }
 0x685   : > { %10454 = shalt.err (!%p10451_p7)
}
 0x686   : > { %s10455_s21 = scalar_lea.hbm %s12392_s9, 4096  ;;  %s10459_s13 = scalar_lea.hbm %s12448_s7, 8192 }
 0x687   : > { %p10456_p8 = scmp.ne.s32.totalorder %s12392_s9, %s10455_s21  ;;  %p10460_p1 = scmp.lt.u32.totalorder %s12392_s9, %s12448_s7 }
 0x688   : > { %p10461_p0 = scmp.lt.u32.totalorder %s10459_s13, %s10455_s21  ;;  %p10463_p6 = scmp.lt.u32.totalorder %s10455_s21, %s12392_s9 }
 0x689   : > { %p10457_p11 = pnand %p10456_p8, %p12616_p9 }
 0x68a   : > { %p10462_p5 = por %p10461_p0, %p10460_p1 }
 0x68b   : > { %p10458_p13 = pneg %p10457_p11 }
 0x68c   : > { %p10464_p10 = por %p10463_p6, %p10462_p5 }
 0x68e   : > { %p10465_p12 = pnand %p10464_p10, %p10458_p13 }
 0x690   : > { %10468 = shalt.err (!%p10465_p12)
}
 0x691   : > { %s10514_s29 = smov 128   ;;  %s10515_s8 = smov 8  }
 0x692   : > { %10361 = dma.vmem_to_hbm [thread:$0]  (%p12616_p9), %s12394_s23, 4096, %s12392_s9, %s12400_s28, %s10514_s29, %s10514_s29, %s10515_s8  }
 0x693 PF: > { %p10373_p2 = scmp.ge.s32.totalorder %s10507_s27, 2  ;;  %s6264_s14 = sand.u32 1, %s10495_s24  }
 0x694   : > { %p12617_p3 = scmp.ne.s32.totalorder %s12502_s12, 0  ;;  %s6265_s17 = scalar_lea.sflag [#allocation5], %s6264_s14 }
 0x696   : > { %p10368_p4 = pnand %p10373_p2, %p12617_p3 }
 0x698   : > { %10490 = dma.done.wait (!%p10368_p4), %s6265_s17, 4096  }
 0x699   : > { %10492 = vsyncadd (!%p10368_p4), %s6265_s17, 4294963200  ;;  %p18_p7 = scmp.ge.s32.totalorder %s10581_s30, 4   ;;  %s12618_s24 = smov %s10499_s25 }
 0x69a   : > { %s12619_s25 = smov %s10503_s26  ;;  %s12620_s26 = smov %s10592_s10 }
 0x69b   : > { %s12621_s27 = smov %s10581_s30  ;;  %20 = sbr.rel (!%p18_p7) target bundleno = 4 (0x4), region = 109 }
 0x6a2   :  { %6270 = vsyncpa [#allocation4], 1 }
 0x6a3   :  { %6272 = vsyncpa [#allocation4 + $0x1], 1 }
 0x6a4   :  { %6273 = vsyncpa [#allocation5], 1 }
 0x6a5   :  { %6275 = vsyncpa [#allocation5 + $0x1], 1 }

</bundles_post_ra>
